<compile_context>
chip_gen: v7x
topology: tpu7x:2x2x1
jax: 0.10.0
libtpu: 0.0.40
codegen_flags: <defaults>
</compile_context>

<pallas_src>
import numpy as np
import jax
import jax.numpy as jnp
from jax.experimental import pallas as pl
from jax.experimental.pallas import tpu as pltpu

NEG_SLOPE = 0.01       # F.leaky_relu default slope
EPS_NORM = 1e-12       # F.normalize default eps
EPS_SOFTMAX = 1e-16    # PyG softmax denominator eps
LANE = 128


def _round_up(x, m):
    return ((x + m - 1) // m) * m


def _leaky(x):
    return jnp.where(x >= 0, x, NEG_SLOPE * x)


def _row_l2_normalize(x):
    nrm = jnp.sqrt(jnp.sum(x * x, axis=-1, keepdims=True))
    return x / jnp.maximum(nrm, EPS_NORM)


# ---------------------------- fused Pallas kernel ----------------------------

def _make_cgcn_kernel(num_user, num_item, u_pad, i_pad, dim_c, num_routing):
    """Build the fused CGCN forward kernel (static sizes captured by closure)."""
    dc = dim_c  # spare zero lane that carries the folded softmax denominator

    def kernel(feat_ref, w_ref, b_ref, pref_ref,
               su_ref, si_ref, du_ref, di_ref,
               dtu_ref, dti_ref, stu_ref, sti_ref,
               out_ref, alpha_ref, x_ref):
        c_pad = x_ref.shape[1]
        col = jax.lax.broadcasted_iota(jnp.int32, (1, c_pad), 1)
        col_mask = (col < dc).astype(jnp.float32)   # 1 on real embedding lanes
        e_dc = (col == dc).astype(jnp.float32)      # 1 on the denominator lane

        # ---- fused preprocessing --------------------------------------------
        # Zero the whole node buffer first: padded rows must not be garbage/NaN
        # because every gather contracts over them (with zero one-hot weights).
        x_ref[...] = jnp.zeros_like(x_ref)
        # features = F.normalize(F.leaky_relu(MLP(features)))   -> item rows
        h = jnp.dot(feat_ref[...], w_ref[...],
                    preferred_element_type=jnp.float32) + b_ref[...]
        x_ref[pl.ds(u_pad, num_item), :] = _row_l2_normalize(_leaky(h))
        # preference = F.normalize(preference)                  -> user rows
        x_ref[pl.ds(0, num_user), :] = _row_l2_normalize(pref_ref[...])

        su = su_ref[...]            # (E, U) bf16 one-hot: src that are users
        du = du_ref[...]            # (E, U) bf16 one-hot: dst that are users
        dtu = dtu_ref[...]          # (U, E) bf16 transposed dst-user one-hot

        # ---- loop-invariant item halves of the per-edge gathers --------------
        x_item_bf = x_ref[pl.ds(u_pad, i_pad), :].astype(jnp.bfloat16)
        xj_item = jnp.dot(si_ref[...], x_item_bf,
                          preferred_element_type=jnp.float32)       # (E, c_pad)
        xi_item = jnp.dot(di_ref[...], x_item_bf,
                          preferred_element_type=jnp.float32)       # (E, c_pad)

        def gather(x_u_bf):
            x_j = jnp.dot(su, x_u_bf, preferred_element_type=jnp.float32) + xj_item
            x_i = jnp.dot(du, x_u_bf, preferred_element_type=jnp.float32) + xi_item
            # x rows are L2-normalized -> logits bounded in [-1, 1]; exp() is
            # safe without the per-segment max subtraction.
            p = jnp.exp(jnp.sum(x_i * x_j, axis=-1, keepdims=True))  # (E, 1)
            return x_j, x_i, p

        # ---- routing iterations (only user rows are updated) -----------------
        def routing_body(_, carry):
            x_u = x_ref[pl.ds(0, u_pad), :]
            x_j, _, p = gather(x_u.astype(jnp.bfloat16))
            # Denominator folded into lane dc (x_j lane dc is guaranteed zero):
            # one scatter matmul yields numerator AND denominator.
            m = (p * (x_j + e_dc)).astype(jnp.bfloat16)              # (E, c_pad)
            s = jnp.dot(dtu, m, preferred_element_type=jnp.float32)  # (U, c_pad)
            den = s[:, dc:dc + 1]
            x_hat_u = s * (1.0 / (den + EPS_SOFTMAX)) * col_mask
            x_ref[pl.ds(0, u_pad), :] = _row_l2_normalize(x_u + x_hat_u)
            return carry

        jax.lax.fori_loop(0, num_routing, routing_body, 0)

        # ---- final pass over the bidirectional edge set -----------------------
        # Dot-product scores are symmetric, so the reversed-edge half reuses p;
        # a reversed edge's target is src, so its scatter goes through S^T.
        # No (2E, N) one-hot is ever materialised.
        x_u = x_ref[pl.ds(0, u_pad), :]
        x_item = x_ref[pl.ds(u_pad, i_pad), :]
        x_j, x_i, p = gather(x_u.astype(jnp.bfloat16))
        m_j = (p * (x_j + e_dc)).astype(jnp.bfloat16)
        m_i = (p * (x_i + e_dc)).astype(jnp.bfloat16)
        s_user = (jnp.dot(dtu, m_j, preferred_element_type=jnp.float32)
                  + jnp.dot(stu_ref[...], m_i, preferred_element_type=jnp.float32))
        s_item = (jnp.dot(dti_ref[...], m_j, preferred_element_type=jnp.float32)
                  + jnp.dot(sti_ref[...], m_i, preferred_element_type=jnp.float32))
        inv_u = 1.0 / (s_user[:, dc:dc + 1] + EPS_SOFTMAX)           # (U, 1)
        inv_i = 1.0 / (s_item[:, dc:dc + 1] + EPS_SOFTMAX)           # (I, 1)
        x_hat_u = s_user * inv_u * col_mask
        x_hat_i = s_item * inv_i * col_mask
        out_ref[pl.ds(0, u_pad), :] = x_u + _leaky(x_hat_u)
        out_ref[pl.ds(u_pad, i_pad), :] = x_item + _leaky(x_hat_i)

        # ---- per-edge attention weights, lane-dense (2, E_pad) ----------------
        inv_u_bf = inv_u.astype(jnp.bfloat16)
        inv_i_bf = inv_i.astype(jnp.bfloat16)
        inv_dst = (jnp.dot(du, inv_u_bf, preferred_element_type=jnp.float32)
                   + jnp.dot(di_ref[...], inv_i_bf, preferred_element_type=jnp.float32))
        inv_src = (jnp.dot(su, inv_u_bf, preferred_element_type=jnp.float32)
                   + jnp.dot(si_ref[...], inv_i_bf, preferred_element_type=jnp.float32))
        lane = jax.lax.broadcasted_iota(jnp.int32, (1, LANE), 1)
        # column 0 = alpha for original edges, column 1 = reversed edges,
        # then one fully-tiled f32 transpose gives the lane-dense (2, E) rows.
        alpha_cols = ((p * inv_dst) * (lane == 0).astype(jnp.float32)
                      + (p * inv_src) * (lane == 1).astype(jnp.float32))  # (E, 128)
        alpha_ref[...] = jnp.transpose(alpha_cols)[0:2, :]

    return kernel


# ---------------------------- wrapper ----------------------------

def _pick_vmem_limit():
    cap = 64 * 1024 * 1024
    try:
        info = pltpu.get_tpu_info()
        cap = int(getattr(info, "vmem_capacity_bytes", cap))
    except Exception:
        pass
    # Leave headroom for Mosaic internal scratch:
    # v5e/v6e (128 MiB) -> ~112 MiB, v7x (64 MiB) -> ~48 MiB.
    return max(32 * 1024 * 1024, min(cap - 16 * 1024 * 1024, 112 * 1024 * 1024))


def cgcn_forward(features_raw, mlp_w, mlp_b, preference_param, edge_index,
                 num_user, num_routing):
    """Fused CGCN forward.  Returns (x + leaky(x_hat), alpha) like the module."""
    src = np.asarray(edge_index[0]).astype(np.int32)
    dst = np.asarray(edge_index[1]).astype(np.int32)
    # GATConv.forward: remove_self_loops(edge_index)  (host-side, data-dependent)
    keep = src != dst
    src, dst = src[keep], dst[keep]

    num_item, dim_feat = features_raw.shape
    dim_c = mlp_w.shape[1]
    n_edges = int(src.shape[0])

    u_pad = _round_up(max(num_user, 1), LANE)
    i_pad = _round_up(max(num_item, 1), LANE)
    e_pad = _round_up(max(n_edges, 1), LANE)
    c_pad = _round_up(dim_c + 1, LANE)   # +1 spare zero lane carries the softmax denom
    f_pad = _round_up(dim_feat, LANE)
    n_pad = u_pad + i_pad

    # Zero-pad dense params; padded rows/cols stay exactly zero through every op.
    w_p = jnp.zeros((f_pad, c_pad), jnp.float32).at[:dim_feat, :dim_c].set(
        jnp.asarray(mlp_w, jnp.float32))
    b_p = jnp.zeros((1, c_pad), jnp.float32).at[:, :dim_c].set(
        jnp.asarray(mlp_b, jnp.float32).reshape(1, dim_c))
    pref_p = jnp.zeros((num_user, c_pad), jnp.float32).at[:, :dim_c].set(
        jnp.asarray(preference_param, jnp.float32))
    feat_p = jnp.zeros((num_item, f_pad), jnp.float32).at[:, :dim_feat].set(
        jnp.asarray(features_raw, jnp.float32))

    # Split (user/item) one-hot gather operands, padded to lane-dense widths.
    # Node remap: user u -> row u, item i -> row u_pad + i.  0/1 exact in bf16.
    src_u = np.where(src < num_user, src, -1)
    src_i = np.where(src >= num_user, src - num_user, -1)
    dst_u = np.where(dst < num_user, dst, -1)
    dst_i = np.where(dst >= num_user, dst - num_user, -1)

    def one_hot_pad(idx, width):
        oh = np.zeros((e_pad, width), np.float32)
        rows = np.arange(n_edges)
        valid = idx >= 0
        oh[rows[valid], idx[valid]] = 1.0
        return jnp.asarray(oh, jnp.bfloat16)

    s_u = one_hot_pad(src_u, u_pad)          # (E_pad, U_pad) gather src, user half
    s_i = one_hot_pad(src_i, i_pad)          # (E_pad, I_pad) gather src, item half
    d_u = one_hot_pad(dst_u, u_pad)          # (E_pad, U_pad) gather dst, user half
    d_i = one_hot_pad(dst_i, i_pad)          # (E_pad, I_pad) gather dst, item half
    # Pre-transposed scatter one-hots (edges on the 128-lane axis): no in-kernel
    # relayout for the edge-axis contraction.
    dt_u = jnp.transpose(d_u)                # (U_pad, E_pad)
    dt_i = jnp.transpose(d_i)                # (I_pad, E_pad)
    st_u = jnp.transpose(s_u)                # (U_pad, E_pad)
    st_i = jnp.transpose(s_i)                # (I_pad, E_pad)

    kernel = _make_cgcn_kernel(num_user, num_item, u_pad, i_pad, dim_c, num_routing)
    out_p, alpha_p = pl.pallas_call(
        kernel,
        out_shape=(jax.ShapeDtypeStruct((n_pad, c_pad), jnp.float32),
                   jax.ShapeDtypeStruct((2, e_pad), jnp.float32)),
        scratch_shapes=[pltpu.VMEM((n_pad, c_pad), jnp.float32)],
        compiler_params=pltpu.CompilerParams(vmem_limit_bytes=_pick_vmem_limit()),
    )(feat_p, w_p, b_p, pref_p, s_u, s_i, d_u, d_i, dt_u, dt_i, st_u, st_i)

    out = jnp.concatenate([out_p[:num_user, :dim_c],
                           out_p[u_pad:u_pad + num_item, :dim_c]], axis=0)
    alpha = jnp.concatenate([alpha_p[0, :n_edges], alpha_p[1, :n_edges]],
                            axis=0)[:, None]
    return out, alpha


# ---------------------------- pure-JAX reference ----------------------------

def _gat_ref(x, src, dst, n_nodes):
    x_j = x[src]
    x_i = x[dst]
    a = jnp.sum(x_i * x_j, axis=-1)
    m = jax.ops.segment_max(a, dst, num_segments=n_nodes)
    m = jnp.where(jnp.isfinite(m), m, 0.0)
    p = jnp.exp(a - m[dst])
    den = jax.ops.segment_sum(p, dst, num_segments=n_nodes)
    alpha = p / (den[dst] + EPS_SOFTMAX)
    out = jax.ops.segment_sum(alpha[:, None] * x_j, dst, num_segments=n_nodes)
    return out, alpha


def cgcn_ref(features_raw, mlp_w, mlp_b, preference_param, edge_index,
             num_user, num_routing):
    src, dst = edge_index
    n_nodes = num_user + features_raw.shape[0]
    features = _row_l2_normalize(_leaky(features_raw @ mlp_w + mlp_b))
    preference = _row_l2_normalize(preference_param)
    for _ in range(num_routing):
        x = jnp.concatenate([preference, features], axis=0)
        x_hat_1, _ = _gat_ref(x, src, dst, n_nodes)
        preference = _row_l2_normalize(preference + x_hat_1[:num_user])
    x = jnp.concatenate([preference, features], axis=0)
    src_bi = jnp.concatenate([src, dst])
    dst_bi = jnp.concatenate([dst, src])
    x_hat_1, alpha = _gat_ref(x, src_bi, dst_bi, n_nodes)
    return x + _leaky(x_hat_1), alpha[:, None]


# ---------------------------- main ----------------------------

if __name__ == "__main__":
    num_user, num_item = 8, 8
    dim_feat, dim_C = 32, 16
    num_routing = 3

    key = jax.random.PRNGKey(0)
    k1, k2, k3, k4 = jax.random.split(key, 4)

    # self.features  (num_item, dim_feat)
    features_raw = jax.random.normal(k1, (num_item, dim_feat), jnp.float32)
    # self.preference: xavier_normal_ of (num_user, dim_C)
    xavier_std = (2.0 / (num_user + dim_C)) ** 0.5
    preference = jax.random.normal(k2, (num_user, dim_C), jnp.float32) * xavier_std
    # self.MLP = Linear(dim_feat, dim_C); weight stored pre-transposed (dim_feat, dim_C)
    mlp_w = jax.random.normal(k3, (dim_feat, dim_C), jnp.float32) * (1.0 / dim_feat ** 0.5)
    mlp_b = jax.random.normal(k4, (1, dim_C), jnp.float32) * 0.01

    # edge_index: user<->item interactions (both directions, no self loops).
    srcs, dsts = [], []
    for u in range(num_user):
        for it in (u % num_item, (3 * u + 1) % num_item):
            srcs += [u, num_user + it]
            dsts += [num_user + it, u]
    src = jnp.asarray(np.array(srcs, dtype=np.int32))
    dst = jnp.asarray(np.array(dsts, dtype=np.int32))
    edge_index = (src, dst)

    out, alpha = cgcn_forward(features_raw, mlp_w, mlp_b, preference,
                              edge_index, num_user, num_routing)
    out, alpha = jax.block_until_ready((out, alpha))

    out_ref, alpha_ref = cgcn_ref(features_raw, mlp_w, mlp_b, preference,
                                  edge_index, num_user, num_routing)
    # bf16 one-hot / gather operands on the MXU (f32 accumulation) => tolerance
    # is set to 3e-2 vs the pure-f32 reference.
    np.testing.assert_allclose(np.asarray(out), np.asarray(out_ref),
                               rtol=3e-2, atol=3e-2)
    np.testing.assert_allclose(np.asarray(alpha), np.asarray(alpha_ref),
                               rtol=3e-2, atol=3e-2)

    print("KERNEL_OK")
</pallas_src>

<mosaic_0001>
module attributes {stable_mosaic.version = 11 : i64} {
  func.func @kernel(%arg0: memref<8x128xf32, #tpu.memory_space<vmem>>, %arg1: memref<128x128xf32, #tpu.memory_space<vmem>>, %arg2: memref<1x128xf32, #tpu.memory_space<vmem>>, %arg3: memref<8x128xf32, #tpu.memory_space<vmem>>, %arg4: memref<128x128xbf16, #tpu.memory_space<vmem>>, %arg5: memref<128x128xbf16, #tpu.memory_space<vmem>>, %arg6: memref<128x128xbf16, #tpu.memory_space<vmem>>, %arg7: memref<128x128xbf16, #tpu.memory_space<vmem>>, %arg8: memref<128x128xbf16, #tpu.memory_space<vmem>>, %arg9: memref<128x128xbf16, #tpu.memory_space<vmem>>, %arg10: memref<128x128xbf16, #tpu.memory_space<vmem>>, %arg11: memref<128x128xbf16, #tpu.memory_space<vmem>>, %arg12: memref<256x128xf32, #tpu.memory_space<vmem>>, %arg13: memref<2x128xf32, #tpu.memory_space<vmem>>, %arg14: memref<256x128xf32, #tpu.memory_space<vmem>>) attributes {dimension_semantics = [], scalar_prefetch = 0 : i64, scratch_operands = 1 : i64, tpu.core_type = #tpu.core_type<tc>} {
    %0 = tpu.iota {dimensions = array<i32: 1>} : vector<1x128xi32>
    %c16_i32 = arith.constant 16 : i32
    %1 = vector.broadcast %c16_i32 : i32 to vector<1x128xi32>
    %2 = arith.cmpi slt, %0, %1 : vector<1x128xi32>
    %3 = arith.extui %2 : vector<1x128xi1> to vector<1x128xi32>
    %4 = arith.sitofp %3 : vector<1x128xi32> to vector<1x128xf32>
    %c16_i32_0 = arith.constant 16 : i32
    %5 = vector.broadcast %c16_i32_0 : i32 to vector<1x128xi32>
    %6 = arith.cmpi eq, %0, %5 : vector<1x128xi32>
    %7 = arith.extui %6 : vector<1x128xi1> to vector<1x128xi32>
    %8 = arith.sitofp %7 : vector<1x128xi32> to vector<1x128xf32>
    %cst = arith.constant 0.000000e+00 : f32
    %9 = vector.broadcast %cst : f32 to vector<256x128xf32>
    %c0 = arith.constant 0 : index
    %c0_1 = arith.constant 0 : index
    %10 = vector.load %arg14[%c0, %c0_1] : memref<256x128xf32, #tpu.memory_space<vmem>>, vector<256x128xf32>
    tpu.vector_store %arg14[%c0, %c0_1], %9 {strides = array<i32>} : memref<256x128xf32, #tpu.memory_space<vmem>>, vector<256x128xf32>,
    %c0_2 = arith.constant 0 : index
    %c0_3 = arith.constant 0 : index
    %11 = vector.load %arg0[%c0_2, %c0_3] : memref<8x128xf32, #tpu.memory_space<vmem>>, vector<8x128xf32>
    %c0_4 = arith.constant 0 : index
    %c0_5 = arith.constant 0 : index
    %12 = vector.load %arg1[%c0_4, %c0_5] : memref<128x128xf32, #tpu.memory_space<vmem>>, vector<128x128xf32>
    %cst_6 = arith.constant dense<0.000000e+00> : vector<8x128xf32>
    %13 = tpu.matmul %11, %12, %cst_6 {dimension_numbers = #tpu.dot_dimension_numbers<[1], [0], [0], [1], [0, 0, 1, 1], [], []>} : vector<8x128xf32>, vector<128x128xf32>, vector<8x128xf32> -> vector<8x128xf32>
    %c0_7 = arith.constant 0 : index
    %c0_8 = arith.constant 0 : index
    %14 = vector.load %arg2[%c0_7, %c0_8] : memref<1x128xf32, #tpu.memory_space<vmem>>, vector<1x128xf32>
    %15 = vector.broadcast %14 : vector<1x128xf32> to vector<8x128xf32>
    %16 = arith.addf %13, %15 : vector<8x128xf32>
    %cst_9 = arith.constant 0.000000e+00 : f32
    %17 = vector.broadcast %cst_9 : f32 to vector<8x128xf32>
    %18 = arith.cmpf oge, %16, %17 : vector<8x128xf32>
    %cst_10 = arith.constant 0.00999999977 : f32
    %19 = vector.broadcast %cst_10 : f32 to vector<8x128xf32>
    %20 = arith.mulf %19, %16 : vector<8x128xf32>
    %21 = arith.select %18, %16, %20 : vector<8x128xi1>, vector<8x128xf32>
    %22 = arith.mulf %21, %21 : vector<8x128xf32>
    %cst_11 = arith.constant dense<0.000000e+00> : vector<8xf32>
    %23 = vector.multi_reduction <add>, %22, %cst_11 [1] : vector<8x128xf32> to vector<8xf32>
    %24 = vector.shape_cast %23 : vector<8xf32> to vector<8x1xf32>
    %25 = math.sqrt %24 : vector<8x1xf32>
    %cst_12 = arith.constant 9.99999996E-13 : f32
    %26 = vector.broadcast %cst_12 : f32 to vector<8x1xf32>
    %27 = arith.maximumf %25, %26 : vector<8x1xf32>
    %28 = vector.broadcast %27 : vector<8x1xf32> to vector<8x128xf32>
    %29 = arith.divf %21, %28 : vector<8x128xf32>
    %c128 = arith.constant 128 : index
    %c0_13 = arith.constant 0 : index
    %30 = vector.load %arg14[%c128, %c0_13] : memref<256x128xf32, #tpu.memory_space<vmem>>, vector<8x128xf32>
    tpu.vector_store %arg14[%c128, %c0_13], %29 {strides = array<i32>} : memref<256x128xf32, #tpu.memory_space<vmem>>, vector<8x128xf32>,
    %c0_14 = arith.constant 0 : index
    %c0_15 = arith.constant 0 : index
    %31 = vector.load %arg3[%c0_14, %c0_15] : memref<8x128xf32, #tpu.memory_space<vmem>>, vector<8x128xf32>
    %32 = arith.mulf %31, %31 : vector<8x128xf32>
    %cst_16 = arith.constant dense<0.000000e+00> : vector<8xf32>
    %33 = vector.multi_reduction <add>, %32, %cst_16 [1] : vector<8x128xf32> to vector<8xf32>
    %34 = vector.shape_cast %33 : vector<8xf32> to vector<8x1xf32>
    %35 = math.sqrt %34 : vector<8x1xf32>
    %cst_17 = arith.constant 9.99999996E-13 : f32
    %36 = vector.broadcast %cst_17 : f32 to vector<8x1xf32>
    %37 = arith.maximumf %35, %36 : vector<8x1xf32>
    %38 = vector.broadcast %37 : vector<8x1xf32> to vector<8x128xf32>
    %39 = arith.divf %31, %38 : vector<8x128xf32>
    %c0_18 = arith.constant 0 : index
    %c0_19 = arith.constant 0 : index
    %40 = vector.load %arg14[%c0_18, %c0_19] : memref<256x128xf32, #tpu.memory_space<vmem>>, vector<8x128xf32>
    tpu.vector_store %arg14[%c0_18, %c0_19], %39 {strides = array<i32>} : memref<256x128xf32, #tpu.memory_space<vmem>>, vector<8x128xf32>,
    %c0_20 = arith.constant 0 : index
    %c0_21 = arith.constant 0 : index
    %41 = vector.load %arg4[%c0_20, %c0_21] : memref<128x128xbf16, #tpu.memory_space<vmem>>, vector<128x128xbf16>
    %c0_22 = arith.constant 0 : index
    %c0_23 = arith.constant 0 : index
    %42 = vector.load %arg6[%c0_22, %c0_23] : memref<128x128xbf16, #tpu.memory_space<vmem>>, vector<128x128xbf16>
    %c0_24 = arith.constant 0 : index
    %c0_25 = arith.constant 0 : index
    %43 = vector.load %arg8[%c0_24, %c0_25] : memref<128x128xbf16, #tpu.memory_space<vmem>>, vector<128x128xbf16>
    %c128_26 = arith.constant 128 : index
    %c0_27 = arith.constant 0 : index
    %44 = vector.load %arg14[%c128_26, %c0_27] : memref<256x128xf32, #tpu.memory_space<vmem>>, vector<128x128xf32>
    %45 = arith.truncf %44 : vector<128x128xf32> to vector<128x128xbf16>
    %c0_28 = arith.constant 0 : index
    %c0_29 = arith.constant 0 : index
    %46 = vector.load %arg5[%c0_28, %c0_29] : memref<128x128xbf16, #tpu.memory_space<vmem>>, vector<128x128xbf16>
    %cst_30 = arith.constant dense<0.000000e+00> : vector<128x128xf32>
    %47 = tpu.matmul %46, %45, %cst_30 {dimension_numbers = #tpu.dot_dimension_numbers<[1], [0], [0], [1], [0, 0, 1, 1], [], []>} : vector<128x128xbf16>, vector<128x128xbf16>, vector<128x128xf32> -> vector<128x128xf32>
    %c0_31 = arith.constant 0 : index
    %c0_32 = arith.constant 0 : index
    %48 = vector.load %arg7[%c0_31, %c0_32] : memref<128x128xbf16, #tpu.memory_space<vmem>>, vector<128x128xbf16>
    %cst_33 = arith.constant dense<0.000000e+00> : vector<128x128xf32>
    %49 = tpu.matmul %48, %45, %cst_33 {dimension_numbers = #tpu.dot_dimension_numbers<[1], [0], [0], [1], [0, 0, 1, 1], [], []>} : vector<128x128xbf16>, vector<128x128xbf16>, vector<128x128xf32> -> vector<128x128xf32>
    %c0_i32 = arith.constant 0 : i32
    %c3_i32 = arith.constant 3 : i32
    %50 = arith.addi %c0_i32, %c3_i32 : i32
    %c1_i32 = arith.constant 1 : i32
    scf.for %arg15 = %c0_i32 to %50 step %c1_i32  : i32 {
      %c0_75 = arith.constant 0 : index
      %c0_76 = arith.constant 0 : index
      %144 = vector.load %arg14[%c0_75, %c0_76] : memref<256x128xf32, #tpu.memory_space<vmem>>, vector<128x128xf32>
      %145 = arith.truncf %144 : vector<128x128xf32> to vector<128x128xbf16>
      %cst_77 = arith.constant dense<0.000000e+00> : vector<128x128xf32>
      %146 = tpu.matmul %41, %145, %cst_77 {dimension_numbers = #tpu.dot_dimension_numbers<[1], [0], [0], [1], [0, 0, 1, 1], [], []>} : vector<128x128xbf16>, vector<128x128xbf16>, vector<128x128xf32> -> vector<128x128xf32>
      %147 = arith.addf %146, %47 : vector<128x128xf32>
      %cst_78 = arith.constant dense<0.000000e+00> : vector<128x128xf32>
      %148 = tpu.matmul %42, %145, %cst_78 {dimension_numbers = #tpu.dot_dimension_numbers<[1], [0], [0], [1], [0, 0, 1, 1], [], []>} : vector<128x128xbf16>, vector<128x128xbf16>, vector<128x128xf32> -> vector<128x128xf32>
      %149 = arith.addf %148, %49 : vector<128x128xf32>
      %150 = arith.mulf %149, %147 : vector<128x128xf32>
      %cst_79 = arith.constant dense<0.000000e+00> : vector<128xf32>
      %151 = vector.multi_reduction <add>, %150, %cst_79 [1] : vector<128x128xf32> to vector<128xf32>
      %152 = vector.shape_cast %151 : vector<128xf32> to vector<128x1xf32>
      %153 = math.exp %152 : vector<128x1xf32>
      %154 = vector.broadcast %8 : vector<1x128xf32> to vector<128x128xf32>
      %155 = arith.addf %147, %154 : vector<128x128xf32>
      %156 = vector.broadcast %153 : vector<128x1xf32> to vector<128x128xf32>
      %157 = arith.mulf %156, %155 : vector<128x128xf32>
      %158 = arith.truncf %157 : vector<128x128xf32> to vector<128x128xbf16>
      %cst_80 = arith.constant dense<0.000000e+00> : vector<128x128xf32>
      %159 = tpu.matmul %43, %158, %cst_80 {dimension_numbers = #tpu.dot_dimension_numbers<[1], [0], [0], [1], [0, 0, 1, 1], [], []>} : vector<128x128xbf16>, vector<128x128xbf16>, vector<128x128xf32> -> vector<128x128xf32>
      %160 = vector.extract_strided_slice %159 {offsets = [0, 16], sizes = [128, 1], strides = [1, 1]} : vector<128x128xf32> to vector<128x1xf32>
      %cst_81 = arith.constant 1.000000e-16 : f32
      %161 = vector.broadcast %cst_81 : f32 to vector<128x1xf32>
      %162 = arith.addf %160, %161 : vector<128x1xf32>
      %cst_82 = arith.constant 1.000000e+00 : f32
      %163 = vector.broadcast %cst_82 : f32 to vector<128x1xf32>
      %164 = arith.divf %163, %162 : vector<128x1xf32>
      %165 = vector.broadcast %164 : vector<128x1xf32> to vector<128x128xf32>
      %166 = arith.mulf %159, %165 : vector<128x128xf32>
      %167 = vector.broadcast %4 : vector<1x128xf32> to vector<128x128xf32>
      %168 = arith.mulf %166, %167 : vector<128x128xf32>
      %169 = arith.addf %144, %168 : vector<128x128xf32>
      %170 = arith.mulf %169, %169 : vector<128x128xf32>
      %cst_83 = arith.constant dense<0.000000e+00> : vector<128xf32>
      %171 = vector.multi_reduction <add>, %170, %cst_83 [1] : vector<128x128xf32> to vector<128xf32>
      %172 = vector.shape_cast %171 : vector<128xf32> to vector<128x1xf32>
      %173 = math.sqrt %172 : vector<128x1xf32>
      %cst_84 = arith.constant 9.99999996E-13 : f32
      %174 = vector.broadcast %cst_84 : f32 to vector<128x1xf32>
      %175 = arith.maximumf %173, %174 : vector<128x1xf32>
      %176 = vector.broadcast %175 : vector<128x1xf32> to vector<128x128xf32>
      %177 = arith.divf %169, %176 : vector<128x128xf32>
      %c0_85 = arith.constant 0 : index
      %c0_86 = arith.constant 0 : index
      %178 = vector.load %arg14[%c0_85, %c0_86] : memref<256x128xf32, #tpu.memory_space<vmem>>, vector<128x128xf32>
      tpu.vector_store %arg14[%c0_85, %c0_86], %177 {strides = array<i32>} : memref<256x128xf32, #tpu.memory_space<vmem>>, vector<128x128xf32>,
    }
    %c0_34 = arith.constant 0 : index
    %c0_35 = arith.constant 0 : index
    %51 = vector.load %arg14[%c0_34, %c0_35] : memref<256x128xf32, #tpu.memory_space<vmem>>, vector<128x128xf32>
    %c128_36 = arith.constant 128 : index
    %c0_37 = arith.constant 0 : index
    %52 = vector.load %arg14[%c128_36, %c0_37] : memref<256x128xf32, #tpu.memory_space<vmem>>, vector<128x128xf32>
    %53 = arith.truncf %51 : vector<128x128xf32> to vector<128x128xbf16>
    %cst_38 = arith.constant dense<0.000000e+00> : vector<128x128xf32>
    %54 = tpu.matmul %41, %53, %cst_38 {dimension_numbers = #tpu.dot_dimension_numbers<[1], [0], [0], [1], [0, 0, 1, 1], [], []>} : vector<128x128xbf16>, vector<128x128xbf16>, vector<128x128xf32> -> vector<128x128xf32>
    %55 = arith.addf %54, %47 : vector<128x128xf32>
    %cst_39 = arith.constant dense<0.000000e+00> : vector<128x128xf32>
    %56 = tpu.matmul %42, %53, %cst_39 {dimension_numbers = #tpu.dot_dimension_numbers<[1], [0], [0], [1], [0, 0, 1, 1], [], []>} : vector<128x128xbf16>, vector<128x128xbf16>, vector<128x128xf32> -> vector<128x128xf32>
    %57 = arith.addf %56, %49 : vector<128x128xf32>
    %58 = arith.mulf %57, %55 : vector<128x128xf32>
    %cst_40 = arith.constant dense<0.000000e+00> : vector<128xf32>
    %59 = vector.multi_reduction <add>, %58, %cst_40 [1] : vector<128x128xf32> to vector<128xf32>
    %60 = vector.shape_cast %59 : vector<128xf32> to vector<128x1xf32>
    %61 = math.exp %60 : vector<128x1xf32>
    %62 = vector.broadcast %8 : vector<1x128xf32> to vector<128x128xf32>
    %63 = arith.addf %55, %62 : vector<128x128xf32>
    %64 = vector.broadcast %61 : vector<128x1xf32> to vector<128x128xf32>
    %65 = arith.mulf %64, %63 : vector<128x128xf32>
    %66 = arith.truncf %65 : vector<128x128xf32> to vector<128x128xbf16>
    %67 = vector.broadcast %8 : vector<1x128xf32> to vector<128x128xf32>
    %68 = arith.addf %57, %67 : vector<128x128xf32>
    %69 = vector.broadcast %61 : vector<128x1xf32> to vector<128x128xf32>
    %70 = arith.mulf %69, %68 : vector<128x128xf32>
    %71 = arith.truncf %70 : vector<128x128xf32> to vector<128x128xbf16>
    %cst_41 = arith.constant dense<0.000000e+00> : vector<128x128xf32>
    %72 = tpu.matmul %43, %66, %cst_41 {dimension_numbers = #tpu.dot_dimension_numbers<[1], [0], [0], [1], [0, 0, 1, 1], [], []>} : vector<128x128xbf16>, vector<128x128xbf16>, vector<128x128xf32> -> vector<128x128xf32>
    %c0_42 = arith.constant 0 : index
    %c0_43 = arith.constant 0 : index
    %73 = vector.load %arg10[%c0_42, %c0_43] : memref<128x128xbf16, #tpu.memory_space<vmem>>, vector<128x128xbf16>
    %cst_44 = arith.constant dense<0.000000e+00> : vector<128x128xf32>
    %74 = tpu.matmul %73, %71, %cst_44 {dimension_numbers = #tpu.dot_dimension_numbers<[1], [0], [0], [1], [0, 0, 1, 1], [], []>} : vector<128x128xbf16>, vector<128x128xbf16>, vector<128x128xf32> -> vector<128x128xf32>
    %75 = arith.addf %72, %74 : vector<128x128xf32>
    %c0_45 = arith.constant 0 : index
    %c0_46 = arith.constant 0 : index
    %76 = vector.load %arg9[%c0_45, %c0_46] : memref<128x128xbf16, #tpu.memory_space<vmem>>, vector<128x128xbf16>
    %cst_47 = arith.constant dense<0.000000e+00> : vector<128x128xf32>
    %77 = tpu.matmul %76, %66, %cst_47 {dimension_numbers = #tpu.dot_dimension_numbers<[1], [0], [0], [1], [0, 0, 1, 1], [], []>} : vector<128x128xbf16>, vector<128x128xbf16>, vector<128x128xf32> -> vector<128x128xf32>
    %c0_48 = arith.constant 0 : index
    %c0_49 = arith.constant 0 : index
    %78 = vector.load %arg11[%c0_48, %c0_49] : memref<128x128xbf16, #tpu.memory_space<vmem>>, vector<128x128xbf16>
    %cst_50 = arith.constant dense<0.000000e+00> : vector<128x128xf32>
    %79 = tpu.matmul %78, %71, %cst_50 {dimension_numbers = #tpu.dot_dimension_numbers<[1], [0], [0], [1], [0, 0, 1, 1], [], []>} : vector<128x128xbf16>, vector<128x128xbf16>, vector<128x128xf32> -> vector<128x128xf32>
    %80 = arith.addf %77, %79 : vector<128x128xf32>
    %81 = vector.extract_strided_slice %75 {offsets = [0, 16], sizes = [128, 1], strides = [1, 1]} : vector<128x128xf32> to vector<128x1xf32>
    %cst_51 = arith.constant 1.000000e-16 : f32
    %82 = vector.broadcast %cst_51 : f32 to vector<128x1xf32>
    %83 = arith.addf %81, %82 : vector<128x1xf32>
    %cst_52 = arith.constant 1.000000e+00 : f32
    %84 = vector.broadcast %cst_52 : f32 to vector<128x1xf32>
    %85 = arith.divf %84, %83 : vector<128x1xf32>
    %86 = vector.extract_strided_slice %80 {offsets = [0, 16], sizes = [128, 1], strides = [1, 1]} : vector<128x128xf32> to vector<128x1xf32>
    %cst_53 = arith.constant 1.000000e-16 : f32
    %87 = vector.broadcast %cst_53 : f32 to vector<128x1xf32>
    %88 = arith.addf %86, %87 : vector<128x1xf32>
    %cst_54 = arith.constant 1.000000e+00 : f32
    %89 = vector.broadcast %cst_54 : f32 to vector<128x1xf32>
    %90 = arith.divf %89, %88 : vector<128x1xf32>
    %91 = vector.broadcast %85 : vector<128x1xf32> to vector<128x128xf32>
    %92 = arith.mulf %75, %91 : vector<128x128xf32>
    %93 = vector.broadcast %4 : vector<1x128xf32> to vector<128x128xf32>
    %94 = arith.mulf %92, %93 : vector<128x128xf32>
    %95 = vector.broadcast %90 : vector<128x1xf32> to vector<128x128xf32>
    %96 = arith.mulf %80, %95 : vector<128x128xf32>
    %97 = vector.broadcast %4 : vector<1x128xf32> to vector<128x128xf32>
    %98 = arith.mulf %96, %97 : vector<128x128xf32>
    %cst_55 = arith.constant 0.000000e+00 : f32
    %99 = vector.broadcast %cst_55 : f32 to vector<128x128xf32>
    %100 = arith.cmpf oge, %94, %99 : vector<128x128xf32>
    %cst_56 = arith.constant 0.00999999977 : f32
    %101 = vector.broadcast %cst_56 : f32 to vector<128x128xf32>
    %102 = arith.mulf %101, %94 : vector<128x128xf32>
    %103 = arith.select %100, %94, %102 : vector<128x128xi1>, vector<128x128xf32>
    %104 = arith.addf %51, %103 : vector<128x128xf32>
    %c0_57 = arith.constant 0 : index
    %c0_58 = arith.constant 0 : index
    %105 = vector.load %arg12[%c0_57, %c0_58] : memref<256x128xf32, #tpu.memory_space<vmem>>, vector<128x128xf32>
    tpu.vector_store %arg12[%c0_57, %c0_58], %104 {strides = array<i32>} : memref<256x128xf32, #tpu.memory_space<vmem>>, vector<128x128xf32>,
    %cst_59 = arith.constant 0.000000e+00 : f32
    %106 = vector.broadcast %cst_59 : f32 to vector<128x128xf32>
    %107 = arith.cmpf oge, %98, %106 : vector<128x128xf32>
    %cst_60 = arith.constant 0.00999999977 : f32
    %108 = vector.broadcast %cst_60 : f32 to vector<128x128xf32>
    %109 = arith.mulf %108, %98 : vector<128x128xf32>
    %110 = arith.select %107, %98, %109 : vector<128x128xi1>, vector<128x128xf32>
    %111 = arith.addf %52, %110 : vector<128x128xf32>
    %c128_61 = arith.constant 128 : index
    %c0_62 = arith.constant 0 : index
    %112 = vector.load %arg12[%c128_61, %c0_62] : memref<256x128xf32, #tpu.memory_space<vmem>>, vector<128x128xf32>
    tpu.vector_store %arg12[%c128_61, %c0_62], %111 {strides = array<i32>} : memref<256x128xf32, #tpu.memory_space<vmem>>, vector<128x128xf32>,
    %113 = arith.truncf %85 : vector<128x1xf32> to vector<128x1xbf16>
    %114 = arith.truncf %90 : vector<128x1xf32> to vector<128x1xbf16>
    %cst_63 = arith.constant dense<0.000000e+00> : vector<128x1xf32>
    %115 = tpu.matmul %42, %113, %cst_63 {dimension_numbers = #tpu.dot_dimension_numbers<[1], [0], [0], [1], [0, 0, 1, 1], [], []>} : vector<128x128xbf16>, vector<128x1xbf16>, vector<128x1xf32> -> vector<128x1xf32>
    %c0_64 = arith.constant 0 : index
    %c0_65 = arith.constant 0 : index
    %116 = vector.load %arg7[%c0_64, %c0_65] : memref<128x128xbf16, #tpu.memory_space<vmem>>, vector<128x128xbf16>
    %cst_66 = arith.constant dense<0.000000e+00> : vector<128x1xf32>
    %117 = tpu.matmul %116, %114, %cst_66 {dimension_numbers = #tpu.dot_dimension_numbers<[1], [0], [0], [1], [0, 0, 1, 1], [], []>} : vector<128x128xbf16>, vector<128x1xbf16>, vector<128x1xf32> -> vector<128x1xf32>
    %118 = arith.addf %115, %117 : vector<128x1xf32>
    %cst_67 = arith.constant dense<0.000000e+00> : vector<128x1xf32>
    %119 = tpu.matmul %41, %113, %cst_67 {dimension_numbers = #tpu.dot_dimension_numbers<[1], [0], [0], [1], [0, 0, 1, 1], [], []>} : vector<128x128xbf16>, vector<128x1xbf16>, vector<128x1xf32> -> vector<128x1xf32>
    %c0_68 = arith.constant 0 : index
    %c0_69 = arith.constant 0 : index
    %120 = vector.load %arg5[%c0_68, %c0_69] : memref<128x128xbf16, #tpu.memory_space<vmem>>, vector<128x128xbf16>
    %cst_70 = arith.constant dense<0.000000e+00> : vector<128x1xf32>
    %121 = tpu.matmul %120, %114, %cst_70 {dimension_numbers = #tpu.dot_dimension_numbers<[1], [0], [0], [1], [0, 0, 1, 1], [], []>} : vector<128x128xbf16>, vector<128x1xbf16>, vector<128x1xf32> -> vector<128x1xf32>
    %122 = arith.addf %119, %121 : vector<128x1xf32>
    %123 = tpu.iota {dimensions = array<i32: 1>} : vector<1x128xi32>
    %124 = arith.mulf %61, %118 : vector<128x1xf32>
    %c0_i32_71 = arith.constant 0 : i32
    %125 = vector.broadcast %c0_i32_71 : i32 to vector<1x128xi32>
    %126 = arith.cmpi eq, %123, %125 : vector<1x128xi32>
    %127 = arith.extui %126 : vector<1x128xi1> to vector<1x128xi32>
    %128 = arith.sitofp %127 : vector<1x128xi32> to vector<1x128xf32>
    %129 = vector.broadcast %124 : vector<128x1xf32> to vector<128x128xf32>
    %130 = vector.broadcast %128 : vector<1x128xf32> to vector<128x128xf32>
    %131 = arith.mulf %129, %130 : vector<128x128xf32>
    %132 = arith.mulf %61, %122 : vector<128x1xf32>
    %c1_i32_72 = arith.constant 1 : i32
    %133 = vector.broadcast %c1_i32_72 : i32 to vector<1x128xi32>
    %134 = arith.cmpi eq, %123, %133 : vector<1x128xi32>
    %135 = arith.extui %134 : vector<1x128xi1> to vector<1x128xi32>
    %136 = arith.sitofp %135 : vector<1x128xi32> to vector<1x128xf32>
    %137 = vector.broadcast %132 : vector<128x1xf32> to vector<128x128xf32>
    %138 = vector.broadcast %136 : vector<1x128xf32> to vector<128x128xf32>
    %139 = arith.mulf %137, %138 : vector<128x128xf32>
    %140 = arith.addf %131, %139 : vector<128x128xf32>
    %141 = tpu.transpose %140, [1, 0] : vector<128x128xf32> -> vector<128x128xf32>
    %142 = vector.extract_strided_slice %141 {offsets = [0, 0], sizes = [2, 128], strides = [1, 1]} : vector<128x128xf32> to vector<2x128xf32>
    %c0_73 = arith.constant 0 : index
    %c0_74 = arith.constant 0 : index
    %143 = vector.load %arg13[%c0_73, %c0_74] : memref<2x128xf32, #tpu.memory_space<vmem>>, vector<2x128xf32>
    tpu.vector_store %arg13[%c0_73, %c0_74], %142 {strides = array<i32>} : memref<2x128xf32, #tpu.memory_space<vmem>>, vector<2x128xf32>,
    return
  }
}

</mosaic_0001>

<bundles_post_ra>
// kernel: tpu_custom_call.1
= control target key start
LH: loop header
LB: loop body
LE: loop exit
PB: predicated region body
PF: predicated region fallthrough
CT: control target
= control target key end

     0   :  { %19 = vsyncpa [#allocation4], 0  ;;  %s7605_s0 = inlined_call_operand.hbm [shape: f32[8,128], index: 0, kind: input, shape index: {}]   ;;  %s7606_s1 = inlined_call_operand.hbm [shape: f32[128,128], index: 1, kind: input, shape index: {}]   ;;  %s7607_s2 = inlined_call_operand.vmem [shape: f32[1,128], index: 2, kind: input, shape index: {}]   ;;  %s7608_s3 = inlined_call_operand.vmem [shape: f32[8,128], index: 3, kind: input, shape index: {}]   ;;  %s7609_s4 = inlined_call_operand.hbm [shape: bf16[128,128], index: 4, kind: input, shape index: {}]   ;;  %s7610_s5 = inlined_call_operand.hbm [shape: bf16[128,128], index: 5, kind: input, shape index: {}]   ;;  %s7611_s6 = inlined_call_operand.hbm [shape: bf16[128,128], index: 6, kind: input, shape index: {}]   ;;  %s7612_s7 = inlined_call_operand.hbm [shape: bf16[128,128], index: 7, kind: input, shape index: {}]   ;;  %s7613_s8 = inlined_call_operand.hbm [shape: bf16[128,128], index: 8, kind: input, shape index: {}]   ;;  %s7614_s9 = inlined_call_operand.hbm [shape: bf16[128,128], index: 9, kind: input, shape index: {}]   ;;  %s7615_s10 = inlined_call_operand.hbm [shape: bf16[128,128], index: 10, kind: input, shape index: {}]   ;;  %s7616_s11 = inlined_call_operand.hbm [shape: bf16[128,128], index: 11, kind: input, shape index: {}]   ;;  %s7617_s12 = inlined_call_operand.hbm [shape: f32[256,128], index: 12, kind: output, shape index: {0}]   ;;  %s7618_s13 = inlined_call_operand.hbm [shape: f32[2,128], index: 13, kind: output, shape index: {1}]  }
   0x1   :  { %20 = vsyncpa [#allocation7], 0 }
   0x2   :  { %21 = vsyncpa [#allocation10], 0 }
   0x3   :  { %22 = vsyncpa [#allocation13], 0 }
   0x4   :  { %23 = vsyncpa [#allocation16], 0 }
   0x5   :  { %24 = vsyncpa [#allocation19], 0 }
   0x6   :  { %25 = vsyncpa [#allocation5], 0 }
   0x7   :  { %26 = vsyncpa [#allocation22], 0  ;;  %s5869_s25 = smov [#allocation6]   ;;  %s5581_s29 = scalar_lea.hbm %s7606_s1, 2048 }
   0x8   :  { %s42_s26 = sshll.u32 %s5869_s25, 4  ;;  %p5582_p0 = scmp.ne.s32.totalorder %s7606_s1, %s5581_s29  ;;  %s43_s26 = int_to_ptr.vmem [resolvable:$true] %s42_s26 }
   0x9   :  { %p5585_p1 = scmp.lt.u32.totalorder %s5581_s29, %s7606_s1 }
   0xb   :  { %p5587_p2 = pnand %p5585_p1, %p5582_p0 }
   0xd   :  { %5590 = shalt.err (!%p5587_p2)
}
   0xe   :  { %s5591_s17 = scalar_lea.vmem %s43_s26, 2048  ;;  %p5596_p4 = scmp.lt.s32.totalorder %s43_s26, %s43_s26 }
   0xf   :  { %p5592_p3 = scmp.ne.s32.totalorder %s43_s26, %s5591_s17  ;;  %p5597_p5 = scmp.lt.s32.totalorder %s5591_s17, %s5591_s17 }
  0x11   :  { %p5598_p6 = por %p5597_p5, %p5596_p4 }
  0x13   :  { %p5599_p7 = pnand %p5598_p6, %p5592_p3 }
  0x15   :  { %5602 = shalt.err (!%p5599_p7)
}
  0x16   :  { %s5870_s18 = smov 128   ;;  %s5871_s19 = smov 8  }
  0x17   :  { %48 = dma.hbm_to_vmem [thread:$0]  %s7606_s1, 2048, %s43_s26, [#allocation7], %s5870_s18, %s5870_s18, %s5871_s19  }
  0x18   :  { %s5872_s22 = smov [#allocation9]   ;;  %s5873_s24 = smov [#allocation12]  }
  0x19   :  { %s70_s23 = sshll.u32 %s5872_s22, 4  ;;  %s94_s25 = sshll.u32 %s5873_s24, 4  ;;  %s71_s23 = int_to_ptr.vmem [resolvable:$true] %s70_s23  ;;  %s95_s25 = int_to_ptr.vmem [resolvable:$true] %s94_s25 }
  0x1a   :  { %s5603_s29 = scalar_lea.hbm %s7610_s5, 1024 }
  0x1b   :  { %p5604_p8 = scmp.ne.s32.totalorder %s7610_s5, %s5603_s29  ;;  %p5607_p9 = scmp.lt.u32.totalorder %s5603_s29, %s7610_s5 }
  0x1d   :  { %p5609_p10 = pnand %p5607_p9, %p5604_p8 }
  0x1f   :  { %5612 = shalt.err (!%p5609_p10)
}
  0x20   :  { %s5613_s1 = scalar_lea.vmem %s71_s23, 1024  ;;  %p5618_p12 = scmp.lt.s32.totalorder %s71_s23, %s71_s23 }
  0x21   :  { %p5614_p11 = scmp.ne.s32.totalorder %s71_s23, %s5613_s1  ;;  %p5619_p13 = scmp.lt.s32.totalorder %s5613_s1, %s5613_s1 }
  0x23   :  { %p5620_p0 = por %p5619_p13, %p5618_p12 }
  0x25   :  { %p5621_p1 = pnand %p5620_p0, %p5614_p11 }
  0x27   :  { %5624 = shalt.err (!%p5621_p1)
}
  0x28   :  { %s5874_s26 = smov 64   ;;  %s5875_s17 = smov 4  }
  0x29   :  { %76 = dma.hbm_to_vmem [thread:$0]  %s7610_s5, 1024, %s71_s23, [#allocation10], %s5874_s26, %s5874_s26, %s5875_s17  }
  0x2a   :  { %s5625_s27 = scalar_lea.hbm %s7612_s7, 1024 }
  0x2b   :  { %p5626_p2 = scmp.ne.s32.totalorder %s7612_s7, %s5625_s27  ;;  %p5629_p3 = scmp.lt.u32.totalorder %s5625_s27, %s7612_s7 }
  0x2d   :  { %p5631_p4 = pnand %p5629_p3, %p5626_p2 }
  0x2f   :  { %5634 = shalt.err (!%p5631_p4)
}
  0x30   :  { %s5635_s15 = scalar_lea.vmem %s95_s25, 1024  ;;  %p5640_p6 = scmp.lt.s32.totalorder %s95_s25, %s95_s25 }
  0x31   :  { %p5636_p5 = scmp.ne.s32.totalorder %s95_s25, %s5635_s15  ;;  %p5641_p7 = scmp.lt.s32.totalorder %s5635_s15, %s5635_s15 }
  0x33   :  { %p5642_p8 = por %p5641_p7, %p5640_p6 }
  0x35   :  { %p5643_p9 = pnand %p5642_p8, %p5636_p5 }
  0x37   :  { %5646 = shalt.err (!%p5643_p9)
}
  0x38   :  { %100 = dma.hbm_to_vmem [thread:$0]  %s7612_s7, 1024, %s95_s25, [#allocation13], %s5874_s26, %s5874_s26, %s5875_s17  }
  0x39   :  { %s5876_s16 = smov [#allocation15]   ;;  %s5877_s20 = smov [#allocation3]  }
  0x3a   :  { %s118_s1 = sshll.u32 %s5876_s16, 4  ;;  %s33_s21 = sshll.u32 %s5877_s20, 4  ;;  %s119_s1 = int_to_ptr.vmem [resolvable:$true] %s118_s1  ;;  %s34_s21 = int_to_ptr.vmem [resolvable:$true] %s33_s21 }
  0x3b   :  { %s5647_s27 = scalar_lea.hbm %s7614_s9, 1024 }
  0x3c   :  { %p5648_p10 = scmp.ne.s32.totalorder %s7614_s9, %s5647_s27  ;;  %p5651_p11 = scmp.lt.u32.totalorder %s5647_s27, %s7614_s9 }
  0x3e   :  { %p5653_p12 = pnand %p5651_p11, %p5648_p10 }
  0x40   :  { %5656 = shalt.err (!%p5653_p12)
}
  0x41   :  { %s5657_s7 = scalar_lea.vmem %s119_s1, 1024  ;;  %p5662_p0 = scmp.lt.s32.totalorder %s119_s1, %s119_s1 }
  0x42   :  { %p5658_p13 = scmp.ne.s32.totalorder %s119_s1, %s5657_s7  ;;  %p5663_p1 = scmp.lt.s32.totalorder %s5657_s7, %s5657_s7 }
  0x44   :  { %p5664_p2 = por %p5663_p1, %p5662_p0 }
  0x46   :  { %p5665_p3 = pnand %p5664_p2, %p5658_p13 }
  0x48   :  { %5668 = shalt.err (!%p5665_p3)
}
  0x49   :  { %124 = dma.hbm_to_vmem [thread:$0]  %s7614_s9, 1024, %s119_s1, [#allocation16], %s5874_s26, %s5874_s26, %s5875_s17  }
  0x4a   :  { %s5669_s16 = scalar_lea.hbm %s7605_s0, 128 }
  0x4b   :  { %p5670_p4 = scmp.ne.s32.totalorder %s7605_s0, %s5669_s16  ;;  %p5673_p5 = scmp.lt.u32.totalorder %s5669_s16, %s7605_s0 }
  0x4d   :  { %p5675_p6 = pnand %p5673_p5, %p5670_p4 }
  0x4f   :  { %5678 = shalt.err (!%p5675_p6)
}
  0x50   :  { %s5679_s28 = scalar_lea.vmem %s34_s21, 128  ;;  %p5684_p8 = scmp.lt.s32.totalorder %s34_s21, %s34_s21 }
  0x51   :  { %p5680_p7 = scmp.ne.s32.totalorder %s34_s21, %s5679_s28  ;;  %p5685_p9 = scmp.lt.s32.totalorder %s5679_s28, %s5679_s28 }
  0x53   :  { %p5686_p10 = por %p5685_p9, %p5684_p8 }
  0x55   :  { %p5687_p11 = pnand %p5686_p10, %p5680_p7 }
  0x57   :  { %5690 = shalt.err (!%p5687_p11)
}
  0x58   :  { %36 = dma.hbm_to_vmem [thread:$0]  %s7605_s0, 128, %s34_s21, [#allocation4]  }
  0x59   :  { %s5878_s29 = smov [#allocation8]   ;;  %s5879_s14 = smov [#allocation11]  }
  0x5a   :  { %s58_s30 = sshll.u32 %s5878_s29, 4  ;;  %s82_s7 = sshll.u32 %s5879_s14, 4  ;;  %s59_s30 = int_to_ptr.vmem [resolvable:$true] %s58_s30  ;;  %s83_s7 = int_to_ptr.vmem [resolvable:$true] %s82_s7 }
  0x5b   :  { %s5691_s5 = scalar_lea.hbm %s7609_s4, 1024 }
  0x5c   :  { %p5692_p12 = scmp.ne.s32.totalorder %s7609_s4, %s5691_s5  ;;  %p5695_p13 = scmp.lt.u32.totalorder %s5691_s5, %s7609_s4 }
  0x5e   :  { %p5697_p0 = pnand %p5695_p13, %p5692_p12 }
  0x60   :  { %5700 = shalt.err (!%p5697_p0)
}
  0x61   :  { %s5701_s0 = scalar_lea.vmem %s59_s30, 1024  ;;  %p5706_p2 = scmp.lt.s32.totalorder %s59_s30, %s59_s30 }
  0x62   :  { %p5702_p1 = scmp.ne.s32.totalorder %s59_s30, %s5701_s0  ;;  %p5707_p3 = scmp.lt.s32.totalorder %s5701_s0, %s5701_s0 }
  0x64   :  { %p5708_p4 = por %p5707_p3, %p5706_p2 }
  0x66   :  { %p5709_p5 = pnand %p5708_p4, %p5702_p1 }
  0x68   :  { %5712 = shalt.err (!%p5709_p5)
}
  0x69   :  { %64 = dma.hbm_to_vmem [thread:$0]  %s7609_s4, 1024, %s59_s30, [#allocation7], %s5874_s26, %s5874_s26, %s5875_s17  }
  0x6a   :  { %s5713_s9 = scalar_lea.hbm %s7611_s6, 1024 }
  0x6b   :  { %p5714_p6 = scmp.ne.s32.totalorder %s7611_s6, %s5713_s9  ;;  %p5717_p7 = scmp.lt.u32.totalorder %s5713_s9, %s7611_s6 }
  0x6d   :  { %p5719_p8 = pnand %p5717_p7, %p5714_p6 }
  0x6f   :  { %5722 = shalt.err (!%p5719_p8)
}
  0x70   :  { %s5723_s15 = scalar_lea.vmem %s83_s7, 1024  ;;  %p5728_p10 = scmp.lt.s32.totalorder %s83_s7, %s83_s7 }
  0x71   :  { %p5724_p9 = scmp.ne.s32.totalorder %s83_s7, %s5723_s15  ;;  %p5729_p11 = scmp.lt.s32.totalorder %s5723_s15, %s5723_s15 }
  0x73   :  { %p5730_p12 = por %p5729_p11, %p5728_p10 }
  0x75   :  { %p5731_p13 = pnand %p5730_p12, %p5724_p9 }
  0x77   :  { %5734 = shalt.err (!%p5731_p13)
}
  0x78   :  { %88 = dma.hbm_to_vmem [thread:$0]  %s7611_s6, 1024, %s83_s7, [#allocation10], %s5874_s26, %s5874_s26, %s5875_s17  }
  0x79   :  { %s5880_s5 = smov [#allocation14]   ;;  %s5881_s16 = smov [#allocation17]  }
  0x7a   :  { %s106_s23 = sshll.u32 %s5880_s5, 4  ;;  %s130_s20 = sshll.u32 %s5881_s16, 4  ;;  %s107_s23 = int_to_ptr.vmem [resolvable:$true] %s106_s23  ;;  %s131_s20 = int_to_ptr.vmem [resolvable:$true] %s130_s20 }
  0x7b   :  { %s5735_s21 = scalar_lea.hbm %s7613_s8, 1024 }
  0x7c   :  { %p5736_p0 = scmp.ne.s32.totalorder %s7613_s8, %s5735_s21  ;;  %p5739_p1 = scmp.lt.u32.totalorder %s5735_s21, %s7613_s8 }
  0x7e   :  { %p5741_p2 = pnand %p5739_p1, %p5736_p0 }
  0x80   :  { %5744 = shalt.err (!%p5741_p2)
}
  0x81   :  { %s5745_s6 = scalar_lea.vmem %s107_s23, 1024  ;;  %p5750_p4 = scmp.lt.s32.totalorder %s107_s23, %s107_s23 }
  0x82   :  { %p5746_p3 = scmp.ne.s32.totalorder %s107_s23, %s5745_s6  ;;  %p5751_p5 = scmp.lt.s32.totalorder %s5745_s6, %s5745_s6 }
  0x84   :  { %p5752_p6 = por %p5751_p5, %p5750_p4 }
  0x86   :  { %p5753_p7 = pnand %p5752_p6, %p5746_p3 }
  0x88   :  { %5756 = shalt.err (!%p5753_p7)
}
  0x89   :  { %112 = dma.hbm_to_vmem [thread:$0]  %s7613_s8, 1024, %s107_s23, [#allocation13], %s5874_s26, %s5874_s26, %s5875_s17  }
  0x8a   :  { %s5757_s25 = scalar_lea.hbm %s7615_s10, 1024 }
  0x8b   :  { %p5758_p8 = scmp.ne.s32.totalorder %s7615_s10, %s5757_s25  ;;  %p5761_p9 = scmp.lt.u32.totalorder %s5757_s25, %s7615_s10 }
  0x8d   :  { %p5763_p10 = pnand %p5761_p9, %p5758_p8 }
  0x8f   :  { %5766 = shalt.err (!%p5763_p10)
}
  0x90   :  { %s5767_s16 = scalar_lea.vmem %s131_s20, 1024  ;;  %p5772_p12 = scmp.lt.s32.totalorder %s131_s20, %s131_s20 }
  0x91   :  { %p5768_p11 = scmp.ne.s32.totalorder %s131_s20, %s5767_s16  ;;  %p5773_p13 = scmp.lt.s32.totalorder %s5767_s16, %s5767_s16 }
  0x93   :  { %p5774_p0 = por %p5773_p13, %p5772_p12 }
  0x95   :  { %p5775_p1 = pnand %p5774_p0, %p5768_p11 }
  0x97   :  { %5778 = shalt.err (!%p5775_p1)
}
  0x98   :  { %136 = dma.hbm_to_vmem [thread:$0]  %s7615_s10, 1024, %s131_s20, [#allocation16], %s5874_s26, %s5874_s26, %s5875_s17  }
  0x99   :  { %s5882_s22 = smov [#allocation18]   ;;  %s5779_s27 = scalar_lea.hbm %s7616_s11, 1024 }
  0x9a   :  { %s142_s0 = sshll.u32 %s5882_s22, 4  ;;  %p5780_p2 = scmp.ne.s32.totalorder %s7616_s11, %s5779_s27  ;;  %s143_s0 = int_to_ptr.vmem [resolvable:$true] %s142_s0 }
  0x9b   :  { %p5783_p3 = scmp.lt.u32.totalorder %s5779_s27, %s7616_s11 }
  0x9d   :  { %p5785_p4 = pnand %p5783_p3, %p5780_p2 }
  0x9f   :  { %5788 = shalt.err (!%p5785_p4)
}
  0xa0   :  { %s5789_s1 = scalar_lea.vmem %s143_s0, 1024  ;;  %p5794_p6 = scmp.lt.s32.totalorder %s143_s0, %s143_s0 }
  0xa1   :  { %p5790_p5 = scmp.ne.s32.totalorder %s143_s0, %s5789_s1  ;;  %p5795_p7 = scmp.lt.s32.totalorder %s5789_s1, %s5789_s1 }
  0xa3   :  { %p5796_p8 = por %p5795_p7, %p5794_p6 }
  0xa5   :  { %p5797_p9 = pnand %p5796_p8, %p5790_p5 }
  0xa7   :  { %5800 = shalt.err (!%p5797_p9)
}
  0xa8   :  { %148 = dma.hbm_to_vmem [thread:$0]  %s7616_s11, 1024, %s143_s0, [#allocation19], %s5874_s26, %s5874_s26, %s5875_s17  }
  0xa9   :  { %5849 = dma.done.wait [#allocation4], 128  }
  0xaa   :  { %5850 = vsyncadd [#allocation4], 4294967168 }
  0xab   :  { %5851 = dma.done.wait [#allocation7], 3072  }
  0xac   :  { %5852 = vsyncadd [#allocation7], 4294964224 }
  0xad   :  { %5853 = dma.done.wait [#allocation10], 2048  }
  0xae   :  { %5854 = vsyncadd [#allocation10], 4294965248 }
  0xaf   :  { %5855 = dma.done.wait [#allocation13], 2048  }
  0xb0   :  { %5856 = vsyncadd [#allocation13], 4294965248 }
  0xb1   :  { %5857 = dma.done.wait [#allocation16], 2048  }
  0xb2   :  { %5858 = vsyncadd [#allocation16], 4294965248 }
  0xb3   :  { %5859 = dma.done.wait [#allocation19], 1024  }
  0xb4   :  { %5860 = vsyncadd [#allocation19], 4294966272  ;;  %v180_v0 = vlaneseq  ;;  %v5883_v1 = vmov 0.0|0.0   ;;  %v7619_v2 = vmov 0.0   ;;  %vm5885_vm0 = vmmov 0   ;;  %v221_v54 = vld [vmem:[#allocation6] sm:$0xff] }
  0xb5   :  { %5120 = vmatprep.subr.bf16.mxu0 %v5883_v1  ;;  %189 = vst [vmem:[#allocation2 + $0x8] sm:$0xff] %v7619_v2  ;;  %190 = vst [vmem:[#allocation2 + $0x10] sm:$0xff] %v7619_v2  ;;  %4637 = vmatprep.mubr.msk.f32.mxu0 %vm5885_vm0, %v7619_v2  ;;  %v6151_v6 = vld [vmem:[#allocation8] sm:$0xf]  ;;  %v6153_v7 = vld [vmem:[#allocation8 + $0x4] sm:$0xf] }
  0xb6   :  { %191 = vst [vmem:[#allocation2 + $0x18] sm:$0xff] %v7619_v2  ;;  %192 = vst [vmem:[#allocation2 + $0x20] sm:$0xff] %v7619_v2  ;;  %v6141_v3 = vand.u32 127, %v180_v0  ;;  %v6155_v8 = vld [vmem:[#allocation8 + $0x8] sm:$0xf]  ;;  %v223_v56 = vld [vmem:[#allocation6 + $0x10] sm:$0xff] }
  0xb7   :  { %193 = vst [vmem:[#allocation2 + $0x28] sm:$0xff] %v7619_v2  ;;  %194 = vst [vmem:[#allocation2 + $0x30] sm:$0xff] %v7619_v2  ;;  %v6157_v9 = vld [vmem:[#allocation8 + $0xc] sm:$0xf]  ;;  %v6159_v10 = vld [vmem:[#allocation8 + $0x10] sm:$0xf] }
  0xb8   :  { %195 = vst [vmem:[#allocation2 + $0x38] sm:$0xff] %v7619_v2  ;;  %196 = vst [vmem:[#allocation2 + $0x40] sm:$0xff] %v7619_v2  ;;  %vm182_vm1 = vcmp.lt.s32.totalorder %v6141_v3, 16  ;;  %vm185_vm2 = vcmp.eq.s32.totalorder %v6141_v3, 16  ;;  %v6161_v11 = vld [vmem:[#allocation8 + $0x14] sm:$0xf] }
  0xb9   :  { %197 = vst [vmem:[#allocation2 + $0x48] sm:$0xff] %v7619_v2  ;;  %198 = vst [vmem:[#allocation2 + $0x50] sm:$0xff] %v7619_v2  ;;  %v6146_v4 = vsel %vm182_vm1, 1.0, %v7619_v2  ;;  %v6149_v5 = vsel %vm185_vm2, 1.0, %v7619_v2  ;;  %v6163_v12 = vld [vmem:[#allocation8 + $0x18] sm:$0xf] }
  0xba   :  { %199 = vst [vmem:[#allocation2 + $0x58] sm:$0xff] %v7619_v2  ;;  %200 = vst [vmem:[#allocation2 + $0x60] sm:$0xff] %v7619_v2  ;;  %v6165_v13 = vld [vmem:[#allocation8 + $0x1c] sm:$0xf]  ;;  %v6167_v14 = vld [vmem:[#allocation8 + $0x20] sm:$0xf] }
  0xbb   :  { %201 = vst [vmem:[#allocation2 + $0x68] sm:$0xff] %v7619_v2  ;;  %202 = vst [vmem:[#allocation2 + $0x70] sm:$0xff] %v7619_v2  ;;  %v6169_v15 = vld [vmem:[#allocation8 + $0x24] sm:$0xf]  ;;  %v6171_v16 = vld [vmem:[#allocation8 + $0x28] sm:$0xf] }
  0xbc   :  { %203 = vst [vmem:[#allocation2 + $0x78] sm:$0xff] %v7619_v2  ;;  %205 = vst [vmem:[#allocation2 + $0x88] sm:$0xff] %v7619_v2  ;;  %v6173_v17 = vld [vmem:[#allocation8 + $0x2c] sm:$0xf]  ;;  %v6175_v18 = vld [vmem:[#allocation8 + $0x30] sm:$0xf] }
  0xbd   :  { %206 = vst [vmem:[#allocation2 + $0x90] sm:$0xff] %v7619_v2  ;;  %207 = vst [vmem:[#allocation2 + $0x98] sm:$0xff] %v7619_v2  ;;  %v6177_v19 = vld [vmem:[#allocation8 + $0x34] sm:$0xf]  ;;  %v6179_v20 = vld [vmem:[#allocation8 + $0x38] sm:$0xf] }
  0xbe   :  { %208 = vst [vmem:[#allocation2 + $0xa0] sm:$0xff] %v7619_v2  ;;  %209 = vst [vmem:[#allocation2 + $0xa8] sm:$0xff] %v7619_v2  ;;  %v6181_v21 = vld [vmem:[#allocation8 + $0x3c] sm:$0xf]  ;;  %v6183_v22 = vld [vmem:[#allocation11] sm:$0xf] }
  0xbf   :  { %210 = vst [vmem:[#allocation2 + $0xb0] sm:$0xff] %v7619_v2  ;;  %211 = vst [vmem:[#allocation2 + $0xb8] sm:$0xff] %v7619_v2  ;;  %v6185_v23 = vld [vmem:[#allocation11 + $0x4] sm:$0xf]  ;;  %v6187_v24 = vld [vmem:[#allocation11 + $0x8] sm:$0xf] }
  0xc0   :  { %212 = vst [vmem:[#allocation2 + $0xc0] sm:$0xff] %v7619_v2  ;;  %213 = vst [vmem:[#allocation2 + $0xc8] sm:$0xff] %v7619_v2  ;;  %v6189_v25 = vld [vmem:[#allocation11 + $0xc] sm:$0xf]  ;;  %v6191_v26 = vld [vmem:[#allocation11 + $0x10] sm:$0xf] }
  0xc1   :  { %214 = vst [vmem:[#allocation2 + $0xd0] sm:$0xff] %v7619_v2  ;;  %215 = vst [vmem:[#allocation2 + $0xd8] sm:$0xff] %v7619_v2  ;;  %v6193_v27 = vld [vmem:[#allocation11 + $0x14] sm:$0xf]  ;;  %v6195_v28 = vld [vmem:[#allocation11 + $0x18] sm:$0xf] }
  0xc2   :  { %216 = vst [vmem:[#allocation2 + $0xe0] sm:$0xff] %v7619_v2  ;;  %217 = vst [vmem:[#allocation2 + $0xe8] sm:$0xff] %v7619_v2  ;;  %v6197_v29 = vld [vmem:[#allocation11 + $0x1c] sm:$0xf]  ;;  %v6199_v30 = vld [vmem:[#allocation11 + $0x20] sm:$0xf] }
  0xc3   :  { %218 = vst [vmem:[#allocation2 + $0xf0] sm:$0xff] %v7619_v2  ;;  %219 = vst [vmem:[#allocation2 + $0xf8] sm:$0xff] %v7619_v2  ;;  %v6201_v31 = vld [vmem:[#allocation11 + $0x24] sm:$0xf]  ;;  %v6203_v32 = vld [vmem:[#allocation11 + $0x28] sm:$0xf] }
  0xc4   :  { %7701 = vst [vmem:[#allocation31_spill] sm:$0xff] %v6141_v3  ;;  %7702 = vst [vmem:[#allocation32_spill] sm:$0xff] %v6146_v4  ;;  %v6205_v33 = vld [vmem:[#allocation11 + $0x2c] sm:$0xf]  ;;  %v6207_v34 = vld [vmem:[#allocation11 + $0x30] sm:$0xf] }
  0xc5   :  { %7703 = vst [vmem:[#allocation33_spill] sm:$0xff] %v6149_v5  ;;  %7704 = vst [vmem:[#allocation34_spill] sm:$0xff] %v6151_v6  ;;  %v6209_v35 = vld [vmem:[#allocation11 + $0x34] sm:$0xf]  ;;  %v6211_v36 = vld [vmem:[#allocation11 + $0x38] sm:$0xf] }
  0xc6   :  { %7705 = vst [vmem:[#allocation35_spill] sm:$0xff] %v6153_v7  ;;  %7706 = vst [vmem:[#allocation36_spill] sm:$0xff] %v6155_v8  ;;  %v6213_v37 = vld [vmem:[#allocation11 + $0x3c] sm:$0xf]  ;;  %v6215_v38 = vld [vmem:[#allocation14] sm:$0xf] }
  0xc7   :  { %7707 = vst [vmem:[#allocation37_spill] sm:$0xff] %v6157_v9  ;;  %7708 = vst [vmem:[#allocation38_spill] sm:$0xff] %v6159_v10  ;;  %v6217_v39 = vld [vmem:[#allocation14 + $0x4] sm:$0xf]  ;;  %v6219_v40 = vld [vmem:[#allocation14 + $0x8] sm:$0xf] }
  0xc8   :  { %7709 = vst [vmem:[#allocation39_spill] sm:$0xff] %v6161_v11  ;;  %7710 = vst [vmem:[#allocation40_spill] sm:$0xff] %v6163_v12  ;;  %v6221_v41 = vld [vmem:[#allocation14 + $0xc] sm:$0xf]  ;;  %v6223_v42 = vld [vmem:[#allocation14 + $0x10] sm:$0xf] }
  0xc9   :  { %7711 = vst [vmem:[#allocation41_spill] sm:$0xff] %v6165_v13  ;;  %7712 = vst [vmem:[#allocation42_spill] sm:$0xff] %v6167_v14  ;;  %v6225_v43 = vld [vmem:[#allocation14 + $0x14] sm:$0xf]  ;;  %v6227_v44 = vld [vmem:[#allocation14 + $0x18] sm:$0xf] }
  0xca   :  { %7713 = vst [vmem:[#allocation43_spill] sm:$0xff] %v6169_v15  ;;  %7714 = vst [vmem:[#allocation44_spill] sm:$0xff] %v6171_v16  ;;  %v6229_v45 = vld [vmem:[#allocation14 + $0x1c] sm:$0xf]  ;;  %v6231_v46 = vld [vmem:[#allocation14 + $0x20] sm:$0xf] }
  0xcb   :  { %7715 = vst [vmem:[#allocation45_spill] sm:$0xff] %v6173_v17  ;;  %7716 = vst [vmem:[#allocation46_spill] sm:$0xff] %v6175_v18  ;;  %v6233_v47 = vld [vmem:[#allocation14 + $0x24] sm:$0xf]  ;;  %v6235_v48 = vld [vmem:[#allocation14 + $0x28] sm:$0xf] }
  0xcc   :  { %7717 = vst [vmem:[#allocation47_spill] sm:$0xff] %v6177_v19  ;;  %7718 = vst [vmem:[#allocation48_spill] sm:$0xff] %v6179_v20  ;;  %v6237_v49 = vld [vmem:[#allocation14 + $0x2c] sm:$0xf]  ;;  %v6239_v50 = vld [vmem:[#allocation14 + $0x30] sm:$0xf] }
  0xcd   :  { %7719 = vst [vmem:[#allocation49_spill] sm:$0xff] %v6181_v21  ;;  %7720 = vst [vmem:[#allocation50_spill] sm:$0xff] %v6183_v22  ;;  %v6241_v51 = vld [vmem:[#allocation14 + $0x34] sm:$0xf]  ;;  %v6243_v52 = vld [vmem:[#allocation14 + $0x38] sm:$0xf] }
  0xce   :  { %7721 = vst [vmem:[#allocation51_spill] sm:$0xff] %v6185_v23  ;;  %7722 = vst [vmem:[#allocation52_spill] sm:$0xff] %v6187_v24  ;;  %v6245_v53 = vld [vmem:[#allocation14 + $0x3c] sm:$0xf]  ;;  %v222_v55 = vld [vmem:[#allocation6 + $0x8] sm:$0xff] }
  0xcf   :  { %7723 = vst [vmem:[#allocation53_spill] sm:$0xff] %v6189_v25  ;;  %7724 = vst [vmem:[#allocation54_spill] sm:$0xff] %v6191_v26  ;;  %v5121_v57 = vpack.c.bf16 %v222_v55, %v221_v54  ;;  %v224_v58 = vld [vmem:[#allocation6 + $0x18] sm:$0xff]  ;;  %v225_v60 = vld [vmem:[#allocation6 + $0x20] sm:$0xff] }
  0xd0   :  { %7725 = vst [vmem:[#allocation55_spill] sm:$0xff] %v6193_v27  ;;  %7726 = vst [vmem:[#allocation56_spill] sm:$0xff] %v6195_v28  ;;  %v5124_v59 = vpack.c.bf16 %v224_v58, %v223_v56  ;;  %v226_v61 = vld [vmem:[#allocation6 + $0x28] sm:$0xff]  ;;  %v227_v62 = vld [vmem:[#allocation6 + $0x30] sm:$0xff] }
  0xd1   :  { %7727 = vst [vmem:[#allocation57_spill] sm:$0xff] %v6197_v29  ;;  %7728 = vst [vmem:[#allocation58_spill] sm:$0xff] %v6199_v30  ;;  %5122 = vmatpush3.bf16.msra.mxu0 %v5121_v57  ;;  %v228_v63 = vld [vmem:[#allocation6 + $0x38] sm:$0xff]  ;;  %v5127_v0 = vpack.c.bf16 %v226_v61, %v225_v60  ;;  %v229_v2 = vld [vmem:[#allocation6 + $0x40] sm:$0xff] }
  0xd2   :  { %7729 = vst [vmem:[#allocation59_spill] sm:$0xff] %v6201_v31  ;;  %7730 = vst [vmem:[#allocation60_spill] sm:$0xff] %v6203_v32  ;;  %5123 = vmatprep.subr.bf16.mxu0 %v5883_v1  ;;  %v230_v3 = vld [vmem:[#allocation6 + $0x48] sm:$0xff]  ;;  %v5130_v4 = vpack.c.bf16 %v228_v63, %v227_v62  ;;  %v231_v54 = vld [vmem:[#allocation6 + $0x50] sm:$0xff] }
  0xd3   :  { %7731 = vst [vmem:[#allocation61_spill] sm:$0xff] %v6205_v33  ;;  %7732 = vst [vmem:[#allocation62_spill] sm:$0xff] %v6207_v34  ;;  %v5133_v55 = vpack.c.bf16 %v230_v3, %v229_v2  ;;  %v232_v56 = vld [vmem:[#allocation6 + $0x58] sm:$0xff]  ;;  %v233_v58 = vld [vmem:[#allocation6 + $0x60] sm:$0xff] }
  0xd4   :  { %7733 = vst [vmem:[#allocation63_spill] sm:$0xff] %v6209_v35  ;;  %7734 = vst [vmem:[#allocation64_spill] sm:$0xff] %v6211_v36  ;;  %v5136_v57 = vpack.c.bf16 %v232_v56, %v231_v54  ;;  %v235_v61 = vld [vmem:[#allocation6 + $0x70] sm:$0xff]  ;;  %v236_v62 = vld [vmem:[#allocation6 + $0x78] sm:$0xff] }
  0xd5   :  { %7735 = vst [vmem:[#allocation65_spill] sm:$0xff] %v6213_v37  ;;  %7736 = vst [vmem:[#allocation66_spill] sm:$0xff] %v6215_v38  ;;  %5125 = vmatpush3.bf16.msra.mxu0 %v5124_v59  ;;  %v234_v59 = vld [vmem:[#allocation6 + $0x68] sm:$0xff]  ;;  %v5142_v63 = vpack.c.bf16 %v236_v62, %v235_v61  ;;  %v220_v2 = vld [vmem:[#allocation3] sm:$0xff] }
  0xd6   :  { %7737 = vst [vmem:[#allocation67_spill] sm:$0xff] %v6217_v39  ;;  %7738 = vst [vmem:[#allocation68_spill] sm:$0xff] %v6219_v40  ;;  %5126 = vmatprep.subr.bf16.mxu0 %v5883_v1  ;;  %v5139_v60 = vpack.c.bf16 %v234_v59, %v233_v58  ;;  %v4241_v3 = vld [vmem:[%s7607_s2] ss:$0 sm:$0xff]  ;;  %v5271_v58 = vld [vmem:[#allocation9] sm:$0xff]   ;;  %s6372_s2 = smov 0  }
  0xd7   :  { %7739 = vst [vmem:[#allocation69_spill] sm:$0xff] %v6221_v41  ;;  %7740 = vst [vmem:[#allocation70_spill] sm:$0xff] %v6223_v42  ;;  %4656 = vmatprep.mubr.bf16.mxu1 %v5271_v58  ;;  %v5279_v59 = vld [vmem:[#allocation12] sm:$0xff]   ;;  %v7752_v58 = vmov 0.0  }
  0xd8   :  { %7741 = vst [vmem:[#allocation71_spill] sm:$0xff] %v6225_v43  ;;  %7742 = vst [vmem:[#allocation72_spill] sm:$0xff] %v6227_v44 }
  0xd9   :  { %7743 = vst [vmem:[#allocation73_spill] sm:$0xff] %v6229_v45  ;;  %7744 = vst [vmem:[#allocation74_spill] sm:$0xff] %v6231_v46  ;;  %5128 = vmatpush3.bf16.msra.mxu0 %v5127_v0 }
  0xda   :  { %7745 = vst [vmem:[#allocation75_spill] sm:$0xff] %v6233_v47  ;;  %7746 = vst [vmem:[#allocation76_spill] sm:$0xff] %v6235_v48  ;;  %5129 = vmatprep.subr.bf16.mxu0 %v5883_v1 }
  0xdb   :  { %7747 = vst [vmem:[#allocation77_spill] sm:$0xff] %v6237_v49  ;;  %7748 = vst [vmem:[#allocation78_spill] sm:$0xff] %v6239_v50 }
  0xdc   :  { %7749 = vst [vmem:[#allocation79_spill] sm:$0xff] %v6241_v51  ;;  %7750 = vst [vmem:[#allocation80_spill] sm:$0xff] %v6243_v52 }
  0xdd   :  { %7751 = vst [vmem:[#allocation81_spill] sm:$0xff] %v6245_v53  ;;  %5131 = vmatpush3.bf16.msra.mxu0 %v5130_v4 }
  0xde   :  { %5132 = vmatprep.subr.bf16.mxu0 %v5883_v1 }
  0xe1   :  { %5134 = vmatpush3.bf16.msra.mxu0 %v5133_v55 }
  0xe2   :  { %5135 = vmatprep.subr.bf16.mxu0 %v5883_v1 }
  0xe5   :  { %5137 = vmatpush3.bf16.msra.mxu0 %v5136_v57 }
  0xe6   :  { %5138 = vmatprep.subr.bf16.mxu0 %v5883_v1 }
  0xe9   :  { %5140 = vmatpush3.bf16.msra.mxu0 %v5139_v60  ;;  %v6260_v60 = vld [vmem:[%s7608_s3] sm:$0xff] }
  0xea   :  { %5141 = vmatprep.subr.bf16.mxu0 %v5883_v1  ;;  %v332_v61 = vmul.f32 %v6260_v60, %v6260_v60 }
  0xed   :  { %5143 = vmatpush3.bf16.msra.mxu0 %v5142_v63 }
  0xf0   :  { %4638 = vmatmul.mubr.f32.vlgmr.msra.gmra.mrb[0].mxu0 %v220_v2 }
  0xf1   :  { %4688 = vmatprep.mubr.bf16.mxu0 %v5279_v59 }
 0x1c3   :  { %v310_v4 = vpop.f32.mrb[0].mxu0 }
 0x1c4   :  { %v311_v0 = vadd.f32 %v4241_v3, %v310_v4  ;;  %v4639_v54 = vpop.f32.mrb[1].mxu0 }
 0x1c6   :  { %v315_v55 = vmul.f32 0.01, %v311_v0  ;;  %vm314_vm3 = vcmp.ge.f32.partialorder %v311_v0, 0.0 }
 0x1c8   :  { %v316_v56 = vsel %vm314_vm3, %v311_v0, %v315_v55 }
 0x1c9   :  { %v317_v57 = vmul.f32 %v316_v56, %v316_v56 }
 0x1cb   :  { %318 = vadd.xlane.f32.xlu0 %v317_v57 }
 0x1cf   :  { %333 = vadd.xlane.f32.xlu0 %v332_v61  ;;  %v5280_v61 = vld [vmem:[#allocation12 + $0x8] sm:$0xff]  }
 0x258   :  { %v319_v62 = vpop.xlane.xlu0 %318 }
 0x259   :  { %5287 = vrsqrt.f32 %v319_v62  ;;  %vm322_vm4 = vcmp.eq.f32.partialorder %v319_v62, inf  ;;  %v325_v3 = vand.u32 2147483648, %v319_v62  ;;  %vm324_vm5 = vcmp.eq.f32.partialorder %v319_v62, 0.0 }
 0x263   :  { %v5288_v63 = vpop.eup %5287 }
 0x264   :  { %v321_v2 = vmul.f32 %v5288_v63, %v319_v62  ;;  %v5283_v63 = vld [vmem:[#allocation12 + $0x10] sm:$0xff]  }
 0x266   :  { %v323_v4 = vsel %vm322_vm4, %v319_v62, %v321_v2  ;;  %v5273_v62 = vld [vmem:[#allocation9 + $0x10] sm:$0xff]   ;;  %v5274_v2 = vld [vmem:[#allocation9 + $0x18] sm:$0xff]  }
 0x267   :  { %v326_v0 = vsel %vm324_vm5, %v325_v3, %v323_v4  ;;  %v5284_v3 = vld [vmem:[#allocation12 + $0x18] sm:$0xff]   ;;  %v5275_v4 = vld [vmem:[#allocation9 + $0x20] sm:$0xff]  }
 0x268   :  { %v327_v54 = vmax.f32 %v326_v0, 1e-12  ;;  %v5276_v0 = vld [vmem:[#allocation9 + $0x28] sm:$0xff]  }
 0x26a   :  { %5289 = vrcp.f32 %v327_v54  ;;  %v5277_v54 = vld [vmem:[#allocation9 + $0x30] sm:$0xff]  }
 0x274   :  { %v5290_v55 = vpop.eup %5289 }
 0x275   :  { %v329_v57 = vmul.f32 %v5290_v55, %v316_v56  ;;  %v5272_v56 = vld [vmem:[#allocation9 + $0x8] sm:$0xff]   ;;  %v5278_v55 = vld [vmem:[#allocation9 + $0x38] sm:$0xff]  }
 0x277   :  { %330 = vst [vmem:[#allocation2 + $0x80] sm:$0xff] %v329_v57  ;;  %v410_v59 = vpack.c.bf16 %v7752_v58, %v329_v57  ;;  %v5281_v57 = vld [vmem:[#allocation12 + $0x20] sm:$0xff]   ;;  %v5282_v58 = vld [vmem:[#allocation12 + $0x28] sm:$0xff]  }
 0x279   :  { %4640 = vmatprep.subr.bf16.mxu1 %v410_v59  ;;  %4672 = vmatprep.subr.bf16.mxu0 %v410_v59 }
 0x27a   :  { %4641 = vmatpush3.bf16.msra.mxu1 %v410_v59  ;;  %4673 = vmatpush3.bf16.msra.mxu0 %v410_v59 }
 0x27b   :  { %4642 = vmatprep.subr.bf16.mxu1 %v5883_v1  ;;  %4674 = vmatprep.subr.bf16.mxu0 %v5883_v1 }
 0x27e   :  { %4643 = vmatpush3.bf16.msra.mxu1 %v5883_v1  ;;  %4675 = vmatpush3.bf16.msra.mxu0 %v5883_v1 }
 0x27f   :  { %4644 = vmatprep.subr.bf16.mxu1 %v5883_v1  ;;  %4676 = vmatprep.subr.bf16.mxu0 %v5883_v1 }
 0x282   :  { %4645 = vmatpush3.bf16.msra.mxu1 %v5883_v1  ;;  %4677 = vmatpush3.bf16.msra.mxu0 %v5883_v1 }
 0x283   :  { %4646 = vmatprep.subr.bf16.mxu1 %v5883_v1  ;;  %4678 = vmatprep.subr.bf16.mxu0 %v5883_v1 }
 0x286   :  { %4647 = vmatpush3.bf16.msra.mxu1 %v5883_v1  ;;  %4679 = vmatpush3.bf16.msra.mxu0 %v5883_v1 }
 0x287   :  { %4648 = vmatprep.subr.bf16.mxu1 %v5883_v1  ;;  %4680 = vmatprep.subr.bf16.mxu0 %v5883_v1 }
 0x28a   :  { %4649 = vmatpush3.bf16.msra.mxu1 %v5883_v1  ;;  %4681 = vmatpush3.bf16.msra.mxu0 %v5883_v1 }
 0x28b   :  { %4650 = vmatprep.subr.bf16.mxu1 %v5883_v1  ;;  %4682 = vmatprep.subr.bf16.mxu0 %v5883_v1 }
 0x28e   :  { %4651 = vmatpush3.bf16.msra.mxu1 %v5883_v1  ;;  %4683 = vmatpush3.bf16.msra.mxu0 %v5883_v1 }
 0x28f   :  { %4652 = vmatprep.subr.bf16.mxu1 %v5883_v1  ;;  %4684 = vmatprep.subr.bf16.mxu0 %v5883_v1 }
 0x292   :  { %4653 = vmatpush3.bf16.msra.mxu1 %v5883_v1  ;;  %4685 = vmatpush3.bf16.msra.mxu0 %v5883_v1 }
 0x293   :  { %4654 = vmatprep.subr.bf16.mxu1 %v5883_v1  ;;  %4686 = vmatprep.subr.bf16.mxu0 %v5883_v1 }
 0x296   :  { %4655 = vmatpush3.bf16.msra.mxu1 %v5883_v1  ;;  %4687 = vmatpush3.bf16.msra.mxu0 %v5883_v1 }
 0x297   :  { %5144 = vmatprep.subr.bf16.mxu1 %v410_v59 }
 0x299   :  { %4657 = vmatmul.mubr.bf16.vlgmr.msra.gmra.mrb[0].mxu1 %v5272_v56  ;;  %4689 = vmatmul.mubr.bf16.vlgmr.msra.gmra.mrb[4].mxu0 %v5280_v61  ;;  %v5286_v56 = vld [vmem:[#allocation12 + $0x38] sm:$0xff]   ;;  %v334_v61 = vpop.xlane.xlu0 %333 }
 0x29a   :  { %5152 = vmatpush3.bf16.msra.mxu1 %v410_v59  ;;  %4660 = vmatprep.mubr.bf16.mxu1 %v5273_v62  ;;  %v5285_v59 = vld [vmem:[#allocation12 + $0x30] sm:$0xff]   ;;  %5291 = vrsqrt.f32 %v334_v61  ;;  %vm337_vm6 = vcmp.eq.f32.partialorder %v334_v61, inf  ;;  %vm339_vm7 = vcmp.eq.f32.partialorder %v334_v61, 0.0 }
 0x29b   :  { %5145 = vmatprep.subr.bf16.mxu1 %v5883_v1  ;;  %4692 = vmatprep.mubr.bf16.mxu0 %v5283_v63  ;;  %v340_v63 = vand.u32 2147483648, %v334_v61 }
 0x29e   :  { %5153 = vmatpush3.bf16.msra.mxu1 %v5883_v1 }
 0x29f   :  { %5146 = vmatprep.subr.bf16.mxu1 %v5883_v1 }
 0x2a1   :  { %4661 = vmatmul.mubr.bf16.gmra.mrb[4].mxu1 %v5274_v2  ;;  %4693 = vmatmul.mubr.bf16.gmra.mrb[8].mxu0 %v5284_v3 }
 0x2a2   :  { %5154 = vmatpush3.bf16.msra.mxu1 %v5883_v1  ;;  %4664 = vmatprep.mubr.bf16.mxu1 %v5275_v4 }
 0x2a3   :  { %5147 = vmatprep.subr.bf16.mxu1 %v5883_v1 }
 0x2a4   :  { %v5292_v62 = vpop.eup %5291 }
 0x2a5   :  { %v336_v2 = vmul.f32 %v5292_v62, %v334_v61 }
 0x2a6   :  { %5155 = vmatpush3.bf16.msra.mxu1 %v5883_v1 }
 0x2a7   :  { %5148 = vmatprep.subr.bf16.mxu1 %v5883_v1  ;;  %v338_v3 = vsel %vm337_vm6, %v334_v61, %v336_v2 }
 0x2a8   :  { %v341_v4 = vsel %vm339_vm7, %v340_v63, %v338_v3 }
 0x2a9   :  { %4665 = vmatmul.mubr.bf16.gmra.mrb[8].mxu1 %v5276_v0  ;;  %v342_v0 = vmax.f32 %v341_v4, 1e-12 }
 0x2aa   :  { %5156 = vmatpush3.bf16.msra.mxu1 %v5883_v1  ;;  %4668 = vmatprep.mubr.bf16.mxu1 %v5277_v54 }
 0x2ab   :  { %5149 = vmatprep.subr.bf16.mxu1 %v5883_v1  ;;  %5293 = vrcp.f32 %v342_v0 }
 0x2ae   :  { %5157 = vmatpush3.bf16.msra.mxu1 %v5883_v1 }
 0x2af   :  { %5150 = vmatprep.subr.bf16.mxu1 %v5883_v1 }
 0x2b1   :  { %4669 = vmatmul.mubr.bf16.gmra.mrb[12].mxu1 %v5278_v55 }
 0x2b2   :  { %5158 = vmatpush3.bf16.msra.mxu1 %v5883_v1  ;;  %4696 = vmatprep.mubr.bf16.mxu1 %v5281_v57 }
 0x2b3   :  { %5151 = vmatprep.subr.bf16.mxu1 %v5883_v1 }
 0x2b5   :  { %v5294_v54 = vpop.eup %5293 }
 0x2b6   :  { %5159 = vmatpush3.bf16.msra.mxu1 %v5883_v1  ;;  %v344_v55 = vmul.f32 %v5294_v54, %v6260_v60 }
 0x2b8   :  { %345 = vst [vmem:[#allocation2] sm:$0xff] %v344_v55 }
 0x2b9   :  { %4697 = vmatmul.mubr.bf16.vlgmr.msra.gmra.mrb[16].mxu1 %v5282_v58 }
 0x2ba   :  { %4700 = vmatprep.mubr.bf16.mxu1 %v5285_v59 }
 0x2c1   :  { %4701 = vmatmul.mubr.bf16.gmra.mrb[20].mxu1 %v5286_v56 }
 0x36c   :  { %v6308_v1 = vpop.f32.mrb[0].mxu1  ;;  %v6310_v57 = vpop.f32.mrb[4].mxu0 }
 0x36d   :  { %v6312_v58 = vpop.f32.mrb[1].mxu1  ;;  %v6314_v59 = vpop.f32.mrb[5].mxu0 }
 0x36e   :  { %v6316_v56 = vpop.f32.mrb[2].mxu1  ;;  %v6318_v62 = vpop.f32.mrb[6].mxu0 }
 0x36f   :  { %v6320_v61 = vpop.f32.mrb[3].mxu1  ;;  %v6322_v63 = vpop.f32.mrb[7].mxu0 }
 0x370   :  { %7753 = vst [vmem:[#allocation82_spill] sm:$0xff] %v6320_v61  ;;  %7754 = vst [vmem:[#allocation83_spill] sm:$0xff] %v6322_v63 }
 0x374   :  { %v6324_v2 = vpop.f32.mrb[4].mxu1  ;;  %v6326_v60 = vpop.f32.mrb[8].mxu0 }
 0x375   :  { %7755 = vst [vmem:[#allocation84_spill] sm:$0xff] %v6324_v2  ;;  %7756 = vst [vmem:[#allocation85_spill] sm:$0xff] %v6326_v60  ;;  %v6328_v3 = vpop.f32.mrb[5].mxu1  ;;  %v6330_v4 = vpop.f32.mrb[9].mxu0 }
 0x376   :  { %7757 = vst [vmem:[#allocation86_spill] sm:$0xff] %v6328_v3  ;;  %7758 = vst [vmem:[#allocation87_spill] sm:$0xff] %v6330_v4  ;;  %v6332_v0 = vpop.f32.mrb[6].mxu1  ;;  %v6334_v54 = vpop.f32.mrb[10].mxu0 }
 0x377   :  { %7759 = vst [vmem:[#allocation88_spill] sm:$0xff] %v6332_v0  ;;  %7760 = vst [vmem:[#allocation89_spill] sm:$0xff] %v6334_v54  ;;  %v6336_v55 = vpop.f32.mrb[7].mxu1  ;;  %v6338_v44 = vpop.f32.mrb[11].mxu0 }
 0x378   :  { %7761 = vst [vmem:[#allocation90_spill] sm:$0xff] %v6336_v55  ;;  %7762 = vst [vmem:[#allocation91_spill] sm:$0xff] %v6338_v44 }
 0x37c   :  { %v6340_v45 = vpop.f32.mrb[8].mxu1 }
 0x37d   :  { %7763 = vst [vmem:[#allocation92_spill] sm:$0xff] %v6340_v45  ;;  %v6342_v52 = vpop.f32.mrb[9].mxu1 }
 0x37e   :  { %7764 = vst [vmem:[#allocation93_spill] sm:$0xff] %v6342_v52  ;;  %v6344_v53 = vpop.f32.mrb[10].mxu1 }
 0x37f   :  { %7765 = vst [vmem:[#allocation94_spill] sm:$0xff] %v6344_v53  ;;  %v6346_v42 = vpop.f32.mrb[11].mxu1 }
 0x380   :  { %7766 = vst [vmem:[#allocation95_spill] sm:$0xff] %v6346_v42 }
 0x384   :  { %v6348_v43 = vpop.f32.mrb[12].mxu1 }
 0x385   :  { %7767 = vst [vmem:[#allocation96_spill] sm:$0xff] %v6348_v43  ;;  %v6350_v50 = vpop.f32.mrb[13].mxu1 }
 0x386   :  { %7768 = vst [vmem:[#allocation97_spill] sm:$0xff] %v6350_v50  ;;  %v6352_v51 = vpop.f32.mrb[14].mxu1 }
 0x387   :  { %7769 = vst [vmem:[#allocation98_spill] sm:$0xff] %v6352_v51  ;;  %v6354_v48 = vpop.f32.mrb[15].mxu1 }
 0x388   :  { %7770 = vst [vmem:[#allocation99_spill] sm:$0xff] %v6354_v48 }
 0x38c   :  { %v6356_v49 = vpop.f32.mrb[16].mxu1 }
 0x38d   :  { %7771 = vst [vmem:[#allocation100_spill] sm:$0xff] %v6356_v49  ;;  %v6358_v40 = vpop.f32.mrb[17].mxu1 }
 0x38e   :  { %7772 = vst [vmem:[#allocation101_spill] sm:$0xff] %v6358_v40  ;;  %v6360_v41 = vpop.f32.mrb[18].mxu1 }
 0x38f   :  { %7773 = vst [vmem:[#allocation102_spill] sm:$0xff] %v6360_v41  ;;  %v6362_v5 = vpop.f32.mrb[19].mxu1 }
 0x390   :  { %7774 = vst [vmem:[#allocation103_spill] sm:$0xff] %v6362_v5 }
 0x394   :  { %v6364_v46 = vpop.f32.mrb[20].mxu1 }
 0x395   :  { %7775 = vst [vmem:[#allocation104_spill] sm:$0xff] %v6364_v46  ;;  %v6366_v47 = vpop.f32.mrb[21].mxu1 }
 0x396   :  { %7776 = vst [vmem:[#allocation105_spill] sm:$0xff] %v6366_v47  ;;  %v6368_v38 = vpop.f32.mrb[22].mxu1 }
 0x397   :  { %7777 = vst [vmem:[#allocation106_spill] sm:$0xff] %v6368_v38  ;;  %v6370_v39 = vpop.f32.mrb[23].mxu1 }
 0x398   :  { %7778 = vst [vmem:[#allocation107_spill] sm:$0xff] %v6370_v39 }
 0x399 LB: > { %v6377_v48 = vld [vmem:[#allocation2] sm:$0xff]  ;;  %v6379_v51 = vld [vmem:[#allocation2 + $0x8] sm:$0xff]  ;;  %v6381_v50 = vld [vmem:[#allocation2 + $0x10] sm:$0xff]  ;;  %s745_s2 = sadd.s32 1, %s5867_s2   ;;  %s5867_s2 = sphi %s6372_s2, %s745_s2  }
 0x39a   : > { %7779 = vst [vmem:[#allocation108_spill] sm:$0xff] %v6379_v51  ;;  %v7780_v7 = vld [vmem:[#allocation35_spill] sm:$0xff]  ;;  %v7781_v6 = vld [vmem:[#allocation34_spill] sm:$0xff]  ;;  %v762_v38 = vpack.c.bf16 %v6379_v51, %v6377_v48  ;;  %v6393_v46 = vld [vmem:[#allocation2 + $0x18] sm:$0xff]  ;;  %p742_p10 = scmp.ge.s32.totalorder %s745_s2, 3  }
 0x39b   : > { %v6385_v47 = vcombine.low %v7781_v6, %v7780_v7  ;;  %v7783_v23 = vld [vmem:[#allocation51_spill] sm:$0xff]  ;;  %v7784_v22 = vld [vmem:[#allocation50_spill] sm:$0xff]  ;;  %v763_v43 = vpack.c.bf16 %v6393_v46, %v6381_v50  ;;  %v6431_v51 = vld [vmem:[#allocation2 + $0x78] sm:$0xff]  ;;  %s5888_s3 = smov (%p742_p10), 112   ;;  %s5890_s14 = smov (%p742_p10), [#allocation20]  }
 0x39c   : > { %v6389_v39 = vcombine.low %v7784_v22, %v7783_v23  ;;  %v6397_v5 = vld [vmem:[#allocation2 + $0x20] sm:$0xff]  ;;  %v6399_v42 = vld [vmem:[#allocation2 + $0x28] sm:$0xff]  ;;  %4704 = vmatprep.subr.bf16.mxu0 %v762_v38  ;;  %4736 = vmatprep.subr.bf16.mxu1 %v762_v38  ;;  %v6405_v7 = vld [vmem:[#allocation2 + $0x30] sm:$0xff]  ;;  %7792 = vst [vmem:[#allocation117_spill] sm:$0xff] %v6431_v51  ;;  %s4203_s25 = sshll.u32 (%p742_p10), %s5890_s14, 4  ;;  %s4204_s25 = int_to_ptr.vmem [resolvable:$true] %s4203_s25 }
 0x39d   : > { %7782 = vst [vmem:[#allocation109_spill] sm:$0xff] %v6385_v47  ;;  %7786 = vst [vmem:[#allocation111_spill] sm:$0xff] %v6397_v5  ;;  %4720 = vmatprep.mubr.bf16.mxu0 %v6385_v47  ;;  %4705 = vmatpush3.bf16.msra.mxu0 %v762_v38  ;;  %v764_v6 = vpack.c.bf16 %v6399_v42, %v6397_v5  ;;  %v6407_v22 = vld [vmem:[#allocation2 + $0x38] sm:$0xff]  ;;  %v6413_v47 = vld [vmem:[#allocation2 + $0x48] sm:$0xff]  ;;  %s5801_s15 = scalar_lea.vmem (%p742_p10), %s4204_s25, 4096  ;;  %p5806_p12 = scmp.lt.s32.totalorder (%p742_p10), %s4204_s25, %s4204_s25 }
 0x39e   : > { %7785 = vst [vmem:[#allocation110_spill] sm:$0xff] %v6389_v39  ;;  %7787 = vst [vmem:[#allocation112_spill] sm:$0xff] %v6399_v42  ;;  %4752 = vmatprep.mubr.bf16.mxu1 %v6389_v39  ;;  %4737 = vmatpush3.bf16.msra.mxu1 %v762_v38  ;;  %v765_v23 = vpack.c.bf16 %v6407_v22, %v6405_v7  ;;  %v6411_v39 = vld [vmem:[#allocation2 + $0x40] sm:$0xff]  ;;  %v6417_v42 = vld [vmem:[#allocation2 + $0x50] sm:$0xff]  ;;  %p5802_p11 = scmp.ne.s32.totalorder (%p742_p10), %s4204_s25, %s5801_s15  ;;  %p5807_p13 = scmp.lt.s32.totalorder (%p742_p10), %s5801_s15, %s5801_s15 }
 0x39f   : > { %4706 = vmatprep.subr.bf16.mxu0 %v763_v43  ;;  %4738 = vmatprep.subr.bf16.mxu1 %v763_v43  ;;  %7788 = vst [vmem:[#allocation113_spill] sm:$0xff] %v6405_v7  ;;  %7789 = vst [vmem:[#allocation114_spill] sm:$0xff] %v6407_v22  ;;  %v766_v38 = vpack.c.bf16 %v6413_v47, %v6411_v39  ;;  %v6419_v5 = vld [vmem:[#allocation2 + $0x58] sm:$0xff]  ;;  %v6423_v22 = vld [vmem:[#allocation2 + $0x60] sm:$0xff] }
 0x3a0   : > { %7790 = vst [vmem:[#allocation115_spill] sm:$0xff] %v6413_v47  ;;  %v6425_v7 = vld [vmem:[#allocation2 + $0x68] sm:$0xff]  ;;  %v6429_v47 = vld [vmem:[#allocation2 + $0x70] sm:$0xff]  ;;  %v7793_v9 = vld [vmem:[#allocation37_spill] sm:$0xff]  ;;  %p5808_p0 = por (%p742_p10), %p5807_p13, %p5806_p12 }
 0x3a1   : > { %4707 = vmatpush3.bf16.msra.mxu0 %v763_v43  ;;  %7791 = vst [vmem:[#allocation116_spill] sm:$0xff] %v6425_v7  ;;  %v7794_v8 = vld [vmem:[#allocation36_spill] sm:$0xff]  ;;  %v7795_v25 = vld [vmem:[#allocation53_spill] sm:$0xff]  ;;  %v7797_v11 = vld [vmem:[#allocation39_spill] sm:$0xff] }
 0x3a2   : > { %4739 = vmatpush3.bf16.msra.mxu1 %v763_v43  ;;  %4708 = vmatprep.subr.bf16.mxu0 %v764_v6  ;;  %v767_v43 = vpack.c.bf16 %v6419_v5, %v6417_v42  ;;  %v7796_v24 = vld [vmem:[#allocation52_spill] sm:$0xff]  ;;  %v7798_v10 = vld [vmem:[#allocation38_spill] sm:$0xff]  ;;  %v7799_v27 = vld [vmem:[#allocation55_spill] sm:$0xff]  ;;  %p5809_p1 = pnand (%p742_p10), %p5808_p0, %p5802_p11 }
 0x3a3   : > { %4740 = vmatprep.subr.bf16.mxu1 %v764_v6  ;;  %v7800_v26 = vld [vmem:[#allocation54_spill] sm:$0xff]  ;;  %v7801_v13 = vld [vmem:[#allocation41_spill] sm:$0xff]  ;;  %v7802_v12 = vld [vmem:[#allocation40_spill] sm:$0xff] }
 0x3a4   : > { %v7803_v29 = vld [vmem:[#allocation57_spill] sm:$0xff]  ;;  %v7804_v28 = vld [vmem:[#allocation56_spill] sm:$0xff]  ;;  %v7805_v15 = vld [vmem:[#allocation43_spill] sm:$0xff] }
 0x3a5   : > { %4709 = vmatpush3.bf16.msra.mxu0 %v764_v6  ;;  %v7806_v14 = vld [vmem:[#allocation42_spill] sm:$0xff]  ;;  %v7808_v31 = vld [vmem:[#allocation59_spill] sm:$0xff]  ;;  %v7810_v17 = vld [vmem:[#allocation45_spill] sm:$0xff] }
 0x3a6   : > { %4741 = vmatpush3.bf16.msra.mxu1 %v764_v6  ;;  %4710 = vmatprep.subr.bf16.mxu0 %v765_v23  ;;  %v768_v6 = vpack.c.bf16 %v6425_v7, %v6423_v22  ;;  %v6441_v7 = vcombine.low %v7796_v24, %v7795_v25  ;;  %v7809_v30 = vld [vmem:[#allocation58_spill] sm:$0xff]  ;;  %v7811_v16 = vld [vmem:[#allocation44_spill] sm:$0xff]  ;;  %v7813_v33 = vld [vmem:[#allocation61_spill] sm:$0xff] }
 0x3a7   : > { %4742 = vmatprep.subr.bf16.mxu1 %v765_v23  ;;  %v7814_v32 = vld [vmem:[#allocation60_spill] sm:$0xff]  ;;  %v7816_v19 = vld [vmem:[#allocation47_spill] sm:$0xff]  ;;  %v7817_v18 = vld [vmem:[#allocation46_spill] sm:$0xff] }
 0x3a8   : > { %v7819_v35 = vld [vmem:[#allocation63_spill] sm:$0xff]  ;;  %v7820_v34 = vld [vmem:[#allocation62_spill] sm:$0xff]  ;;  %v7822_v21 = vld [vmem:[#allocation49_spill] sm:$0xff] }
 0x3a9   : > { %4711 = vmatpush3.bf16.msra.mxu0 %v765_v23  ;;  %v7823_v20 = vld [vmem:[#allocation48_spill] sm:$0xff]  ;;  %v7825_v37 = vld [vmem:[#allocation65_spill] sm:$0xff]  ;;  %v7828_v61 = vld [vmem:[#allocation82_spill] sm:$0xff] }
 0x3aa   : > { %4743 = vmatpush3.bf16.msra.mxu1 %v765_v23  ;;  %4712 = vmatprep.subr.bf16.mxu0 %v766_v38  ;;  %v769_v23 = vpack.c.bf16 %v6431_v51, %v6429_v47  ;;  %v6449_v51 = vcombine.low %v7800_v26, %v7799_v27  ;;  %v7826_v36 = vld [vmem:[#allocation64_spill] sm:$0xff]  ;;  %v7829_v63 = vld [vmem:[#allocation83_spill] sm:$0xff]  ;;  %v7831_v60 = vld [vmem:[#allocation85_spill] sm:$0xff] }
 0x3ab   : > { %4744 = vmatprep.subr.bf16.mxu1 %v766_v38  ;;  %v7830_v2 = vld [vmem:[#allocation84_spill] sm:$0xff]  ;;  %v7832_v4 = vld [vmem:[#allocation87_spill] sm:$0xff]  ;;  %v7833_v3 = vld [vmem:[#allocation86_spill] sm:$0xff] }
 0x3ac   : > { %v7834_v0 = vld [vmem:[#allocation88_spill] sm:$0xff]  ;;  %v7835_v54 = vld [vmem:[#allocation89_spill] sm:$0xff]  ;;  %v7836_v55 = vld [vmem:[#allocation90_spill] sm:$0xff] }
 0x3ad   : > { %4713 = vmatpush3.bf16.msra.mxu0 %v766_v38  ;;  %v7837_v44 = vld [vmem:[#allocation91_spill] sm:$0xff]  ;;  %v7838_v45 = vld [vmem:[#allocation92_spill] sm:$0xff]  ;;  %v7840_v52 = vld [vmem:[#allocation93_spill] sm:$0xff] }
 0x3ae   : > { %4745 = vmatpush3.bf16.msra.mxu1 %v766_v38  ;;  %4714 = vmatprep.subr.bf16.mxu0 %v767_v43  ;;  %v6437_v38 = vcombine.low %v7794_v8, %v7793_v9  ;;  %v6465_v8 = vcombine.low %v7806_v14, %v7805_v15  ;;  %v6469_v9 = vcombine.low %v7809_v30, %v7808_v31  ;;  %v7839_v49 = vld [vmem:[#allocation100_spill] sm:$0xff]  ;;  %v7841_v40 = vld [vmem:[#allocation101_spill] sm:$0xff]  ;;  %v7842_v53 = vld [vmem:[#allocation94_spill] sm:$0xff] }
 0x3af   : > { %4746 = vmatprep.subr.bf16.mxu1 %v767_v43  ;;  %v6497_v14 = vcombine.low %v7823_v20, %v7822_v21  ;;  %v6501_v15 = vcombine.low %v7826_v36, %v7825_v37  ;;  %v7843_v41 = vld [vmem:[#allocation102_spill] sm:$0xff] }
 0x3b0   : > { %7807 = vst [vmem:[#allocation118_spill] sm:$0xff] %v6465_v8 }
 0x3b1   : > { %4715 = vmatpush3.bf16.msra.mxu0 %v767_v43  ;;  %7824 = vst [vmem:[#allocation123_spill] sm:$0xff] %v6497_v14  ;;  %7827 = vst [vmem:[#allocation124_spill] sm:$0xff] %v6501_v15 }
 0x3b2   : > { %4747 = vmatpush3.bf16.msra.mxu1 %v767_v43  ;;  %4716 = vmatprep.subr.bf16.mxu0 %v768_v6  ;;  %v6445_v43 = vcombine.low %v7798_v10, %v7797_v11  ;;  %v6477_v10 = vcombine.low %v7811_v16, %v7810_v17  ;;  %v6481_v11 = vcombine.low %v7814_v32, %v7813_v33 }
 0x3b3   : > { %4748 = vmatprep.subr.bf16.mxu1 %v768_v6 }
 0x3b4   : > { %7812 = vst [vmem:[#allocation119_spill] sm:$0xff] %v6477_v10  ;;  %7815 = vst [vmem:[#allocation120_spill] sm:$0xff] %v6481_v11 }
 0x3b5   : > { %4717 = vmatpush3.bf16.msra.mxu0 %v768_v6 }
 0x3b6   : > { %4749 = vmatpush3.bf16.msra.mxu1 %v768_v6  ;;  %4718 = vmatprep.subr.bf16.mxu0 %v769_v23  ;;  %v6457_v6 = vcombine.low %v7802_v12, %v7801_v13  ;;  %v6485_v12 = vcombine.low %v7817_v18, %v7816_v19  ;;  %v6489_v13 = vcombine.low %v7820_v34, %v7819_v35 }
 0x3b7   : > { %4750 = vmatprep.subr.bf16.mxu1 %v769_v23 }
 0x3b8   : > { %7818 = vst [vmem:[#allocation121_spill] sm:$0xff] %v6485_v12  ;;  %7821 = vst [vmem:[#allocation122_spill] sm:$0xff] %v6489_v13 }
 0x3b9   : > { %4719 = vmatpush3.bf16.msra.mxu0 %v769_v23 }
 0x3ba   : > { %4751 = vmatpush3.bf16.msra.mxu1 %v769_v23  ;;  %v6461_v23 = vcombine.low %v7804_v28, %v7803_v29 }
 0x3bc   : > { %4721 = vmatmul.mubr.bf16.vlgmr.msra.gmra.mrb[0].mxu0 %v6437_v38 }
 0x3bd   : > { %4753 = vmatmul.mubr.bf16.vlgmr.msra.gmra.mrb[0].mxu1 %v6441_v7  ;;  %4724 = vmatprep.mubr.bf16.mxu0 %v6445_v43 }
 0x3be   : > { %4756 = vmatprep.mubr.bf16.mxu1 %v6449_v51 }
 0x3c4   : > { %4725 = vmatmul.mubr.bf16.gmra.mrb[4].mxu0 %v6457_v6 }
 0x3c5   : > { %4757 = vmatmul.mubr.bf16.gmra.mrb[4].mxu1 %v6461_v23  ;;  %4728 = vmatprep.mubr.bf16.mxu0 %v6465_v8 }
 0x3c6   : > { %4760 = vmatprep.mubr.bf16.mxu1 %v6469_v9 }
 0x3cc   : > { %4729 = vmatmul.mubr.bf16.gmra.mrb[8].mxu0 %v6477_v10 }
 0x3cd   : > { %4761 = vmatmul.mubr.bf16.gmra.mrb[8].mxu1 %v6481_v11  ;;  %4732 = vmatprep.mubr.bf16.mxu0 %v6485_v12 }
 0x3ce   : > { %4764 = vmatprep.mubr.bf16.mxu1 %v6489_v13 }
 0x3d4   : > { %4733 = vmatmul.mubr.bf16.gmra.mrb[12].mxu0 %v6497_v14 }
 0x3d5   : > { %4765 = vmatmul.mubr.bf16.gmra.mrb[12].mxu1 %v6501_v15 }
 0x48f   : > { %v4722_v16 = vpop.f32.mrb[0].mxu0 }
 0x490   : > { %v4754_v17 = vpop.f32.mrb[0].mxu1  ;;  %v6506_v18 = vadd.f32 %v4722_v16, %v6308_v1  ;;  %v852_v24 = vpop.f32.mrb[1].mxu0 }
 0x491   : > { %v1006_v19 = vadd.f32 %v4754_v17, %v6310_v57  ;;  %v997_v25 = vpop.f32.mrb[1].mxu1  ;;  %v6510_v20 = vadd.f32 %v852_v24, %v6312_v58  ;;  %v4723_v26 = vpop.f32.mrb[2].mxu0 }
 0x492   : > { %v998_v21 = vadd.f32 %v997_v25, %v6314_v59  ;;  %v4755_v27 = vpop.f32.mrb[2].mxu1  ;;  %v6514_v28 = vadd.f32 %v4723_v26, %v6316_v56  ;;  %v855_v30 = vpop.f32.mrb[3].mxu0 }
 0x493   : > { %v1009_v29 = vadd.f32 %v4755_v27, %v6318_v62  ;;  %v1000_v31 = vpop.f32.mrb[3].mxu1  ;;  %v1062_v16 = vmul.f32 %v1006_v19, %v6506_v18  ;;  %v6519_v17 = vadd.f32 %v855_v30, %v7828_v61 }
 0x494   : > { %v1001_v32 = vadd.f32 %v1000_v31, %v7829_v63  ;;  %v1060_v24 = vmul.f32 %v998_v21, %v6510_v20 }
 0x495   : > { %1080 = vadd.xlane.f32.xlu1 %v1062_v16  ;;  %v1063_v25 = vmul.f32 %v1009_v29, %v6514_v28 }
 0x496   : > { %1076 = vadd.xlane.f32.xlu0 %v1060_v24  ;;  %v1061_v26 = vmul.f32 %v1001_v32, %v6519_v17 }
 0x497   : > { %v4726_v33 = vpop.f32.mrb[4].mxu0 }
 0x498   : > { %v4758_v34 = vpop.f32.mrb[4].mxu1  ;;  %v6526_v27 = vadd.f32 %v4726_v33, %v7830_v2  ;;  %v868_v30 = vpop.f32.mrb[5].mxu0  ;;  %v7853_v2 = vld [vmem:[#allocation107_spill] sm:$0xff] }
 0x499   : > { %v1022_v19 = vadd.f32 %v4758_v34, %v7831_v60  ;;  %v1013_v35 = vpop.f32.mrb[5].mxu1  ;;  %1082 = vadd.xlane.f32.xlu1 %v1063_v25  ;;  %v6531_v21 = vadd.f32 %v868_v30, %v7833_v3  ;;  %v4727_v16 = vpop.f32.mrb[6].mxu0  ;;  %v7848_v3 = vld [vmem:[#allocation97_spill] sm:$0xff] }
 0x49a   : > { %v1014_v31 = vadd.f32 %v1013_v35, %v7832_v4  ;;  %v4759_v29 = vpop.f32.mrb[6].mxu1  ;;  %1078 = vadd.xlane.f32.xlu0 %v1061_v26  ;;  %v6534_v32 = vadd.f32 %v4727_v16, %v7834_v0  ;;  %v871_v33 = vpop.f32.mrb[7].mxu0  ;;  %v7851_v4 = vld [vmem:[#allocation106_spill] sm:$0xff] }
 0x49b   : > { %v1025_v24 = vadd.f32 %v4759_v29, %v7835_v54  ;;  %v1016_v36 = vpop.f32.mrb[7].mxu1  ;;  %v1066_v34 = vmul.f32 %v1022_v19, %v6526_v27  ;;  %v6539_v25 = vadd.f32 %v871_v33, %v7836_v55 }
 0x49c   : > { %v1017_v35 = vadd.f32 %v1016_v36, %v7837_v44  ;;  %v1064_v30 = vmul.f32 %v1014_v31, %v6531_v21  ;;  %v7845_v44 = vld [vmem:[#allocation103_spill] sm:$0xff] }
 0x49d   : > { %v1067_v37 = vmul.f32 %v1025_v24, %v6534_v32 }
 0x49e   : > { %1084 = vadd.xlane.f32.xlu0 %v1064_v30  ;;  %v1065_v26 = vmul.f32 %v1017_v35, %v6539_v25 }
 0x49f   : > { %v4730_v16 = vpop.f32.mrb[8].mxu0 }
 0x4a0   : > { %v4762_v0 = vpop.f32.mrb[8].mxu1  ;;  %1086 = vadd.xlane.f32.xlu1 %v1065_v26  ;;  %v6546_v29 = vadd.f32 %v4730_v16, %v7838_v45  ;;  %v884_v54 = vpop.f32.mrb[9].mxu0 }
 0x4a1   : > { %v1038_v19 = vadd.f32 %v4762_v0, %v7839_v49  ;;  %v1029_v33 = vpop.f32.mrb[9].mxu1  ;;  %v6550_v55 = vadd.f32 %v884_v54, %v7840_v52  ;;  %v4731_v31 = vpop.f32.mrb[10].mxu0  ;;  %v7844_v0 = vld [vmem:[#allocation95_spill] sm:$0xff] }
 0x4a2   : > { %v1030_v36 = vadd.f32 %v1029_v33, %v7841_v40  ;;  %v4763_v24 = vpop.f32.mrb[10].mxu1  ;;  %1088 = vadd.xlane.f32.xlu0 %v1066_v34  ;;  %v6554_v35 = vadd.f32 %v4731_v31, %v7842_v53  ;;  %v887_v26 = vpop.f32.mrb[11].mxu0 }
 0x4a3   : > { %v1041_v30 = vadd.f32 %v4763_v24, %v7843_v41  ;;  %v1032_v16 = vpop.f32.mrb[11].mxu1  ;;  %v1070_v45 = vmul.f32 %v1038_v19, %v6546_v29  ;;  %v6559_v49 = vadd.f32 %v887_v26, %v7844_v0  ;;  %v7846_v24 = vld [vmem:[#allocation96_spill] sm:$0xff] }
 0x4a4   : > { %v1033_v54 = vadd.f32 %v1032_v16, %v7845_v44  ;;  %1090 = vadd.xlane.f32.xlu1 %v1067_v37  ;;  %v1068_v33 = vmul.f32 %v1030_v36, %v6550_v55  ;;  %v7847_v19 = vld [vmem:[#allocation104_spill] sm:$0xff]  ;;  %v7849_v37 = vld [vmem:[#allocation105_spill] sm:$0xff] }
 0x4a5   : > { %v1071_v40 = vmul.f32 %v1041_v30, %v6554_v35 }
 0x4a6   : > { %1092 = vadd.xlane.f32.xlu0 %v1068_v33  ;;  %v1069_v34 = vmul.f32 %v1033_v54, %v6559_v49  ;;  %v7850_v33 = vld [vmem:[#allocation98_spill] sm:$0xff] }
 0x4a7   : > { %v4734_v31 = vpop.f32.mrb[12].mxu0 }
 0x4a8   : > { %v4766_v53 = vpop.f32.mrb[12].mxu1  ;;  %1094 = vadd.xlane.f32.xlu1 %v1069_v34  ;;  %v6566_v41 = vadd.f32 %v4734_v31, %v7846_v24  ;;  %v900_v26 = vpop.f32.mrb[13].mxu0 }
 0x4a9   : > { %v1054_v52 = vadd.f32 %v4766_v53, %v7847_v19  ;;  %v1045_v0 = vpop.f32.mrb[13].mxu1  ;;  %v6570_v44 = vadd.f32 %v900_v26, %v7848_v3  ;;  %v4735_v16 = vpop.f32.mrb[14].mxu0  ;;  %v7852_v53 = vld [vmem:[#allocation99_spill] sm:$0xff] }
 0x4aa   : > { %v1046_v36 = vadd.f32 %v1045_v0, %v7849_v37  ;;  %v4767_v30 = vpop.f32.mrb[14].mxu1  ;;  %1096 = vadd.xlane.f32.xlu0 %v1070_v45  ;;  %v6574_v54 = vadd.f32 %v4735_v16, %v7850_v33  ;;  %v903_v60 = vpop.f32.mrb[15].mxu0  ;;  %v7855_v37 = vld [vmem:[#allocation66_spill] sm:$0xff] }
 0x4ab   : > { %v1057_v34 = vadd.f32 %v4767_v30, %v7851_v4  ;;  %v1048_v31 = vpop.f32.mrb[15].mxu1  ;;  %v1074_v24 = vmul.f32 %v1054_v52, %v6566_v41  ;;  %v6579_v19 = vadd.f32 %v903_v60, %v7852_v53  ;;  %v7854_v4 = vld [vmem:[#allocation67_spill] sm:$0xff]  ;;  %v7858_v60 = vld [vmem:[#allocation74_spill] sm:$0xff] }
 0x4ac   : > { %v1049_v3 = vadd.f32 %v1048_v31, %v7853_v2  ;;  %1098 = vadd.xlane.f32.xlu1 %v1071_v40  ;;  %v1072_v26 = vmul.f32 %v1046_v36, %v6570_v44  ;;  %v6587_v16 = vcombine.low %v7855_v37, %v7854_v4  ;;  %v7857_v52 = vld [vmem:[#allocation75_spill] sm:$0xff] }
 0x4ad   : > { %v1075_v0 = vmul.f32 %v1057_v34, %v6574_v54  ;;  %v6591_v30 = vcombine.low %v7858_v60, %v7857_v52 }
 0x4ae   : > { %1100 = vadd.xlane.f32.xlu0 %v1072_v26  ;;  %v1073_v45 = vmul.f32 %v1049_v3, %v6579_v19  ;;  %7856 = vst [vmem:[#allocation125_spill] sm:$0xff] %v6587_v16  ;;  %4784 = vmatprep.mubr.bf16.mxu0 %v6587_v16 }
 0x4af   : > { %7859 = vst [vmem:[#allocation126_spill] sm:$0xff] %v6591_v30  ;;  %4792 = vmatprep.mubr.bf16.mxu1 %v6591_v30 }
 0x4b0   : > { %1102 = vadd.xlane.f32.xlu1 %v1073_v45 }
 0x4b2   : > { %1104 = vadd.xlane.f32.xlu0 %v1074_v24 }
 0x4b4   : > { %1106 = vadd.xlane.f32.xlu1 %v1075_v0 }
 0x522   : > { %v1081_v40 = vpop.xlane.xlu1 %1080 }
 0x523   : > { %v1112_v2 = vmul.f32 1.442695, %v1081_v40  ;;  %v1077_v36 = vpop.xlane.xlu0 %1076 }
 0x524   : > { %v1108_v33 = vmul.f32 1.442695, %v1077_v36  ;;  %v7860_v36 = vld [vmem:[#allocation33_spill] sm:$0xff] }
 0x525   : > { %5297 = vpow2.f32 %v1112_v2  ;;  %v1142_v2 = vadd.f32 %v7860_v36, %v6506_v18 }
 0x526   : > { %v1083_v34 = vpop.xlane.xlu1 %1082  ;;  %5299 = vpow2.f32 %v1108_v33  ;;  %v1143_v33 = vadd.f32 %v7860_v36, %v6514_v28 }
 0x527   : > { %v1114_v31 = vmul.f32 1.442695, %v1083_v34  ;;  %v1079_v24 = vpop.xlane.xlu0 %1078 }
 0x528   : > { %v1110_v53 = vmul.f32 1.442695, %v1079_v24  ;;  %v1140_v24 = vadd.f32 %v7860_v36, %v6510_v20 }
 0x529   : > { %5301 = vpow2.f32 %v1114_v31 }
 0x52a   : > { %5303 = vpow2.f32 %v1110_v53  ;;  %v1141_v53 = vadd.f32 %v7860_v36, %v6519_v17  ;;  %v1144_v17 = vadd.f32 %v7860_v36, %v6531_v21  ;;  %v1146_v21 = vadd.f32 %v7860_v36, %v6526_v27 }
 0x52b   : > { %v1085_v3 = vpop.xlane.xlu0 %1084  ;;  %v1148_v27 = vadd.f32 %v7860_v36, %v6550_v55  ;;  %v1151_v55 = vadd.f32 %v7860_v36, %v6554_v35 }
 0x52c   : > { %v1116_v26 = vmul.f32 1.442695, %v1085_v3 }
 0x52d   : > { %v1087_v0 = vpop.xlane.xlu1 %1086 }
 0x52e   : > { %5305 = vpow2.f32 %v1116_v26  ;;  %v1118_v45 = vmul.f32 1.442695, %v1087_v0 }
 0x52f   : > { %v1089_v4 = vpop.xlane.xlu0 %1088  ;;  %v5298_v52 = vpop.eup %5297 }
 0x530   : > { %5307 = vpow2.f32 %v1118_v45  ;;  %v1120_v37 = vmul.f32 1.442695, %v1089_v4  ;;  %v5300_v40 = vpop.eup %5299  ;;  %v1158_v45 = vmul.f32 %v5298_v52, %v1142_v2 }
 0x531   : > { %v1091_v60 = vpop.xlane.xlu1 %1090  ;;  %v1156_v18 = vmul.f32 %v5300_v40, %v1140_v24 }
 0x532   : > { %5309 = vpow2.f32 %v1120_v37  ;;  %v1122_v34 = vmul.f32 1.442695, %v1091_v60 }
 0x533   : > { %v5302_v31 = vpop.eup %5301  ;;  %v1093_v3 = vpop.xlane.xlu0 %1092 }
 0x534   : > { %v5304_v26 = vpop.eup %5303  ;;  %5311 = vpow2.f32 %v1122_v34  ;;  %v1124_v0 = vmul.f32 1.442695, %v1093_v3  ;;  %v1159_v4 = vmul.f32 %v5302_v31, %v1143_v33  ;;  %v1145_v34 = vadd.f32 %v7860_v36, %v6539_v25 }
 0x535   : > { %v1095_v30 = vpop.xlane.xlu1 %1094  ;;  %v1157_v16 = vmul.f32 %v5304_v26, %v1141_v53  ;;  %v1147_v25 = vadd.f32 %v7860_v36, %v6534_v32  ;;  %v1149_v32 = vadd.f32 %v7860_v36, %v6559_v49 }
 0x536   : > { %5313 = vpow2.f32 %v1124_v0  ;;  %v1126_v28 = vmul.f32 1.442695, %v1095_v30  ;;  %v1173_v37 = vpack.c.bf16 %v1159_v4, %v1158_v45 }
 0x537   : > { %v1097_v60 = vpop.xlane.xlu0 %1096  ;;  %v1172_v63 = vpack.c.bf16 %v1157_v16, %v1156_v18 }
 0x538   : > { %v5306_v61 = vpop.eup %5305  ;;  %5315 = vpow2.f32 %v1126_v28  ;;  %v1128_v20 = vmul.f32 1.442695, %v1097_v60 }
 0x539   : > { %v1099_v3 = vpop.xlane.xlu1 %1098  ;;  %4768 = vmatprep.subr.bf16.mxu0 %v1172_v63  ;;  %5160 = vmatprep.subr.bf16.mxu1 %v1172_v63  ;;  %v1160_v30 = vmul.f32 %v5306_v61, %v1144_v17 }
 0x53a   : > { %v5308_v52 = vpop.eup %5307  ;;  %5317 = vpow2.f32 %v1128_v20  ;;  %v1130_v40 = vmul.f32 1.442695, %v1099_v3  ;;  %4769 = vmatpush3.bf16.msra.mxu0 %v1172_v63  ;;  %5168 = vmatpush3.bf16.msra.mxu1 %v1172_v63 }
 0x53b   : > { %4770 = vmatprep.subr.bf16.mxu0 %v1173_v37  ;;  %5161 = vmatprep.subr.bf16.mxu1 %v1173_v37  ;;  %v1101_v16 = vpop.xlane.xlu0 %1100  ;;  %v1161_v2 = vmul.f32 %v5308_v52, %v1145_v34  ;;  %v1150_v52 = vadd.f32 %v7860_v36, %v6546_v29 }
 0x53c   : > { %v5310_v33 = vpop.eup %5309  ;;  %5319 = vpow2.f32 %v1130_v40  ;;  %v1132_v31 = vmul.f32 1.442695, %v1101_v16 }
 0x53d   : > { %v1103_v24 = vpop.xlane.xlu1 %1102  ;;  %v1174_v53 = vpack.c.bf16 %v1161_v2, %v1160_v30  ;;  %v1162_v63 = vmul.f32 %v5310_v33, %v1146_v21  ;;  %v1152_v33 = vadd.f32 %v7860_v36, %v6570_v44 }
 0x53e   : > { %v5312_v26 = vpop.eup %5311  ;;  %5321 = vpow2.f32 %v1132_v31  ;;  %v1134_v0 = vmul.f32 1.442695, %v1103_v24  ;;  %4771 = vmatpush3.bf16.msra.mxu0 %v1173_v37  ;;  %5169 = vmatpush3.bf16.msra.mxu1 %v1173_v37  ;;  %v1153_v31 = vadd.f32 %v7860_v36, %v6579_v19 }
 0x53f   : > { %4772 = vmatprep.subr.bf16.mxu0 %v1174_v53  ;;  %5162 = vmatprep.subr.bf16.mxu1 %v1174_v53  ;;  %v1105_v61 = vpop.xlane.xlu0 %1104  ;;  %v1163_v45 = vmul.f32 %v5312_v26, %v1147_v25  ;;  %v1155_v26 = vadd.f32 %v7860_v36, %v6574_v54 }
 0x540   : > { %v5314_v4 = vpop.eup %5313  ;;  %5323 = vpow2.f32 %v1134_v0  ;;  %v1136_v18 = vmul.f32 1.442695, %v1105_v61 }
 0x541   : > { %v1107_v28 = vpop.xlane.xlu1 %1106  ;;  %v1175_v60 = vpack.c.bf16 %v1163_v45, %v1162_v63  ;;  %v1164_v37 = vmul.f32 %v5314_v4, %v1148_v27  ;;  %v7861_v45 = vld [vmem:[#allocation69_spill] sm:$0xff]  ;;  %v7862_v4 = vld [vmem:[#allocation68_spill] sm:$0xff] }
 0x542   : > { %v5316_v20 = vpop.eup %5315  ;;  %5325 = vpow2.f32 %v1136_v18  ;;  %v1138_v17 = vmul.f32 1.442695, %v1107_v28  ;;  %4773 = vmatpush3.bf16.msra.mxu0 %v1174_v53  ;;  %5170 = vmatpush3.bf16.msra.mxu1 %v1174_v53  ;;  %v1154_v53 = vadd.f32 %v7860_v36, %v6566_v41  ;;  %v6629_v18 = vcombine.low %v7862_v4, %v7861_v45  ;;  %v7863_v41 = vld [vmem:[#allocation77_spill] sm:$0xff]  ;;  %v7864_v27 = vld [vmem:[#allocation76_spill] sm:$0xff]  ;;  %v7865_v36 = vld [vmem:[#allocation79_spill] sm:$0xff] }
 0x543   : > { %4774 = vmatprep.subr.bf16.mxu0 %v1175_v60  ;;  %5163 = vmatprep.subr.bf16.mxu1 %v1175_v60  ;;  %v1165_v34 = vmul.f32 %v5316_v20, %v1149_v32  ;;  %v6633_v54 = vcombine.low %v7864_v27, %v7863_v41  ;;  %v7866_v32 = vld [vmem:[#allocation78_spill] sm:$0xff] }
 0x544   : > { %v5318_v3 = vpop.eup %5317  ;;  %5327 = vpow2.f32 %v1138_v17  ;;  %v6637_v28 = vcombine.low %v7866_v32, %v7865_v36  ;;  %v7868_v20 = vld [vmem:[#allocation70_spill] sm:$0xff] }
 0x545   : > { %v1176_v49 = vpack.c.bf16 %v1165_v34, %v1164_v37  ;;  %v1166_v16 = vmul.f32 %v5318_v3, %v1150_v52  ;;  %v7869_v37 = vld [vmem:[#allocation81_spill] sm:$0xff]  ;;  %v7870_v34 = vld [vmem:[#allocation80_spill] sm:$0xff] }
 0x546   : > { %v5320_v40 = vpop.eup %5319  ;;  %4775 = vmatpush3.bf16.msra.mxu0 %v1175_v60  ;;  %5171 = vmatpush3.bf16.msra.mxu1 %v1175_v60  ;;  %v7867_v60 = vld [vmem:[#allocation71_spill] sm:$0xff]  ;;  %v6649_v3 = vcombine.low %v7870_v34, %v7869_v37  ;;  %v7871_v52 = vld [vmem:[#allocation73_spill] sm:$0xff] }
 0x547   : > { %4776 = vmatprep.subr.bf16.mxu0 %v1176_v49  ;;  %5164 = vmatprep.subr.bf16.mxu1 %v1176_v49  ;;  %v1167_v30 = vmul.f32 %v5320_v40, %v1151_v55  ;;  %v6641_v17 = vcombine.low %v7868_v20, %v7867_v60  ;;  %v7872_v55 = vld [vmem:[#allocation72_spill] sm:$0xff]  ;;  %v5886_v40 = vmov 16  }
 0x548   : > { %v5322_v2 = vpop.eup %5321  ;;  %5295 = vset.pattern.permute.xlu1 %v5886_v40  ;;  %5296 = vset.pattern.permute.xlu0 %v5886_v40 }
 0x549   : > { %v1177_v21 = vpack.c.bf16 %v1167_v30, %v1166_v16  ;;  %v1168_v35 = vmul.f32 %v5322_v2, %v1152_v33 }
 0x54a   : > { %v5324_v29 = vpop.eup %5323  ;;  %4777 = vmatpush3.bf16.msra.mxu0 %v1176_v49  ;;  %5172 = vmatpush3.bf16.msra.mxu1 %v1176_v49  ;;  %v6653_v49 = vcombine.low %v7872_v55, %v7871_v52 }
 0x54b   : > { %4778 = vmatprep.subr.bf16.mxu0 %v1177_v21  ;;  %5165 = vmatprep.subr.bf16.mxu1 %v1177_v21  ;;  %v1169_v25 = vmul.f32 %v5324_v29, %v1153_v31 }
 0x54c   : > { %v5326_v24 = vpop.eup %5325 }
 0x54d   : > { %v1178_v0 = vpack.c.bf16 %v1169_v25, %v1168_v35  ;;  %v1170_v19 = vmul.f32 %v5326_v24, %v1154_v53 }
 0x54e   : > { %v5328_v44 = vpop.eup %5327  ;;  %4779 = vmatpush3.bf16.msra.mxu0 %v1177_v21  ;;  %5173 = vmatpush3.bf16.msra.mxu1 %v1177_v21 }
 0x54f   : > { %4780 = vmatprep.subr.bf16.mxu0 %v1178_v0  ;;  %5166 = vmatprep.subr.bf16.mxu1 %v1178_v0  ;;  %v1171_v61 = vmul.f32 %v5328_v44, %v1155_v26 }
 0x551   : > { %v1179_v63 = vpack.c.bf16 %v1171_v61, %v1170_v19 }
 0x552   : > { %4781 = vmatpush3.bf16.msra.mxu0 %v1178_v0  ;;  %5174 = vmatpush3.bf16.msra.mxu1 %v1178_v0 }
 0x553   : > { %4782 = vmatprep.subr.bf16.mxu0 %v1179_v63  ;;  %5167 = vmatprep.subr.bf16.mxu1 %v1179_v63 }
 0x556   : > { %4783 = vmatpush3.bf16.msra.mxu0 %v1179_v63  ;;  %5175 = vmatpush3.bf16.msra.mxu1 %v1179_v63 }
 0x559   : > { %4785 = vmatmul.mubr.bf16.vlgmr.msra.gmra.mrb[16].mxu0 %v6629_v18  ;;  %4793 = vmatmul.mubr.bf16.vlgmr.msra.gmra.mrb[16].mxu1 %v6633_v54 }
 0x55a   : > { %4796 = vmatprep.mubr.bf16.mxu1 %v6637_v28  ;;  %4788 = vmatprep.mubr.bf16.mxu0 %v6641_v17 }
 0x561   : > { %4797 = vmatmul.mubr.bf16.gmra.mrb[20].mxu1 %v6649_v3  ;;  %4789 = vmatmul.mubr.bf16.gmra.mrb[20].mxu0 %v6653_v49 }
 0x62c   : > { %v6657_v16 = vpop.f32.mrb[16].mxu0  ;;  %v6659_v30 = vpop.f32.mrb[16].mxu1 }
 0x62d   : > { %v1327_v2 = vadd.f32 1e-16, %v6657_v16  ;;  %v6662_v33 = vpop.f32.mrb[17].mxu0  ;;  %v6664_v31 = vpop.f32.mrb[17].mxu1  ;;  %v1335_v35 = vadd.f32 1e-16, %v6659_v30 }
 0x62e   : > { %v1325_v21 = vadd.f32 1e-16, %v6662_v33  ;;  %v6667_v29 = vpop.f32.mrb[18].mxu0  ;;  %v6670_v25 = vpop.f32.mrb[18].mxu1  ;;  %v1333_v0 = vadd.f32 1e-16, %v6664_v31 }
 0x62f   : > { %5329 = vrcp.f32 %v1327_v2  ;;  %v6672_v24 = vpop.f32.mrb[19].mxu0  ;;  %v6674_v53 = vpop.f32.mrb[19].mxu1  ;;  %v1336_v26 = vadd.f32 1e-16, %v6670_v25  ;;  %v1328_v4 = vadd.f32 1e-16, %v6667_v29 }
 0x630   : > { %5331 = vrcp.f32 %v1325_v21  ;;  %v1334_v61 = vadd.f32 1e-16, %v6674_v53  ;;  %v1326_v34 = vadd.f32 1e-16, %v6672_v24 }
 0x631   : > { %5333 = vrcp.f32 %v1335_v35 }
 0x632   : > { %5335 = vrcp.f32 %v1336_v26 }
 0x633   : > { %5337 = vrcp.f32 %v1333_v0 }
 0x634   : > { %v6678_v44 = vpop.f32.mrb[20].mxu1  ;;  %v6680_v19 = vpop.f32.mrb[20].mxu0  ;;  %5339 = vrcp.f32 %v1334_v61 }
 0x635   : > { %v6683_v63 = vpop.f32.mrb[21].mxu1  ;;  %v6685_v45 = vpop.f32.mrb[21].mxu0  ;;  %5341 = vrcp.f32 %v1328_v4  ;;  %v1331_v40 = vadd.f32 1e-16, %v6680_v19 }
 0x636   : > { %v6688_v41 = vpop.f32.mrb[22].mxu1  ;;  %v6690_v27 = vpop.f32.mrb[22].mxu0  ;;  %v1329_v26 = vadd.f32 1e-16, %v6685_v45  ;;  %v1337_v4 = vadd.f32 1e-16, %v6683_v63 }
 0x637   : > { %v6692_v36 = vpop.f32.mrb[23].mxu1  ;;  %v6694_v32 = vpop.f32.mrb[23].mxu0  ;;  %v1340_v52 = vadd.f32 1e-16, %v6688_v41 }
 0x638   : > { %v1338_v60 = vadd.f32 1e-16, %v6692_v36 }
 0x639   : > { %v5330_v20 = vpop.eup %5329 }
 0x63a   : > { %v5332_v37 = vpop.eup %5331  ;;  %1385 = vperm.xlu1 %5295, %v5330_v20   ;;  %5343 = vrcp.f32 %v1338_v60 }
 0x63b   : > { %1375 = vperm.xlu0 %5296, %v5332_v37   ;;  %v5334_v55 = vpop.eup %5333  ;;  %5345 = vrcp.f32 %v1326_v34  ;;  %v1332_v34 = vadd.f32 1e-16, %v6690_v27 }
 0x63c   : > { %v5336_v2 = vpop.eup %5335  ;;  %5347 = vrcp.f32 %v1340_v52  ;;  %v1330_v52 = vadd.f32 1e-16, %v6694_v32 }
 0x63d   : > { %v5338_v21 = vpop.eup %5337  ;;  %5349 = vrcp.f32 %v1331_v40 }
 0x63e   : > { %1425 = vperm.xlu1 %5295, %v5334_v55   ;;  %v5340_v35 = vpop.eup %5339  ;;  %5351 = vrcp.f32 %v1329_v26 }
 0x63f   : > { %1430 = vperm.xlu0 %5296, %v5336_v2   ;;  %v5342_v0 = vpop.eup %5341  ;;  %5353 = vrcp.f32 %v1337_v4  ;;  %v1339_v2 = vadd.f32 1e-16, %v6678_v44 }
 0x640   : > { %5355 = vrcp.f32 %v1332_v34 }
 0x641   : > { %5357 = vrcp.f32 %v1330_v52 }
 0x642   : > { %1415 = vperm.xlu1 %5295, %v5338_v21   ;;  %5359 = vrcp.f32 %v1339_v2 }
 0x643   : > { %1420 = vperm.xlu0 %5296, %v5340_v35  }
 0x644   : > { %v5344_v61 = vpop.eup %5343 }
 0x645   : > { %v5346_v60 = vpop.eup %5345 }
 0x646   : > { %1390 = vperm.xlu1 %5295, %v5342_v0   ;;  %v5348_v20 = vpop.eup %5347 }
 0x647   : > { %1440 = vperm.xlu0 %5296, %v5344_v61   ;;  %v5350_v37 = vpop.eup %5349 }
 0x648   : > { %v5352_v55 = vpop.eup %5351 }
 0x649   : > { %v5354_v40 = vpop.eup %5353 }
 0x64a   : > { %1380 = vperm.xlu1 %5295, %v5346_v60   ;;  %v5356_v21 = vpop.eup %5355 }
 0x64b   : > { %1450 = vperm.xlu0 %5296, %v5348_v20   ;;  %v5358_v35 = vpop.eup %5357  ;;  %v7873_v20 = vld [vmem:[#allocation32_spill] sm:$0xff] }
 0x64c   : > { %v5360_v26 = vpop.eup %5359 }
 0x64e   : > { %1405 = vperm.xlu1 %5295, %v5350_v37  }
 0x652   : > { %1395 = vperm.xlu1 %5295, %v5352_v55  }
 0x656   : > { %1435 = vperm.xlu1 %5295, %v5354_v40  }
 0x65a   : > { %1410 = vperm.xlu1 %5295, %v5356_v21  }
 0x65e   : > { %1400 = vperm.xlu1 %5295, %v5358_v35  }
 0x662   : > { %1445 = vperm.xlu1 %5295, %v5360_v26  }
 0x6b9   : > { %v1386_v0 = vpop.permute.xlu1 %1385 }
 0x6ba   : > { %v1455_v61 = vmul.f32 %v6657_v16, %v1386_v0  ;;  %v1376_v4 = vpop.permute.xlu0 %1375 }
 0x6bb   : > { %v1453_v60 = vmul.f32 %v1376_v4, %v6662_v33 }
 0x6bc   : > { %v1471_v37 = vmul.f32 %v7873_v20, %v1455_v61 }
 0x6bd   : > { %v1469_v34 = vmul.f32 %v7873_v20, %v1453_v60  ;;  %v1426_v55 = vpop.permute.xlu1 %1425 }
 0x6be   : > { %v6710_v52 = vadd.f32 %v1471_v37, %v6381_v50  ;;  %v1463_v40 = vmul.f32 %v6659_v30, %v1426_v55  ;;  %v1431_v21 = vpop.permute.xlu0 %1430 }
 0x6bf   : > { %v6714_v2 = vadd.f32 %v1469_v34, %v6377_v48  ;;  %v1464_v48 = vmul.f32 %v6670_v25, %v1431_v21 }
 0x6c0   : > { %v1479_v35 = vmul.f32 %v7873_v20, %v1463_v40  ;;  %v1503_v16 = vmul.f32 %v6710_v52, %v6710_v52 }
 0x6c1   : > { %v1416_v33 = vpop.permute.xlu1 %1415  ;;  %v1501_v26 = vmul.f32 %v6714_v2, %v6714_v2 }
 0x6c2   : > { %v6722_v0 = vadd.f32 %v1479_v35, %v6417_v42  ;;  %v1461_v50 = vmul.f32 %v1416_v33, %v6664_v31  ;;  %1521 = vadd.xlane.f32.xlu0 %v1503_v16  ;;  %v1421_v4 = vpop.permute.xlu0 %1420  ;;  %v1480_v42 = vmul.f32 %v7873_v20, %v1464_v48  ;;  %v7875_v48 = vld [vmem:[#allocation115_spill] sm:$0xff] }
 0x6c3   : > { %1517 = vadd.xlane.f32.xlu1 %v1501_v26  ;;  %v1462_v31 = vmul.f32 %v1421_v4, %v6674_v53  ;;  %v7874_v26 = vld [vmem:[#allocation108_spill] sm:$0xff] }
 0x6c4   : > { %v1477_v30 = vmul.f32 %v7873_v20, %v1461_v50  ;;  %v1511_v61 = vmul.f32 %v6722_v0, %v6722_v0 }
 0x6c5   : > { %v1391_v60 = vpop.permute.xlu1 %1390 }
 0x6c6   : > { %v6730_v37 = vadd.f32 %v1477_v30, %v6411_v39  ;;  %v1456_v34 = vmul.f32 %v6667_v29, %v1391_v60  ;;  %1537 = vadd.xlane.f32.xlu0 %v1511_v61  ;;  %v6743_v39 = vadd.f32 %v1480_v42, %v6419_v5  ;;  %v1478_v29 = vmul.f32 %v7873_v20, %v1462_v31  ;;  %v7876_v60 = vld [vmem:[#allocation113_spill] sm:$0xff] }
 0x6c8   : > { %v1472_v55 = vmul.f32 %v7873_v20, %v1456_v34  ;;  %v1509_v25 = vmul.f32 %v6730_v37, %v6730_v37  ;;  %v1512_v61 = vmul.f32 %v6743_v39, %v6743_v39 }
 0x6c9   : > { %v1381_v40 = vpop.permute.xlu1 %1380 }
 0x6ca   : > { %v6739_v21 = vadd.f32 %v1472_v55, %v6393_v46  ;;  %v1454_v35 = vmul.f32 %v1381_v40, %v6672_v24  ;;  %1533 = vadd.xlane.f32.xlu0 %v1509_v25  ;;  %v6754_v24 = vadd.f32 %v1478_v29, %v7875_v48  ;;  %v7877_v40 = vld [vmem:[#allocation111_spill] sm:$0xff] }
 0x6cc   : > { %v1470_v16 = vmul.f32 %v7873_v20, %v1454_v35  ;;  %v1504_v53 = vmul.f32 %v6739_v21, %v6739_v21  ;;  %v1510_v55 = vmul.f32 %v6754_v24, %v6754_v24 }
 0x6cd   : > { %v1406_v33 = vpop.permute.xlu1 %1405 }
 0x6ce   : > { %v6750_v50 = vadd.f32 %v1470_v16, %v7874_v26  ;;  %v1459_v46 = vmul.f32 %v6680_v19, %v1406_v33  ;;  %1523 = vadd.xlane.f32.xlu1 %v1504_v53  ;;  %v1441_v16 = vpop.permute.xlu0 %1440 }
 0x6cf   : > { %v1466_v48 = vmul.f32 %v1441_v16, %v6692_v36 }
 0x6d0   : > { %v1475_v5 = vmul.f32 %v7873_v20, %v1459_v46  ;;  %v1502_v30 = vmul.f32 %v6750_v50, %v6750_v50 }
 0x6d1   : > { %v1396_v4 = vpop.permute.xlu1 %1395 }
 0x6d2   : > { %v6762_v34 = vadd.f32 %v1475_v5, %v7876_v60  ;;  %v1457_v42 = vmul.f32 %v1396_v4, %v6685_v45  ;;  %1519 = vadd.xlane.f32.xlu0 %v1502_v30  ;;  %1539 = vadd.xlane.f32.xlu1 %v1512_v61  ;;  %v1451_v30 = vpop.permute.xlu0 %1450  ;;  %v7878_v4 = vld [vmem:[#allocation114_spill] sm:$0xff] }
 0x6d4   : > { %v1473_v19 = vmul.f32 %v7873_v20, %v1457_v42  ;;  %v1507_v31 = vmul.f32 %v6762_v34, %v6762_v34 }
 0x6d5   : > { %v1436_v25 = vpop.permute.xlu1 %1435 }
 0x6d6   : > { %v6771_v35 = vadd.f32 %v1473_v19, %v7877_v40  ;;  %v1465_v29 = vmul.f32 %v1436_v25, %v6683_v63  ;;  %1529 = vadd.xlane.f32.xlu0 %v1507_v31  ;;  %1535 = vadd.xlane.f32.xlu1 %v1510_v55  ;;  %v7879_v55 = vld [vmem:[#allocation112_spill] sm:$0xff] }
 0x6d8   : > { %v1481_v45 = vmul.f32 %v7873_v20, %v1465_v29  ;;  %v1505_v53 = vmul.f32 %v6771_v35, %v6771_v35  ;;  %v7880_v29 = vld [vmem:[#allocation116_spill] sm:$0xff] }
 0x6d9   : > { %v1411_v33 = vpop.permute.xlu1 %1410 }
 0x6da   : > { %v6778_v26 = vadd.f32 %v1481_v45, %v6423_v22  ;;  %v1460_v46 = vmul.f32 %v6690_v27, %v1411_v33  ;;  %1525 = vadd.xlane.f32.xlu0 %v1505_v53  ;;  %v1482_v22 = vmul.f32 %v7873_v20, %v1466_v48  ;;  %v1468_v27 = vmul.f32 %v6688_v41, %v1451_v30  ;;  %v7881_v33 = vld [vmem:[#allocation117_spill] sm:$0xff] }
 0x6dc   : > { %v1476_v5 = vmul.f32 %v7873_v20, %v1460_v46  ;;  %v1513_v63 = vmul.f32 %v6778_v26, %v6778_v26  ;;  %v6799_v16 = vadd.f32 %v1482_v22, %v7880_v29 }
 0x6dd   : > { %v1401_v61 = vpop.permute.xlu1 %1400 }
 0x6de   : > { %v6786_v60 = vadd.f32 %v1476_v5, %v7878_v4  ;;  %v1458_v42 = vmul.f32 %v1401_v61, %v6694_v32  ;;  %1541 = vadd.xlane.f32.xlu0 %v1513_v63  ;;  %v1484_v32 = vmul.f32 %v7873_v20, %v1468_v27 }
 0x6e0   : > { %v1474_v19 = vmul.f32 %v7873_v20, %v1458_v42  ;;  %v1508_v36 = vmul.f32 %v6786_v60, %v6786_v60  ;;  %v6809_v46 = vadd.f32 %v1484_v32, %v7881_v33 }
 0x6e1   : > { %v1446_v31 = vpop.permute.xlu1 %1445 }
 0x6e2   : > { %v6795_v25 = vadd.f32 %v1474_v19, %v7879_v55  ;;  %v1467_v40 = vmul.f32 %v6678_v44, %v1446_v31  ;;  %1531 = vadd.xlane.f32.xlu1 %v1508_v36  ;;  %v1514_v44 = vmul.f32 %v6799_v16, %v6799_v16 }
 0x6e4   : > { %v1483_v45 = vmul.f32 %v7873_v20, %v1467_v40  ;;  %v1506_v41 = vmul.f32 %v6795_v25, %v6795_v25  ;;  %v1516_v20 = vmul.f32 %v6809_v46, %v6809_v46 }
 0x6e6   : > { %v6806_v53 = vadd.f32 %v1483_v45, %v6429_v47  ;;  %1527 = vadd.xlane.f32.xlu1 %v1506_v41 }
 0x6e8   : > { %v1515_v48 = vmul.f32 %v6806_v53, %v6806_v53 }
 0x6ea   : > { %1543 = vadd.xlane.f32.xlu1 %v1514_v44  ;;  %1545 = vadd.xlane.f32.xlu0 %v1515_v48 }
 0x6ee   : > { %1547 = vadd.xlane.f32.xlu1 %v1516_v20 }
 0x74f   : > { %v1522_v5 = vpop.xlane.xlu0 %1521 }
 0x750   : > { %5361 = vrsqrt.f32 %v1522_v5  ;;  %v1518_v47 = vpop.xlane.xlu1 %1517  ;;  %vm1565_vm8 = vcmp.eq.f32.partialorder %v1522_v5, inf  ;;  %v1568_v27 = vand.u32 2147483648, %v1522_v5  ;;  %vm1567_vm9 = vcmp.eq.f32.partialorder %v1522_v5, 0.0 }
 0x751   : > { %5363 = vrsqrt.f32 %v1518_v47  ;;  %vm1551_vm10 = vcmp.eq.f32.partialorder %v1518_v47, inf  ;;  %v1554_v31 = vand.u32 2147483648, %v1518_v47  ;;  %vm1553_vm11 = vcmp.eq.f32.partialorder %v1518_v47, 0.0 }
 0x753   : > { %v1538_v63 = vpop.xlane.xlu0 %1537 }
 0x754   : > { %5365 = vrsqrt.f32 %v1538_v63  ;;  %vm1621_vm12 = vcmp.eq.f32.partialorder %v1538_v63, inf  ;;  %v1624_v20 = vand.u32 2147483648, %v1538_v63  ;;  %vm1623_vm13 = vcmp.eq.f32.partialorder %v1538_v63, 0.0 }
 0x757   : > { %v1534_v30 = vpop.xlane.xlu0 %1533 }
 0x758   : > { %5367 = vrsqrt.f32 %v1534_v30  ;;  %vm1607_vm14 = vcmp.eq.f32.partialorder %v1534_v30, inf  ;;  %vm1609_vm15 = vcmp.eq.f32.partialorder %v1534_v30, 0.0 }
 0x75a   : > { %v5362_v61 = vpop.eup %5361 }
 0x75b   : > { %v5364_v4 = vpop.eup %5363  ;;  %v1564_v42 = vmul.f32 %v5362_v61, %v1522_v5  ;;  %v1524_v22 = vpop.xlane.xlu1 %1523 }
 0x75c   : > { %v1550_v19 = vmul.f32 %v5364_v4, %v1518_v47  ;;  %5369 = vrsqrt.f32 %v1524_v22  ;;  %vm1572_vm0 = vcmp.eq.f32.partialorder %v1524_v22, inf  ;;  %vm1574_vm1 = vcmp.eq.f32.partialorder %v1524_v22, 0.0 }
 0x75d   : > { %v1566_v36 = vsel %vm1565_vm8, %v1522_v5, %v1564_v42 }
 0x75e   : > { %v5366_v55 = vpop.eup %5365  ;;  %v1569_v40 = vsel %vm1567_vm9, %v1568_v27, %v1566_v36  ;;  %v1552_v29 = vsel %vm1551_vm10, %v1518_v47, %v1550_v19  ;;  %v1610_v36 = vand.u32 2147483648, %v1534_v30 }
 0x75f   : > { %v1663_v32 = vmax.f32 %v1569_v40, 1e-12  ;;  %v1555_v45 = vsel %vm1553_vm11, %v1554_v31, %v1552_v29  ;;  %v1620_v41 = vmul.f32 %v5366_v55, %v1538_v63  ;;  %v1520_v33 = vpop.xlane.xlu0 %1519  ;;  %v6817_v44 = vpop.xlane.xlu1 %1539 }
 0x760   : > { %v1661_v48 = vmax.f32 %v1555_v45, 1e-12  ;;  %5371 = vrsqrt.f32 %v1520_v33  ;;  %v1575_v45 = vand.u32 2147483648, %v1524_v22  ;;  %vm1558_vm2 = vcmp.eq.f32.partialorder %v1520_v33, inf }
 0x761   : > { %5373 = vrcp.f32 %v1663_v32  ;;  %v1622_v61 = vsel %vm1621_vm12, %v1538_v63, %v1620_v41  ;;  %vm1560_vm3 = vcmp.eq.f32.partialorder %v1520_v33, 0.0  ;;  %vm1628_vm4 = vcmp.eq.f32.partialorder %v6817_v44, inf }
 0x762   : > { %v5368_v5 = vpop.eup %5367  ;;  %5375 = vrcp.f32 %v1661_v48  ;;  %v1625_v4 = vsel %vm1623_vm13, %v1624_v20, %v1622_v61  ;;  %vm1630_vm5 = vcmp.eq.f32.partialorder %v6817_v44, 0.0 }
 0x763   : > { %v1671_v42 = vmax.f32 %v1625_v4, 1e-12  ;;  %v1606_v27 = vmul.f32 %v5368_v5, %v1534_v30  ;;  %5377 = vrsqrt.f32 %v6817_v44  ;;  %v6820_v47 = vpop.xlane.xlu0 %1529  ;;  %v6822_v19 = vpop.xlane.xlu1 %1535 }
 0x764   : > { %5379 = vrsqrt.f32 %v6820_v47  ;;  %vm1593_vm6 = vcmp.eq.f32.partialorder %v6820_v47, inf  ;;  %vm1595_vm7 = vcmp.eq.f32.partialorder %v6820_v47, 0.0  ;;  %vm1614_vm8 = vcmp.eq.f32.partialorder %v6822_v19, inf }
 0x765   : > { %5381 = vrcp.f32 %v1671_v42  ;;  %v1608_v31 = vsel %vm1607_vm14, %v1534_v30, %v1606_v27  ;;  %vm1616_vm9 = vcmp.eq.f32.partialorder %v6822_v19, 0.0 }
 0x766   : > { %v5370_v55 = vpop.eup %5369  ;;  %v1611_v63 = vsel %vm1609_vm15, %v1610_v36, %v1608_v31  ;;  %5383 = vrsqrt.f32 %v6822_v19  ;;  %v1561_v36 = vand.u32 2147483648, %v1520_v33 }
 0x767   : > { %v1669_v40 = vmax.f32 %v1611_v63, 1e-12  ;;  %v1571_v29 = vmul.f32 %v5370_v55, %v1524_v22  ;;  %v6826_v32 = vpop.xlane.xlu0 %1525 }
 0x768   : > { %5385 = vrsqrt.f32 %v6826_v32  ;;  %vm1579_vm10 = vcmp.eq.f32.partialorder %v6826_v32, inf  ;;  %vm1581_vm11 = vcmp.eq.f32.partialorder %v6826_v32, 0.0 }
 0x769   : > { %5387 = vrcp.f32 %v1669_v40  ;;  %v1573_v41 = vsel %vm1572_vm0, %v1524_v22, %v1571_v29 }
 0x76a   : > { %v5372_v48 = vpop.eup %5371  ;;  %v1576_v20 = vsel %vm1574_vm1, %v1575_v45, %v1573_v41  ;;  %v1631_v45 = vand.u32 2147483648, %v6817_v44 }
 0x76b   : > { %v5374_v61 = vpop.eup %5373  ;;  %v1664_v5 = vmax.f32 %v1576_v20, 1e-12  ;;  %v1557_v30 = vmul.f32 %v5372_v48, %v1520_v33  ;;  %v6829_v4 = vpop.xlane.xlu0 %1541 }
 0x76c   : > { %v5376_v42 = vpop.eup %5375  ;;  %v1682_v27 = vmul.f32 %v5374_v61, %v6710_v52  ;;  %5389 = vrsqrt.f32 %v6829_v4  ;;  %vm1635_vm12 = vcmp.eq.f32.partialorder %v6829_v4, inf  ;;  %vm1637_vm13 = vcmp.eq.f32.partialorder %v6829_v4, 0.0 }
 0x76d   : > { %v5378_v31 = vpop.eup %5377  ;;  %v1678_v22 = vmul.f32 %v5376_v42, %v6714_v2  ;;  %5391 = vrcp.f32 %v1664_v5  ;;  %v1559_v55 = vsel %vm1558_vm2, %v1520_v33, %v1557_v30  ;;  %v1596_v2 = vand.u32 2147483648, %v6820_v47 }
 0x76e   : > { %v5380_v63 = vpop.eup %5379  ;;  %1711 = vst [vmem:[#allocation2 + $0x10] sm:$0xff] %v1682_v27  ;;  %v1562_v40 = vsel %vm1560_vm3, %v1561_v36, %v1559_v55  ;;  %v1627_v29 = vmul.f32 %v5378_v31, %v6817_v44 }
 0x76f   : > { %v5382_v52 = vpop.eup %5381  ;;  %1709 = vst [vmem:[#allocation2] sm:$0xff] %v1678_v22  ;;  %v1662_v41 = vmax.f32 %v1562_v40, 1e-12  ;;  %v1592_v48 = vmul.f32 %v5380_v63, %v6820_v47  ;;  %v6842_v33 = vpop.xlane.xlu1 %1531  ;;  %v1617_v22 = vand.u32 2147483648, %v6822_v19 }
 0x770   : > { %v5384_v20 = vpop.eup %5383  ;;  %v1698_v61 = vmul.f32 %v5382_v52, %v6722_v0  ;;  %v1629_v5 = vsel %vm1628_vm4, %v6817_v44, %v1627_v29  ;;  %5393 = vrsqrt.f32 %v6842_v33  ;;  %v1582_v52 = vand.u32 2147483648, %v6826_v32 }
 0x771   : > { %5395 = vrcp.f32 %v1662_v41  ;;  %v1632_v30 = vsel %vm1630_vm5, %v1631_v45, %v1629_v5  ;;  %v1594_v42 = vsel %vm1593_vm6, %v6820_v47, %v1592_v48  ;;  %v1613_v27 = vmul.f32 %v5384_v20, %v6822_v19 }
 0x772   : > { %v5386_v36 = vpop.eup %5385  ;;  %1719 = vst [vmem:[#allocation2 + $0x50] sm:$0xff] %v1698_v61  ;;  %v1672_v31 = vmax.f32 %v1632_v30, 1e-12  ;;  %v1597_v0 = vsel %vm1595_vm7, %v1596_v2, %v1594_v42  ;;  %vm1600_vm14 = vcmp.eq.f32.partialorder %v6842_v33, inf  ;;  %vm1602_vm15 = vcmp.eq.f32.partialorder %v6842_v33, 0.0 }
 0x773   : > { %v5388_v55 = vpop.eup %5387  ;;  %v1667_v63 = vmax.f32 %v1597_v0, 1e-12  ;;  %v1615_v40 = vsel %vm1614_vm8, %v6822_v19, %v1613_v27  ;;  %v1578_v29 = vmul.f32 %v5386_v36, %v6826_v32  ;;  %v6859_v44 = vpop.xlane.xlu1 %1527  ;;  %v1638_v27 = vand.u32 2147483648, %v6829_v4 }
 0x774   : > { %v1694_v47 = vmul.f32 %v5388_v55, %v6730_v37  ;;  %5397 = vrcp.f32 %v1672_v31  ;;  %v1618_v45 = vsel %vm1616_vm9, %v1617_v22, %v1615_v40  ;;  %v1603_v40 = vand.u32 2147483648, %v6842_v33 }
 0x775   : > { %5399 = vrcp.f32 %v1667_v63  ;;  %v1670_v41 = vmax.f32 %v1618_v45, 1e-12  ;;  %v1580_v48 = vsel %vm1579_vm10, %v6826_v32, %v1578_v29  ;;  %vm1586_vm0 = vcmp.eq.f32.partialorder %v6859_v44, inf }
 0x776   : > { %v5390_v2 = vpop.eup %5389  ;;  %1717 = vst [vmem:[#allocation2 + $0x40] sm:$0xff] %v1694_v47  ;;  %v1583_v19 = vsel %vm1581_vm11, %v1582_v52, %v1580_v48  ;;  %5401 = vrsqrt.f32 %v6859_v44  ;;  %vm1588_vm1 = vcmp.eq.f32.partialorder %v6859_v44, 0.0 }
 0x777   : > { %v5392_v20 = vpop.eup %5391  ;;  %5403 = vrcp.f32 %v1670_v41  ;;  %v1665_v61 = vmax.f32 %v1583_v19, 1e-12  ;;  %v1634_v37 = vmul.f32 %v5390_v2, %v6829_v4  ;;  %v1546_v5 = vpop.xlane.xlu0 %1545 }
 0x778   : > { %v6867_v30 = vpop.xlane.xlu1 %1543  ;;  %v1684_v42 = vmul.f32 %v5392_v20, %v6739_v21  ;;  %5405 = vrsqrt.f32 %v1546_v5  ;;  %vm1649_vm2 = vcmp.eq.f32.partialorder %v1546_v5, inf  ;;  %vm1651_vm3 = vcmp.eq.f32.partialorder %v1546_v5, 0.0 }
 0x779   : > { %5407 = vrcp.f32 %v1665_v61  ;;  %v1636_v32 = vsel %vm1635_vm12, %v6829_v4, %v1634_v37  ;;  %vm1642_vm4 = vcmp.eq.f32.partialorder %v6867_v30, inf  ;;  %vm1644_vm5 = vcmp.eq.f32.partialorder %v6867_v30, 0.0 }
 0x77a   : > { %v5394_v36 = vpop.eup %5393  ;;  %1712 = vst [vmem:[#allocation2 + $0x18] sm:$0xff] %v1684_v42  ;;  %v1639_v31 = vsel %vm1637_vm13, %v1638_v27, %v1636_v32  ;;  %5409 = vrsqrt.f32 %v6867_v30 }
 0x77b   : > { %v5396_v0 = vpop.eup %5395  ;;  %v1673_v22 = vmax.f32 %v1639_v31, 1e-12  ;;  %v1599_v55 = vmul.f32 %v5394_v36, %v6842_v33  ;;  %v1652_v36 = vand.u32 2147483648, %v1546_v5 }
 0x77c   : > { %v1548_v21 = vpop.xlane.xlu1 %1547  ;;  %v1680_v63 = vmul.f32 %v5396_v0, %v6750_v50 }
 0x77d   : > { %5411 = vrsqrt.f32 %v1548_v21  ;;  %v1601_v4 = vsel %vm1600_vm14, %v6842_v33, %v1599_v55  ;;  %v1589_v33 = vand.u32 2147483648, %v6859_v44  ;;  %vm1656_vm6 = vcmp.eq.f32.partialorder %v1548_v21, inf }
 0x77e   : > { %5413 = vrcp.f32 %v1673_v22  ;;  %v5398_v29 = vpop.eup %5397  ;;  %1710 = vst [vmem:[#allocation2 + $0x8] sm:$0xff] %v1680_v63  ;;  %v1604_v47 = vsel %vm1602_vm15, %v1603_v40, %v1601_v4  ;;  %vm1658_vm7 = vcmp.eq.f32.partialorder %v1548_v21, 0.0 }
 0x77f   : > { %v5400_v45 = vpop.eup %5399  ;;  %v1700_v52 = vmul.f32 %v5398_v29, %v6743_v39  ;;  %v1668_v41 = vmax.f32 %v1604_v47, 1e-12  ;;  %v1659_v47 = vand.u32 2147483648, %v1548_v21 }
 0x780   : > { %v5402_v48 = vpop.eup %5401  ;;  %v1690_v50 = vmul.f32 %v5400_v45, %v6762_v34 }
 0x781   : > { %v5404_v2 = vpop.eup %5403  ;;  %1720 = vst [vmem:[#allocation2 + $0x58] sm:$0xff] %v1700_v52  ;;  %5415 = vrcp.f32 %v1668_v41  ;;  %v1585_v19 = vmul.f32 %v5402_v48, %v6859_v44 }
 0x782   : > { %v5406_v20 = vpop.eup %5405  ;;  %1715 = vst [vmem:[#allocation2 + $0x30] sm:$0xff] %v1690_v50  ;;  %v1696_v61 = vmul.f32 %v5404_v2, %v6754_v24 }
 0x783   : > { %v5408_v37 = vpop.eup %5407  ;;  %v1587_v39 = vsel %vm1586_vm0, %v6859_v44, %v1585_v19  ;;  %v1648_v42 = vmul.f32 %v5406_v20, %v1546_v5  ;;  %v1645_v44 = vand.u32 2147483648, %v6867_v30 }
 0x784   : > { %v5410_v34 = vpop.eup %5409  ;;  %1718 = vst [vmem:[#allocation2 + $0x48] sm:$0xff] %v1696_v61  ;;  %v1686_v27 = vmul.f32 %v5408_v37, %v6771_v35  ;;  %v1590_v32 = vsel %vm1588_vm1, %v1589_v33, %v1587_v39  ;;  %v1727_v39 = vld [vmem:[#allocation2 + $0x10] sm:$0xff] (%p742_p10) }
 0x785   : > { %v1666_v31 = vmax.f32 %v1590_v32, 1e-12  ;;  %v1650_v0 = vsel %vm1649_vm2, %v1546_v5, %v1648_v42  ;;  %v1641_v24 = vmul.f32 %v5410_v34, %v6867_v30  ;;  %v7882_v42 = vld [vmem:[#allocation109_spill] sm:$0xff] (%p742_p10) }
 0x786   : > { %1713 = vst [vmem:[#allocation2 + $0x20] sm:$0xff] %v1686_v27  ;;  %v1653_v55 = vsel %vm1651_vm3, %v1652_v36, %v1650_v0  ;;  %4816 = vmatprep.mubr.bf16.mxu0 (%p742_p10), %v7882_v42 }
 0x787   : > { %v5412_v22 = vpop.eup %5411  ;;  %5417 = vrcp.f32 %v1666_v31  ;;  %v1675_v35 = vmax.f32 %v1653_v55, 1e-12  ;;  %v1643_v40 = vsel %vm1642_vm4, %v6867_v30, %v1641_v24  ;;  %v1733_v24 = vld [vmem:[#allocation2 + $0x40] sm:$0xff] (%p742_p10) }
 0x788   : > { %v5414_v63 = vpop.eup %5413  ;;  %v1655_v4 = vmul.f32 %v5412_v22, %v1548_v21  ;;  %v1646_v5 = vsel %vm1644_vm5, %v1645_v44, %v1643_v40  ;;  %v1735_v44 = vld [vmem:[#allocation2 + $0x50] sm:$0xff] (%p742_p10) }
 0x789   : > { %v1702_v29 = vmul.f32 %v5414_v63, %v6778_v26  ;;  %5419 = vrcp.f32 %v1675_v35  ;;  %v1674_v45 = vmax.f32 %v1646_v5, 1e-12  ;;  %v1736_v63 = vld [vmem:[#allocation2 + $0x58] sm:$0xff] (%p742_p10) }
 0x78a   : > { %v1657_v52 = vsel %vm1656_vm6, %v1548_v21, %v1655_v4 }
 0x78b   : > { %1721 = vst [vmem:[#allocation2 + $0x60] sm:$0xff] %v1702_v29  ;;  %v1660_v41 = vsel %vm1658_vm7, %v1659_v47, %v1657_v52  ;;  %v5416_v48 = vpop.eup %5415  ;;  %5421 = vrcp.f32 %v1674_v45  ;;  %v1734_v22 = vld [vmem:[#allocation2 + $0x48] sm:$0xff] (%p742_p10)  ;;  %v1762_v29 = vpack.c.bf16 (%p742_p10), %v1736_v63, %v1735_v44 }
 0x78c   : > { %v1676_v50 = vmax.f32 %v1660_v41, 1e-12  ;;  %v1692_v2 = vmul.f32 %v5416_v48, %v6786_v60  ;;  %v1725_v60 = vld [vmem:[#allocation2] sm:$0xff] (%p742_p10)  ;;  %v1761_v35 = vpack.c.bf16 (%p742_p10), %v1734_v22, %v1733_v24  ;;  %v7888_v22 = vld [vmem:[#allocation87_spill] sm:$0xff] (%p742_p10) }
 0x78d   :  { %v1729_v32 = vld [vmem:[#allocation2 + $0x20] sm:$0xff] (%p742_p10) }
 0x78e   : > { %5423 = vrcp.f32 %v1676_v50  ;;  %1716 = vst [vmem:[#allocation2 + $0x38] sm:$0xff] %v1692_v2  ;;  %v7889_v44 = vld [vmem:[#allocation86_spill] sm:$0xff] (%p742_p10) }
 0x791   : > { %v5418_v30 = vpop.eup %5417 }
 0x792   : > { %v1688_v19 = vmul.f32 %v5418_v30, %v6795_v25  ;;  %v1726_v25 = vld [vmem:[#allocation2 + $0x8] sm:$0xff] (%p742_p10)  ;;  %v1737_v40 = vld [vmem:[#allocation2 + $0x60] sm:$0xff] (%p742_p10) }
 0x793   : > { %v5420_v26 = vpop.eup %5419  ;;  %v1757_v34 = vpack.c.bf16 (%p742_p10), %v1726_v25, %v1725_v60 }
 0x794   : > { %1714 = vst [vmem:[#allocation2 + $0x28] sm:$0xff] %v1688_v19  ;;  %v1706_v20 = vmul.f32 %v5420_v26, %v6806_v53  ;;  %v7883_v53 = vld [vmem:[#allocation110_spill] sm:$0xff] (%p742_p10) }
 0x795   : > { %v5422_v61 = vpop.eup %5421  ;;  %4848 = vmatprep.mubr.bf16.mxu1 (%p742_p10), %v7883_v53  ;;  %4800 = vmatprep.subr.bf16.mxu0 (%p742_p10), %v1757_v34  ;;  %v1732_v0 = vld [vmem:[#allocation2 + $0x38] sm:$0xff] (%p742_p10) }
 0x796   : > { %1723 = vst [vmem:[#allocation2 + $0x70] sm:$0xff] %v1706_v20  ;;  %v1704_v21 = vmul.f32 %v5422_v61, %v6799_v16  ;;  %744 = sbr.rel (!%p742_p10) target bundleno = 921 (0x399), region = 123  ;;  %v1728_v16 = vld [vmem:[#allocation2 + $0x18] sm:$0xff] (%p742_p10)  ;;  %4832 = vmatprep.subr.bf16.mxu1 (%p742_p10), %v1757_v34  ;;  %4801 = vmatpush3.bf16.msra.mxu0 (%p742_p10), %v1757_v34 }
 0x797   :  { %v1758_v27 = vpack.c.bf16 (%p742_p10), %v1728_v16, %v1727_v39  ;;  %4833 = vmatpush3.bf16.msra.mxu1 (%p742_p10), %v1757_v34  ;;  %v7885_v39 = vld [vmem:[#allocation83_spill] sm:$0xff] (%p742_p10) }
 0x798   : > { %v5424_v33 = vpop.eup %5423  ;;  %1722 = vst [vmem:[#allocation2 + $0x68] sm:$0xff] %v1704_v21 }
 0x799   : > { %v1708_v37 = vmul.f32 %v5424_v33, %v6809_v46  ;;  %v1731_v46 = vld [vmem:[#allocation2 + $0x30] sm:$0xff] (%p742_p10)  ;;  %4802 = vmatprep.subr.bf16.mxu0 (%p742_p10), %v1758_v27  ;;  %4834 = vmatprep.subr.bf16.mxu1 (%p742_p10), %v1758_v27 }
 0x79a   :  { %4803 = vmatpush3.bf16.msra.mxu0 (%p742_p10), %v1758_v27  ;;  %v1760_v55 = vpack.c.bf16 (%p742_p10), %v1732_v0, %v1731_v46  ;;  %v7887_v46 = vld [vmem:[#allocation85_spill] sm:$0xff] (%p742_p10) }
 0x79b   : > { %1724 = vst [vmem:[#allocation2 + $0x78] sm:$0xff] %v1708_v37  ;;  %v1730_v36 = vld [vmem:[#allocation2 + $0x28] sm:$0xff] (%p742_p10)  ;;  %4835 = vmatpush3.bf16.msra.mxu1 (%p742_p10), %v1758_v27 }
 0x79c   :  { %v1759_v31 = vpack.c.bf16 (%p742_p10), %v1730_v36, %v1729_v32  ;;  %v7886_v32 = vld [vmem:[#allocation84_spill] sm:$0xff] (%p742_p10) }
 0x79d   :  { %v1739_v5 = vld [vmem:[#allocation2 + $0x70] sm:$0xff] }
 0x79e   :  { %4804 = vmatprep.subr.bf16.mxu0 %v1759_v31  ;;  %4836 = vmatprep.subr.bf16.mxu1 %v1759_v31 }
 0x79f   :  { %4805 = vmatpush3.bf16.msra.mxu0 %v1759_v31  ;;  %4837 = vmatpush3.bf16.msra.mxu1 %v1759_v31  ;;  %v1738_v4 = vld [vmem:[#allocation2 + $0x68] sm:$0xff] }
 0x7a0   :  { %4806 = vmatprep.subr.bf16.mxu0 %v1760_v55  ;;  %4838 = vmatprep.subr.bf16.mxu1 %v1760_v55  ;;  %v1763_v45 = vpack.c.bf16 %v1738_v4, %v1737_v40  ;;  %v7890_v4 = vld [vmem:[#allocation88_spill] sm:$0xff] }
 0x7a2   :  { %v1740_v47 = vld [vmem:[#allocation2 + $0x78] sm:$0xff] }
 0x7a3   :  { %4807 = vmatpush3.bf16.msra.mxu0 %v1760_v55  ;;  %4839 = vmatpush3.bf16.msra.mxu1 %v1760_v55  ;;  %v1764_v52 = vpack.c.bf16 %v1740_v47, %v1739_v5  ;;  %v7891_v5 = vld [vmem:[#allocation89_spill] sm:$0xff] }
 0x7a4   :  { %4808 = vmatprep.subr.bf16.mxu0 %v1761_v35  ;;  %4840 = vmatprep.subr.bf16.mxu1 %v1761_v35 }
 0x7a7   :  { %4809 = vmatpush3.bf16.msra.mxu0 %v1761_v35  ;;  %4841 = vmatpush3.bf16.msra.mxu1 %v1761_v35 }
 0x7a8   :  { %4810 = vmatprep.subr.bf16.mxu0 %v1762_v29  ;;  %4842 = vmatprep.subr.bf16.mxu1 %v1762_v29 }
 0x7ab   :  { %4811 = vmatpush3.bf16.msra.mxu0 %v1762_v29  ;;  %4843 = vmatpush3.bf16.msra.mxu1 %v1762_v29 }
 0x7ac   :  { %4812 = vmatprep.subr.bf16.mxu0 %v1763_v45  ;;  %4844 = vmatprep.subr.bf16.mxu1 %v1763_v45 }
 0x7af   :  { %4813 = vmatpush3.bf16.msra.mxu0 %v1763_v45  ;;  %4845 = vmatpush3.bf16.msra.mxu1 %v1763_v45 }
 0x7b0   :  { %4814 = vmatprep.subr.bf16.mxu0 %v1764_v52  ;;  %4846 = vmatprep.subr.bf16.mxu1 %v1764_v52 }
 0x7b3   :  { %4815 = vmatpush3.bf16.msra.mxu0 %v1764_v52  ;;  %4847 = vmatpush3.bf16.msra.mxu1 %v1764_v52 }
 0x7b6   :  { %4817 = vmatmul.mubr.bf16.vlgmr.msra.gmra.mrb[0].mxu0 %v6437_v38  ;;  %4849 = vmatmul.mubr.bf16.vlgmr.msra.gmra.mrb[0].mxu1 %v6441_v7 }
 0x7b7   :  { %4820 = vmatprep.mubr.bf16.mxu0 %v6445_v43  ;;  %4852 = vmatprep.mubr.bf16.mxu1 %v6449_v51 }
 0x7be   :  { %4821 = vmatmul.mubr.bf16.gmra.mrb[4].mxu0 %v6457_v6  ;;  %4853 = vmatmul.mubr.bf16.gmra.mrb[4].mxu1 %v6461_v23 }
 0x7bf   :  { %4824 = vmatprep.mubr.bf16.mxu0 %v6465_v8  ;;  %4856 = vmatprep.mubr.bf16.mxu1 %v6469_v9 }
 0x7c6   :  { %4825 = vmatmul.mubr.bf16.gmra.mrb[8].mxu0 %v6477_v10  ;;  %4857 = vmatmul.mubr.bf16.gmra.mrb[8].mxu1 %v6481_v11 }
 0x7c7   :  { %4828 = vmatprep.mubr.bf16.mxu0 %v6485_v12  ;;  %4860 = vmatprep.mubr.bf16.mxu1 %v6489_v13  ;;  %v7909_v12 = vld [vmem:[#allocation107_spill] sm:$0xff] }
 0x7ce   :  { %4829 = vmatmul.mubr.bf16.gmra.mrb[12].mxu0 %v6497_v14  ;;  %4861 = vmatmul.mubr.bf16.gmra.mrb[12].mxu1 %v6501_v15  ;;  %v7907_v15 = vld [vmem:[#allocation106_spill] sm:$0xff] }
 0x889   :  { %v4818_v41 = vpop.f32.mrb[0].mxu0  ;;  %v4850_v48 = vpop.f32.mrb[0].mxu1 }
 0x88a   :  { %v6921_v50 = vadd.f32 %v4818_v41, %v6308_v1  ;;  %v6924_v2 = vadd.f32 %v4850_v48, %v6310_v57  ;;  %v1847_v30 = vpop.f32.mrb[1].mxu0  ;;  %v1992_v19 = vpop.f32.mrb[1].mxu1  ;;  %v7884_v57 = vld [vmem:[#allocation82_spill] sm:$0xff] }
 0x88b   :  { %v6927_v26 = vadd.f32 %v1847_v30, %v6312_v58  ;;  %v6930_v20 = vadd.f32 %v1992_v19, %v6314_v59  ;;  %v4819_v61 = vpop.f32.mrb[2].mxu0  ;;  %v4851_v21 = vpop.f32.mrb[2].mxu1  ;;  %v7892_v41 = vld [vmem:[#allocation90_spill] sm:$0xff]  ;;  %v7893_v30 = vld [vmem:[#allocation91_spill] sm:$0xff] }
 0x88c   :  { %v6933_v33 = vadd.f32 %v4819_v61, %v6316_v56  ;;  %v6936_v37 = vadd.f32 %v4851_v21, %v6318_v62  ;;  %v1850_v1 = vpop.f32.mrb[3].mxu0  ;;  %v1995_v60 = vpop.f32.mrb[3].mxu1  ;;  %v2057_v58 = vmul.f32 %v6924_v2, %v6921_v50 }
 0x88d   :  { %v6939_v25 = vadd.f32 %v1850_v1, %v7884_v57  ;;  %v6942_v34 = vadd.f32 %v1995_v60, %v7885_v39  ;;  %v2055_v59 = vmul.f32 %v6930_v20, %v6927_v26 }
 0x88e   :  { %v2058_v56 = vmul.f32 %v6936_v37, %v6933_v33  ;;  %2075 = vadd.xlane.f32.xlu1 %v2057_v58  ;;  %v7894_v58 = vld [vmem:[#allocation92_spill] sm:$0xff] }
 0x88f   :  { %v2056_v62 = vmul.f32 %v6942_v34, %v6939_v25  ;;  %2071 = vadd.xlane.f32.xlu0 %v2055_v59 }
 0x891   :  { %v4822_v16 = vpop.f32.mrb[4].mxu0  ;;  %v4854_v27 = vpop.f32.mrb[4].mxu1 }
 0x892   :  { %v6953_v36 = vadd.f32 %v4822_v16, %v7886_v32  ;;  %v6956_v31 = vadd.f32 %v4854_v27, %v7887_v46  ;;  %v2008_v0 = vpop.f32.mrb[5].mxu1  ;;  %v1863_v24 = vpop.f32.mrb[5].mxu0  ;;  %2077 = vadd.xlane.f32.xlu1 %v2058_v56  ;;  %v7895_v56 = vld [vmem:[#allocation100_spill] sm:$0xff]  ;;  %v7896_v32 = vld [vmem:[#allocation93_spill] sm:$0xff] }
 0x893   :  { %v6959_v55 = vadd.f32 %v2008_v0, %v7888_v22  ;;  %v6962_v63 = vadd.f32 %v1863_v24, %v7889_v44  ;;  %v4823_v35 = vpop.f32.mrb[6].mxu0  ;;  %v4855_v40 = vpop.f32.mrb[6].mxu1  ;;  %2073 = vadd.xlane.f32.xlu0 %v2056_v62  ;;  %v7897_v0 = vld [vmem:[#allocation101_spill] sm:$0xff] }
 0x894   :  { %v6965_v29 = vadd.f32 %v4823_v35, %v7890_v4  ;;  %v6968_v47 = vadd.f32 %v4855_v40, %v7891_v5  ;;  %v1866_v45 = vpop.f32.mrb[7].mxu0  ;;  %v2011_v52 = vpop.f32.mrb[7].mxu1  ;;  %v2061_v21 = vmul.f32 %v6956_v31, %v6953_v36  ;;  %v7898_v35 = vld [vmem:[#allocation94_spill] sm:$0xff] }
 0x895   :  { %v6971_v48 = vadd.f32 %v1866_v45, %v7892_v41  ;;  %v6974_v19 = vadd.f32 %v2011_v52, %v7893_v30  ;;  %v2059_v61 = vmul.f32 %v6959_v55, %v6962_v63  ;;  %v7899_v4 = vld [vmem:[#allocation102_spill] sm:$0xff]  ;;  %v7900_v41 = vld [vmem:[#allocation95_spill] sm:$0xff] }
 0x896   :  { %v2062_v60 = vmul.f32 %v6968_v47, %v6965_v29 }
 0x897   :  { %v2060_v1 = vmul.f32 %v6974_v19, %v6971_v48  ;;  %2079 = vadd.xlane.f32.xlu0 %v2059_v61  ;;  %v7901_v61 = vld [vmem:[#allocation103_spill] sm:$0xff] }
 0x899   :  { %v4826_v57 = vpop.f32.mrb[8].mxu0  ;;  %v4858_v39 = vpop.f32.mrb[8].mxu1  ;;  %2081 = vadd.xlane.f32.xlu1 %v2060_v1 }
 0x89a   :  { %v6985_v59 = vadd.f32 %v4826_v57, %v7894_v58  ;;  %v6988_v62 = vadd.f32 %v4858_v39, %v7895_v56  ;;  %v1879_v16 = vpop.f32.mrb[9].mxu0  ;;  %v2024_v27 = vpop.f32.mrb[9].mxu1 }
 0x89b   :  { %v6991_v46 = vadd.f32 %v1879_v16, %v7896_v32  ;;  %v6994_v24 = vadd.f32 %v2024_v27, %v7897_v0  ;;  %v4827_v22 = vpop.f32.mrb[10].mxu0  ;;  %v4859_v44 = vpop.f32.mrb[10].mxu1  ;;  %2083 = vadd.xlane.f32.xlu0 %v2061_v21  ;;  %v7902_v27 = vld [vmem:[#allocation96_spill] sm:$0xff] }
 0x89c   :  { %v6997_v40 = vadd.f32 %v4827_v22, %v7898_v35  ;;  %v7000_v5 = vadd.f32 %v4859_v44, %v7899_v4  ;;  %v1882_v45 = vpop.f32.mrb[11].mxu0  ;;  %v2027_v52 = vpop.f32.mrb[11].mxu1  ;;  %v2065_v39 = vmul.f32 %v6988_v62, %v6985_v59  ;;  %v7903_v0 = vld [vmem:[#allocation104_spill] sm:$0xff]  ;;  %v7904_v35 = vld [vmem:[#allocation97_spill] sm:$0xff] }
 0x89d   :  { %v7003_v30 = vadd.f32 %v1882_v45, %v7900_v41  ;;  %v7006_v1 = vadd.f32 %v2027_v52, %v7901_v61  ;;  %2085 = vadd.xlane.f32.xlu1 %v2062_v60  ;;  %v2063_v57 = vmul.f32 %v6994_v24, %v6991_v46  ;;  %v7905_v45 = vld [vmem:[#allocation105_spill] sm:$0xff] }
 0x89e   :  { %v2066_v56 = vmul.f32 %v7000_v5, %v6997_v40 }
 0x89f   :  { %v2064_v58 = vmul.f32 %v7006_v1, %v7003_v30  ;;  %2087 = vadd.xlane.f32.xlu0 %v2063_v57  ;;  %v7906_v57 = vld [vmem:[#allocation98_spill] sm:$0xff] }
 0x8a1   :  { %v4830_v21 = vpop.f32.mrb[12].mxu0  ;;  %v4862_v16 = vpop.f32.mrb[12].mxu1  ;;  %2089 = vadd.xlane.f32.xlu1 %v2064_v58  ;;  %v7908_v58 = vld [vmem:[#allocation99_spill] sm:$0xff] }
 0x8a2   :  { %v7017_v32 = vadd.f32 %v4830_v21, %v7902_v27  ;;  %v7020_v60 = vadd.f32 %v4862_v16, %v7903_v0  ;;  %v1895_v22 = vpop.f32.mrb[13].mxu0  ;;  %v2040_v44 = vpop.f32.mrb[13].mxu1 }
 0x8a3   :  { %v7023_v4 = vadd.f32 %v1895_v22, %v7904_v35  ;;  %v7026_v52 = vadd.f32 %v2040_v44, %v7905_v45  ;;  %v4831_v41 = vpop.f32.mrb[14].mxu0  ;;  %v4863_v61 = vpop.f32.mrb[14].mxu1  ;;  %2091 = vadd.xlane.f32.xlu0 %v2065_v39  ;;  %v5429_v39 = vld [vmem:[#allocation17] sm:$0xff]  }
 0x8a4   :  { %v7029_v14 = vadd.f32 %v4831_v41, %v7906_v57  ;;  %v7032_v21 = vadd.f32 %v4863_v61, %v7907_v15  ;;  %v1898_v27 = vpop.f32.mrb[15].mxu0  ;;  %v2043_v16 = vpop.f32.mrb[15].mxu1  ;;  %v2069_v35 = vmul.f32 %v7020_v60, %v7017_v32  ;;  %4880 = vmatprep.mubr.bf16.mxu0 %v5429_v39 }
 0x8a5   :  { %v7035_v0 = vadd.f32 %v1898_v27, %v7908_v58  ;;  %v7038_v22 = vadd.f32 %v2043_v16, %v7909_v12  ;;  %2093 = vadd.xlane.f32.xlu1 %v2066_v56  ;;  %v2067_v44 = vmul.f32 %v7026_v52, %v7023_v4  ;;  %v5430_v12 = vld [vmem:[#allocation18] sm:$0xff]  }
 0x8a6   :  { %v2070_v45 = vmul.f32 %v7032_v21, %v7029_v14  ;;  %4944 = vmatprep.mubr.bf16.mxu1 %v5430_v12 }
 0x8a7   :  { %v2068_v15 = vmul.f32 %v7038_v22, %v7035_v0  ;;  %2095 = vadd.xlane.f32.xlu0 %v2067_v44 }
 0x8a9   :  { %2097 = vadd.xlane.f32.xlu1 %v2068_v15 }
 0x8ab   :  { %2099 = vadd.xlane.f32.xlu0 %v2069_v35 }
 0x8ad   :  { %2101 = vadd.xlane.f32.xlu1 %v2070_v45 }
 0x91b   :  { %v2076_v56 = vpop.xlane.xlu1 %2075 }
 0x91c   :  { %v2072_v41 = vpop.xlane.xlu0 %2071  ;;  %v2107_v61 = vmul.f32 1.442695, %v2076_v56  ;;  %v7911_v56 = vld [vmem:[#allocation33_spill] sm:$0xff] }
 0x91d   :  { %v2103_v57 = vmul.f32 1.442695, %v2072_v41  ;;  %v2137_v41 = vadd.f32 %v7911_v56, %v6921_v50  ;;  %v2178_v50 = vadd.f32 %v7911_v56, %v6936_v37 }
 0x91e   :  { %5469 = vpow2.f32 %v2107_v61 }
 0x91f   :  { %v2078_v27 = vpop.xlane.xlu1 %2077  ;;  %5471 = vpow2.f32 %v2103_v57 }
 0x920   :  { %v2109_v16 = vmul.f32 1.442695, %v2078_v27  ;;  %v2074_v58 = vpop.xlane.xlu0 %2073  ;;  %v2177_v27 = vadd.f32 %v7911_v56, %v6924_v2  ;;  %v2176_v2 = vadd.f32 %v7911_v56, %v6942_v34 }
 0x921   :  { %v2105_v13 = vmul.f32 1.442695, %v2074_v58 }
 0x922   :  { %5473 = vpow2.f32 %v2109_v16  ;;  %v2175_v16 = vadd.f32 %v7911_v56, %v6930_v20 }
 0x923   :  { %5475 = vpow2.f32 %v2105_v13  ;;  %v2135_v13 = vadd.f32 %v7911_v56, %v6927_v26 }
 0x924   :  { %v2080_v44 = vpop.xlane.xlu0 %2079 }
 0x925   :  { %v2111_v35 = vmul.f32 1.442695, %v2080_v44  ;;  %v2138_v44 = vadd.f32 %v7911_v56, %v6933_v33 }
 0x926   :  { %v2082_v15 = vpop.xlane.xlu1 %2081 }
 0x927   :  { %v2113_v45 = vmul.f32 1.442695, %v2082_v15  ;;  %5477 = vpow2.f32 %v2111_v35  ;;  %v2136_v15 = vadd.f32 %v7911_v56, %v6939_v25 }
 0x928   :  { %v2084_v39 = vpop.xlane.xlu0 %2083  ;;  %v7048_v12 = vpop.eup %5469 }
 0x929   :  { %5479 = vpow2.f32 %v2113_v45  ;;  %7910 = vst [vmem:[#allocation34_spill] sm:$0xff] %v7048_v12  ;;  %v2115_v61 = vmul.f32 1.442695, %v2084_v39  ;;  %v7052_v57 = vpop.eup %5471  ;;  %v2193_v20 = vmul.f32 %v7048_v12, %v2177_v27 }
 0x92a   :  { %v2086_v10 = vpop.xlane.xlu1 %2085  ;;  %7912 = vst [vmem:[#allocation35_spill] sm:$0xff] %v7052_v57  ;;  %v2191_v37 = vmul.f32 %v7052_v57, %v2175_v16  ;;  %v2151_v34 = vmul.f32 %v7052_v57, %v2135_v13  ;;  %v2140_v13 = vadd.f32 %v7911_v56, %v6971_v48 }
 0x92b   :  { %v2117_v58 = vmul.f32 1.442695, %v2086_v10  ;;  %5481 = vpow2.f32 %v2115_v61  ;;  %v2153_v10 = vmul.f32 %v7048_v12, %v2137_v41 }
 0x92c   :  { %v7066_v35 = vpop.eup %5473  ;;  %v2088_v26 = vpop.xlane.xlu0 %2087 }
 0x92d   :  { %7913 = vst [vmem:[#allocation36_spill] sm:$0xff] %v7066_v35  ;;  %5483 = vpow2.f32 %v2117_v58  ;;  %v7072_v45 = vpop.eup %5475  ;;  %v2119_v33 = vmul.f32 1.442695, %v2088_v26  ;;  %v2194_v25 = vmul.f32 %v7066_v35, %v2178_v50  ;;  %v2154_v61 = vmul.f32 %v7066_v35, %v2138_v44 }
 0x92e   :  { %7914 = vst [vmem:[#allocation37_spill] sm:$0xff] %v7072_v45  ;;  %v2090_v39 = vpop.xlane.xlu1 %2089  ;;  %v2192_v8 = vmul.f32 %v7072_v45, %v2176_v2  ;;  %v2152_v58 = vmul.f32 %v7072_v45, %v2136_v15  ;;  %v2179_v26 = vadd.f32 %v7911_v56, %v6959_v55  ;;  %v2139_v2 = vadd.f32 %v7911_v56, %v6962_v63 }
 0x92f   :  { %v2121_v11 = vmul.f32 1.442695, %v2090_v39  ;;  %5485 = vpow2.f32 %v2119_v33  ;;  %v2208_v27 = vpack.c.bf16 %v2194_v25, %v2193_v20  ;;  %v7080_v41 = vpack.c.bf16 %v2154_v61, %v2153_v10 }
 0x930   :  { %v2092_v16 = vpop.xlane.xlu0 %2091  ;;  %v2207_v12 = vpack.c.bf16 %v2192_v8, %v2191_v37  ;;  %v7084_v50 = vpack.c.bf16 %v2152_v58, %v2151_v34  ;;  %v2180_v15 = vadd.f32 %v7911_v56, %v6974_v19  ;;  %v2141_v19 = vadd.f32 %v7911_v56, %v6953_v36 }
 0x931   :  { %5487 = vpow2.f32 %v2121_v11  ;;  %v7086_v44 = vpop.eup %5477  ;;  %v2123_v20 = vmul.f32 1.442695, %v2092_v16  ;;  %v2181_v39 = vadd.f32 %v7911_v56, %v6956_v31  ;;  %v2142_v37 = vadd.f32 %v7911_v56, %v6965_v29 }
 0x932   :  { %7915 = vst [vmem:[#allocation38_spill] sm:$0xff] %v7086_v44  ;;  %v2094_v10 = vpop.xlane.xlu1 %2093  ;;  %4864 = vmatprep.subr.bf16.mxu0 %v2207_v12  ;;  %4928 = vmatprep.subr.bf16.mxu1 %v2207_v12  ;;  %v2195_v8 = vmul.f32 %v7086_v44, %v2179_v26  ;;  %v2155_v63 = vmul.f32 %v7086_v44, %v2139_v2 }
 0x933   :  { %v7094_v33 = vpop.eup %5479  ;;  %v2125_v11 = vmul.f32 1.442695, %v2094_v10  ;;  %5489 = vpow2.f32 %v2123_v20  ;;  %4865 = vmatpush3.bf16.msra.mxu0 %v2207_v12  ;;  %4929 = vmatpush3.bf16.msra.mxu1 %v2207_v12  ;;  %v2182_v61 = vadd.f32 %v7911_v56, %v6968_v47  ;;  %v2143_v47 = vadd.f32 %v7911_v56, %v6991_v46 }
 0x934   :  { %7916 = vst [vmem:[#allocation39_spill] sm:$0xff] %v7094_v33  ;;  %v2196_v55 = vmul.f32 %v7094_v33, %v2180_v15  ;;  %v2156_v48 = vmul.f32 %v7094_v33, %v2140_v13  ;;  %4866 = vmatprep.subr.bf16.mxu0 %v2208_v27  ;;  %4930 = vmatprep.subr.bf16.mxu1 %v2208_v27  ;;  %v2096_v25 = vpop.xlane.xlu0 %2095 }
 0x935   :  { %5491 = vpow2.f32 %v2125_v11  ;;  %v7106_v12 = vpop.eup %5481  ;;  %v2127_v34 = vmul.f32 1.442695, %v2096_v25  ;;  %v2183_v20 = vadd.f32 %v7911_v56, %v6994_v24  ;;  %v2144_v10 = vadd.f32 %v7911_v56, %v7003_v30 }
 0x936   :  { %7917 = vst [vmem:[#allocation40_spill] sm:$0xff] %v7106_v12  ;;  %v2098_v58 = vpop.xlane.xlu1 %2097  ;;  %v2209_v26 = vpack.c.bf16 %v2196_v55, %v2195_v8  ;;  %v7110_v16 = vpack.c.bf16 %v2156_v48, %v2155_v63  ;;  %v2197_v2 = vmul.f32 %v7106_v12, %v2181_v39  ;;  %v2157_v13 = vmul.f32 %v7106_v12, %v2141_v19 }
 0x937   :  { %v7112_v36 = vpop.eup %5483  ;;  %v2129_v31 = vmul.f32 1.442695, %v2098_v58  ;;  %5493 = vpow2.f32 %v2127_v34  ;;  %4867 = vmatpush3.bf16.msra.mxu0 %v2208_v27  ;;  %4931 = vmatpush3.bf16.msra.mxu1 %v2208_v27  ;;  %v2184_v8 = vadd.f32 %v7911_v56, %v7006_v1  ;;  %v2145_v1 = vadd.f32 %v7911_v56, %v6985_v59 }
 0x938   :  { %7918 = vst [vmem:[#allocation41_spill] sm:$0xff] %v7112_v36  ;;  %v2198_v29 = vmul.f32 %v7112_v36, %v2182_v61  ;;  %v2158_v15 = vmul.f32 %v7112_v36, %v2142_v37  ;;  %4868 = vmatprep.subr.bf16.mxu0 %v2209_v26  ;;  %4932 = vmatprep.subr.bf16.mxu1 %v2209_v26  ;;  %v2100_v11 = vpop.xlane.xlu0 %2099 }
 0x939   :  { %5495 = vpow2.f32 %v2129_v31  ;;  %v7124_v27 = vpop.eup %5485  ;;  %v2131_v55 = vmul.f32 1.442695, %v2100_v11  ;;  %v2185_v61 = vadd.f32 %v7911_v56, %v6988_v62  ;;  %v2146_v58 = vadd.f32 %v7911_v56, %v6997_v40 }
 0x93a   :  { %7919 = vst [vmem:[#allocation42_spill] sm:$0xff] %v7124_v27  ;;  %v2102_v63 = vpop.xlane.xlu1 %2101  ;;  %v2210_v48 = vpack.c.bf16 %v2198_v29, %v2197_v2  ;;  %v7128_v19 = vpack.c.bf16 %v2158_v15, %v2157_v13  ;;  %v2199_v39 = vmul.f32 %v7124_v27, %v2183_v20  ;;  %v2159_v37 = vmul.f32 %v7124_v27, %v2143_v47 }
 0x93b   :  { %v7130_v46 = vpop.eup %5487  ;;  %v2133_v24 = vmul.f32 1.442695, %v2102_v63  ;;  %5497 = vpow2.f32 %v2131_v55  ;;  %4869 = vmatpush3.bf16.msra.mxu0 %v2209_v26  ;;  %4933 = vmatpush3.bf16.msra.mxu1 %v2209_v26  ;;  %v2186_v26 = vadd.f32 %v7911_v56, %v7000_v5  ;;  %v2147_v40 = vadd.f32 %v7911_v56, %v7023_v4 }
 0x93c   :  { %7920 = vst [vmem:[#allocation43_spill] sm:$0xff] %v7130_v46  ;;  %v2200_v30 = vmul.f32 %v7130_v46, %v2184_v8  ;;  %v2160_v25 = vmul.f32 %v7130_v46, %v2144_v10  ;;  %4870 = vmatprep.subr.bf16.mxu0 %v2210_v48  ;;  %4934 = vmatprep.subr.bf16.mxu1 %v2210_v48 }
 0x93d   :  { %5499 = vpow2.f32 %v2133_v24  ;;  %v7140_v34 = vpop.eup %5489  ;;  %v2187_v5 = vadd.f32 %v7911_v56, %v7026_v52  ;;  %v2148_v20 = vadd.f32 %v7911_v56, %v7035_v0  ;;  %v2188_v10 = vadd.f32 %v7911_v56, %v7038_v22 }
 0x93e   :  { %7921 = vst [vmem:[#allocation44_spill] sm:$0xff] %v7140_v34  ;;  %v2211_v31 = vpack.c.bf16 %v2200_v30, %v2199_v39  ;;  %v7146_v2 = vpack.c.bf16 %v2160_v25, %v2159_v37  ;;  %v2201_v59 = vmul.f32 %v7140_v34, %v2185_v61  ;;  %v2161_v13 = vmul.f32 %v7140_v34, %v2145_v1 }
 0x93f   :  { %v7148_v29 = vpop.eup %5491  ;;  %4871 = vmatpush3.bf16.msra.mxu0 %v2210_v48  ;;  %4935 = vmatpush3.bf16.msra.mxu1 %v2210_v48  ;;  %v2149_v0 = vadd.f32 %v7911_v56, %v7017_v32  ;;  %v2189_v22 = vadd.f32 %v7911_v56, %v7020_v60  ;;  %v2150_v39 = vadd.f32 %v7911_v56, %v7029_v14 }
 0x940   :  { %7922 = vst [vmem:[#allocation45_spill] sm:$0xff] %v7148_v29  ;;  %v2202_v62 = vmul.f32 %v7148_v29, %v2186_v26  ;;  %v2162_v15 = vmul.f32 %v7148_v29, %v2146_v58  ;;  %4872 = vmatprep.subr.bf16.mxu0 %v2211_v31  ;;  %4936 = vmatprep.subr.bf16.mxu1 %v2211_v31 }
 0x941   :  { %v7158_v47 = vpop.eup %5493  ;;  %v2190_v30 = vadd.f32 %v7911_v56, %v7032_v21  ;;  %v5431_v21 = vld [vmem:[#allocation17 + $0x8] sm:$0xff]  }
 0x942   :  { %7923 = vst [vmem:[#allocation46_spill] sm:$0xff] %v7158_v47  ;;  %v2212_v11 = vpack.c.bf16 %v2202_v62, %v2201_v59  ;;  %v7164_v8 = vpack.c.bf16 %v2162_v15, %v2161_v13  ;;  %v2203_v4 = vmul.f32 %v7158_v47, %v2187_v5  ;;  %v2163_v63 = vmul.f32 %v7158_v47, %v2147_v40  ;;  %v5432_v56 = vld [vmem:[#allocation18 + $0x8] sm:$0xff]   ;;  %v5434_v59 = vld [vmem:[#allocation18 + $0x10] sm:$0xff]   ;;  %v5435_v62 = vld [vmem:[#allocation17 + $0x18] sm:$0xff]  }
 0x943   :  { %v7166_v55 = vpop.eup %5495  ;;  %4873 = vmatpush3.bf16.msra.mxu0 %v2211_v31  ;;  %4937 = vmatpush3.bf16.msra.mxu1 %v2211_v31  ;;  %v5433_v31 = vld [vmem:[#allocation17 + $0x10] sm:$0xff]   ;;  %v5436_v13 = vld [vmem:[#allocation18 + $0x18] sm:$0xff]   ;;  %v5437_v15 = vld [vmem:[#allocation17 + $0x20] sm:$0xff]  }
 0x944   :  { %7924 = vst [vmem:[#allocation47_spill] sm:$0xff] %v7166_v55  ;;  %v2204_v52 = vmul.f32 %v7166_v55, %v2188_v10  ;;  %v2164_v48 = vmul.f32 %v7166_v55, %v2148_v20  ;;  %4874 = vmatprep.subr.bf16.mxu0 %v2212_v11  ;;  %4938 = vmatprep.subr.bf16.mxu1 %v2212_v11  ;;  %v5438_v40 = vld [vmem:[#allocation18 + $0x20] sm:$0xff]   ;;  %v5441_v5 = vld [vmem:[#allocation17 + $0x30] sm:$0xff]  }
 0x945   :  { %v7176_v24 = vpop.eup %5497  ;;  %v5442_v20 = vld [vmem:[#allocation18 + $0x30] sm:$0xff]   ;;  %v5445_v10 = vld [vmem:[#allocation15] sm:$0xff]  }
 0x946   :  { %7925 = vst [vmem:[#allocation48_spill] sm:$0xff] %v7176_v24  ;;  %v2213_v37 = vpack.c.bf16 %v2204_v52, %v2203_v4  ;;  %v7182_v25 = vpack.c.bf16 %v2164_v48, %v2163_v63  ;;  %v2205_v32 = vmul.f32 %v7176_v24, %v2189_v22  ;;  %v2165_v61 = vmul.f32 %v7176_v24, %v2149_v0  ;;  %v5448_v4 = vld [vmem:[#allocation15 + $0x18] sm:$0xff]   ;;  %v5449_v52 = vld [vmem:[#allocation15 + $0x20] sm:$0xff]   ;;  %v5450_v48 = vld [vmem:[#allocation15 + $0x28] sm:$0xff]  }
 0x947   :  { %v7184_v1 = vpop.eup %5499  ;;  %4875 = vmatpush3.bf16.msra.mxu0 %v2212_v11  ;;  %4939 = vmatpush3.bf16.msra.mxu1 %v2212_v11  ;;  %v5446_v11 = vld [vmem:[#allocation15 + $0x8] sm:$0xff]   ;;  %v7928_v63 = vld [vmem:[#allocation126_spill] sm:$0xff]  ;;  %v5451_v0 = vld [vmem:[#allocation15 + $0x30] sm:$0xff]  }
 0x948   :  { %7926 = vst [vmem:[#allocation49_spill] sm:$0xff] %v7184_v1  ;;  %v2206_v60 = vmul.f32 %v7184_v1, %v2190_v30  ;;  %v2166_v58 = vmul.f32 %v7184_v1, %v2150_v39  ;;  %4876 = vmatprep.subr.bf16.mxu0 %v2213_v37  ;;  %4940 = vmatprep.subr.bf16.mxu1 %v2213_v37 }
 0x94a   :  { %v2214_v14 = vpack.c.bf16 %v2206_v60, %v2205_v32  ;;  %v7190_v26 = vpack.c.bf16 %v2166_v58, %v2165_v61 }
 0x94b   :  { %4877 = vmatpush3.bf16.msra.mxu0 %v2213_v37  ;;  %4941 = vmatpush3.bf16.msra.mxu1 %v2213_v37 }
 0x94c   :  { %4878 = vmatprep.subr.bf16.mxu0 %v2214_v14  ;;  %4942 = vmatprep.subr.bf16.mxu1 %v2214_v14 }
 0x94f   :  { %4879 = vmatpush3.bf16.msra.mxu0 %v2214_v14  ;;  %4943 = vmatpush3.bf16.msra.mxu1 %v2214_v14 }
 0x950   :  { %4896 = vmatprep.subr.bf16.mxu0 %v7084_v50  ;;  %4960 = vmatprep.subr.bf16.mxu1 %v7084_v50 }
 0x952   :  { %4881 = vmatmul.mubr.bf16.vlgmr.msra.gmra.mrb[16].mxu0 %v5431_v21  ;;  %4945 = vmatmul.mubr.bf16.vlgmr.msra.gmra.mrb[16].mxu1 %v5432_v56 }
 0x953   :  { %4897 = vmatpush3.bf16.msra.mxu0 %v7084_v50  ;;  %4961 = vmatpush3.bf16.msra.mxu1 %v7084_v50  ;;  %v5439_v50 = vld [vmem:[#allocation17 + $0x28] sm:$0xff]  }
 0x954   :  { %4898 = vmatprep.subr.bf16.mxu0 %v7080_v41  ;;  %4962 = vmatprep.subr.bf16.mxu1 %v7080_v41 }
 0x955   :  { %4884 = vmatprep.mubr.bf16.mxu0 %v5433_v31  ;;  %4948 = vmatprep.mubr.bf16.mxu1 %v5434_v59 }
 0x957   :  { %4899 = vmatpush3.bf16.msra.mxu0 %v7080_v41  ;;  %4963 = vmatpush3.bf16.msra.mxu1 %v7080_v41  ;;  %v5440_v41 = vld [vmem:[#allocation18 + $0x28] sm:$0xff]  }
 0x958   :  { %4900 = vmatprep.subr.bf16.mxu0 %v7110_v16  ;;  %4964 = vmatprep.subr.bf16.mxu1 %v7110_v16 }
 0x95a   :  { %4885 = vmatmul.mubr.bf16.gmra.mrb[20].mxu0 %v5435_v62  ;;  %4949 = vmatmul.mubr.bf16.gmra.mrb[20].mxu1 %v5436_v13 }
 0x95b   :  { %4901 = vmatpush3.bf16.msra.mxu0 %v7110_v16  ;;  %4965 = vmatpush3.bf16.msra.mxu1 %v7110_v16  ;;  %v5443_v16 = vld [vmem:[#allocation17 + $0x38] sm:$0xff]  }
 0x95c   :  { %4902 = vmatprep.subr.bf16.mxu0 %v7128_v19  ;;  %4966 = vmatprep.subr.bf16.mxu1 %v7128_v19 }
 0x95d   :  { %4888 = vmatprep.mubr.bf16.mxu0 %v5437_v15  ;;  %4952 = vmatprep.mubr.bf16.mxu1 %v5438_v40 }
 0x95f   :  { %4903 = vmatpush3.bf16.msra.mxu0 %v7128_v19  ;;  %4967 = vmatpush3.bf16.msra.mxu1 %v7128_v19  ;;  %v5444_v19 = vld [vmem:[#allocation18 + $0x38] sm:$0xff]  }
 0x960   :  { %4904 = vmatprep.subr.bf16.mxu0 %v7146_v2  ;;  %4968 = vmatprep.subr.bf16.mxu1 %v7146_v2 }
 0x962   :  { %4889 = vmatmul.mubr.bf16.gmra.mrb[24].mxu0 %v5439_v50  ;;  %4953 = vmatmul.mubr.bf16.gmra.mrb[24].mxu1 %v5440_v41 }
 0x963   :  { %4905 = vmatpush3.bf16.msra.mxu0 %v7146_v2  ;;  %4969 = vmatpush3.bf16.msra.mxu1 %v7146_v2  ;;  %v7927_v2 = vld [vmem:[#allocation125_spill] sm:$0xff] }
 0x964   :  { %4906 = vmatprep.subr.bf16.mxu0 %v7164_v8  ;;  %4970 = vmatprep.subr.bf16.mxu1 %v7164_v8 }
 0x965   :  { %4892 = vmatprep.mubr.bf16.mxu0 %v5441_v5  ;;  %4956 = vmatprep.mubr.bf16.mxu1 %v5442_v20 }
 0x967   :  { %4907 = vmatpush3.bf16.msra.mxu0 %v7164_v8  ;;  %4971 = vmatpush3.bf16.msra.mxu1 %v7164_v8  ;;  %v5447_v8 = vld [vmem:[#allocation15 + $0x10] sm:$0xff]  }
 0x968   :  { %4908 = vmatprep.subr.bf16.mxu0 %v7182_v25  ;;  %4972 = vmatprep.subr.bf16.mxu1 %v7182_v25 }
 0x96a   :  { %4893 = vmatmul.mubr.bf16.gmra.mrb[28].mxu0 %v5443_v16  ;;  %4957 = vmatmul.mubr.bf16.gmra.mrb[28].mxu1 %v5444_v19 }
 0x96b   :  { %4909 = vmatpush3.bf16.msra.mxu0 %v7182_v25  ;;  %4973 = vmatpush3.bf16.msra.mxu1 %v7182_v25 }
 0x96c   :  { %4910 = vmatprep.subr.bf16.mxu0 %v7190_v26  ;;  %4974 = vmatprep.subr.bf16.mxu1 %v7190_v26 }
 0x96d   :  { %4912 = vmatprep.mubr.bf16.mxu0 %v7927_v2  ;;  %4976 = vmatprep.mubr.bf16.mxu1 %v5445_v10 }
 0x96f   :  { %4911 = vmatpush3.bf16.msra.mxu0 %v7190_v26  ;;  %4975 = vmatpush3.bf16.msra.mxu1 %v7190_v26 }
 0x972   :  { %4913 = vmatmul.mubr.bf16.vlgmr.msra.gmra.mrb[16].mxu0 %v6629_v18  ;;  %4977 = vmatmul.mubr.bf16.vlgmr.msra.gmra.mrb[16].mxu1 %v5446_v11  ;;  %v5452_v18 = vld [vmem:[#allocation15 + $0x38] sm:$0xff]  }
 0x973   :  { %4916 = vmatprep.mubr.bf16.mxu0 %v6641_v17  ;;  %4980 = vmatprep.mubr.bf16.mxu1 %v5447_v8  ;;  %v5887_v17 = vmov 16  }
 0x974   :  { %5426 = vset.pattern.permute.xlu1 %v5887_v17  ;;  %5425 = vset.pattern.permute.xlu0 %v5887_v17 }
 0x97a   :  { %4917 = vmatmul.mubr.bf16.gmra.mrb[20].mxu0 %v6653_v49  ;;  %4981 = vmatmul.mubr.bf16.gmra.mrb[20].mxu1 %v5448_v4 }
 0x97b   :  { %4920 = vmatprep.mubr.bf16.mxu0 %v7928_v63  ;;  %4984 = vmatprep.mubr.bf16.mxu1 %v5449_v52 }
 0x982   :  { %4921 = vmatmul.mubr.bf16.gmra.mrb[24].mxu0 %v6633_v54  ;;  %4985 = vmatmul.mubr.bf16.gmra.mrb[24].mxu1 %v5450_v48 }
 0x983   :  { %4924 = vmatprep.mubr.bf16.mxu0 %v6637_v28  ;;  %4988 = vmatprep.mubr.bf16.mxu1 %v5451_v0 }
 0x98a   :  { %4925 = vmatmul.mubr.bf16.gmra.mrb[28].mxu0 %v6649_v3  ;;  %4989 = vmatmul.mubr.bf16.gmra.mrb[28].mxu1 %v5452_v18 }
 0xa45   :  { %v7232_v49 = vpop.f32.mrb[16].mxu0  ;;  %v7234_v22 = vpop.f32.mrb[16].mxu1 }
 0xa46   :  { %7929 = vst [vmem:[#allocation50_spill] sm:$0xff] %v7234_v22  ;;  %v2845_v39 = vadd.f32 1e-16, %v7232_v49  ;;  %v2893_v30 = vadd.f32 1e-16, %v7234_v22  ;;  %v7238_v54 = vpop.f32.mrb[17].mxu0 }
 0xa47   :  { %v7240_v37 = vpop.f32.mrb[17].mxu1  ;;  %v2843_v28 = vadd.f32 1e-16, %v7238_v54  ;;  %v7244_v25 = vpop.f32.mrb[18].mxu0 }
 0xa48   :  { %7930 = vst [vmem:[#allocation51_spill] sm:$0xff] %v7240_v37  ;;  %v2891_v3 = vadd.f32 1e-16, %v7240_v37  ;;  %v7246_v32 = vpop.f32.mrb[18].mxu1  ;;  %5501 = vrcp.f32 %v2845_v39  ;;  %v2846_v60 = vadd.f32 1e-16, %v7244_v25 }
 0xa49   :  { %7931 = vst [vmem:[#allocation52_spill] sm:$0xff] %v7246_v32  ;;  %v7249_v61 = vpop.f32.mrb[19].mxu0  ;;  %v7251_v58 = vpop.f32.mrb[19].mxu1  ;;  %5503 = vrcp.f32 %v2893_v30  ;;  %v2894_v14 = vadd.f32 1e-16, %v7246_v32  ;;  %v5453_v32 = vld [vmem:[#allocation12] sm:$0xff]  }
 0xa4a   :  { %7932 = vst [vmem:[#allocation53_spill] sm:$0xff] %v7251_v58  ;;  %5505 = vrcp.f32 %v2843_v28  ;;  %v2844_v26 = vadd.f32 1e-16, %v7249_v61  ;;  %v2892_v21 = vadd.f32 1e-16, %v7251_v58  ;;  %5008 = vmatprep.mubr.bf16.mxu0 %v5453_v32 }
 0xa4b   :  { %5507 = vrcp.f32 %v2891_v3 }
 0xa4c   :  { %5509 = vrcp.f32 %v2846_v60 }
 0xa4d   :  { %5511 = vrcp.f32 %v2894_v14  ;;  %v7256_v56 = vpop.f32.mrb[20].mxu0  ;;  %v7258_v31 = vpop.f32.mrb[20].mxu1 }
 0xa4e   :  { %7933 = vst [vmem:[#allocation54_spill] sm:$0xff] %v7258_v31  ;;  %5513 = vrcp.f32 %v2844_v26  ;;  %v2849_v59 = vadd.f32 1e-16, %v7256_v56  ;;  %v2897_v62 = vadd.f32 1e-16, %v7258_v31  ;;  %v7262_v13 = vpop.f32.mrb[21].mxu0 }
 0xa4f   :  { %v7264_v15 = vpop.f32.mrb[21].mxu1  ;;  %5515 = vrcp.f32 %v2892_v21  ;;  %v2847_v40 = vadd.f32 1e-16, %v7262_v13  ;;  %v7268_v41 = vpop.f32.mrb[22].mxu0 }
 0xa50   :  { %7934 = vst [vmem:[#allocation55_spill] sm:$0xff] %v7264_v15  ;;  %v2895_v50 = vadd.f32 1e-16, %v7264_v15  ;;  %v7270_v5 = vpop.f32.mrb[22].mxu1  ;;  %5517 = vrcp.f32 %v2849_v59  ;;  %v2850_v20 = vadd.f32 1e-16, %v7268_v41 }
 0xa51   :  { %7935 = vst [vmem:[#allocation56_spill] sm:$0xff] %v7270_v5  ;;  %v7273_v16 = vpop.f32.mrb[23].mxu0  ;;  %v7275_v19 = vpop.f32.mrb[23].mxu1  ;;  %5519 = vrcp.f32 %v2897_v62  ;;  %v2898_v10 = vadd.f32 1e-16, %v7270_v5 }
 0xa52   :  { %7936 = vst [vmem:[#allocation57_spill] sm:$0xff] %v7275_v19  ;;  %v7278_v2 = vpop.eup %5501  ;;  %5521 = vrcp.f32 %v2847_v40  ;;  %v2848_v11 = vadd.f32 1e-16, %v7273_v16  ;;  %v2896_v4 = vadd.f32 1e-16, %v7275_v19 }
 0xa53   :  { %v7281_v8 = vpop.eup %5503  ;;  %5523 = vrcp.f32 %v2895_v50 }
 0xa54   :  { %v7284_v52 = vpop.eup %5505  ;;  %5525 = vrcp.f32 %v2850_v20 }
 0xa55   :  { %v7286_v63 = vpop.eup %5507  ;;  %5527 = vrcp.f32 %v2898_v10  ;;  %v7288_v48 = vpop.f32.mrb[24].mxu0 }
 0xa56   :  { %v7290_v0 = vpop.f32.mrb[24].mxu1  ;;  %v7292_v18 = vpop.eup %5509  ;;  %5529 = vrcp.f32 %v2848_v11  ;;  %v2853_v17 = vadd.f32 1e-16, %v7288_v48 }
 0xa57   :  { %7937 = vst [vmem:[#allocation58_spill] sm:$0xff] %v7290_v0  ;;  %v2901_v39 = vadd.f32 1e-16, %v7290_v0  ;;  %v7296_v30 = vpop.f32.mrb[25].mxu0  ;;  %v7298_v28 = vpop.f32.mrb[25].mxu1  ;;  %5531 = vrcp.f32 %v2896_v4 }
 0xa58   :  { %7938 = vst [vmem:[#allocation59_spill] sm:$0xff] %v7298_v28  ;;  %v7300_v3 = vpop.eup %5511  ;;  %v2851_v60 = vadd.f32 1e-16, %v7296_v30  ;;  %v2899_v14 = vadd.f32 1e-16, %v7298_v28  ;;  %v7304_v26 = vpop.f32.mrb[26].mxu0  ;;  %5533 = vrcp.f32 %v2853_v17 }
 0xa59   :  { %7939 = vst [vmem:[#allocation60_spill] sm:$0xff] %v7304_v26  ;;  %v7306_v21 = vpop.f32.mrb[26].mxu1  ;;  %v7310_v62 = vpop.eup %5513  ;;  %v3332_v40 = vpack.c.bf16 %v7300_v3, %v7281_v8  ;;  %v2854_v50 = vadd.f32 1e-16, %v7304_v26  ;;  %5535 = vrcp.f32 %v2901_v39 }
 0xa5a   :  { %7940 = vst [vmem:[#allocation61_spill] sm:$0xff] %v7306_v21  ;;  %v7315_v20 = vpop.f32.mrb[27].mxu0  ;;  %v7317_v10 = vpop.f32.mrb[27].mxu1  ;;  %v2902_v4 = vadd.f32 1e-16, %v7306_v21  ;;  %5537 = vrcp.f32 %v2851_v60  ;;  %v7951_v32 = vpack.c.bf16 %v7310_v62, %v7284_v52 }
 0xa5b   :  { %7941 = vst [vmem:[#allocation62_spill] sm:$0xff] %v7317_v10  ;;  %v7319_v11 = vpop.eup %5515  ;;  %3413 = vrot.lane.b32.xlu1 %v3332_v40, %s5888_s3  ;;  %v2852_v1 = vadd.f32 1e-16, %v7315_v20  ;;  %5539 = vrcp.f32 %v2899_v14  ;;  %v2900_v39 = vadd.f32 1e-16, %v7317_v10 }
 0xa5c   :  { %v7324_v55 = vpop.eup %5517  ;;  %v3331_v17 = vpack.c.bf16 %v7319_v11, %v7286_v63  ;;  %5541 = vrcp.f32 %v2854_v50 }
 0xa5d   :  { %v7330_v47 = vpop.eup %5519  ;;  %5543 = vrcp.f32 %v2902_v4  ;;  %v7338_v60 = vpop.f32.mrb[28].mxu0 }
 0xa5e   :  { %v7333_v24 = vpop.eup %5521  ;;  %3411 = vrot.lane.b32.xlu0 %v3331_v17, %s5888_s3  ;;  %7942 = vst [vmem:[#allocation63_spill] sm:$0xff] %v7338_v60  ;;  %v7340_v40 = vpop.f32.mrb[28].mxu1  ;;  %5545 = vrcp.f32 %v2852_v1  ;;  %v2857_v29 = vadd.f32 1e-16, %v7338_v60 }
 0xa5f   :  { %v7336_v59 = vpop.eup %5523  ;;  %7943 = vst [vmem:[#allocation64_spill] sm:$0xff] %v7340_v40  ;;  %v2905_v14 = vadd.f32 1e-16, %v7340_v40  ;;  %v7346_v27 = vpop.f32.mrb[29].mxu0  ;;  %5547 = vrcp.f32 %v2900_v39 }
 0xa60   :  { %v7342_v46 = vpop.eup %5525  ;;  %7944 = vst [vmem:[#allocation65_spill] sm:$0xff] %v7346_v27  ;;  %v7348_v34 = vpop.f32.mrb[29].mxu1  ;;  %v2855_v4 = vadd.f32 1e-16, %v7346_v27  ;;  %5549 = vrcp.f32 %v2857_v29 }
 0xa61   :  { %7945 = vst [vmem:[#allocation66_spill] sm:$0xff] %v7348_v34  ;;  %v7350_v50 = vpop.eup %5527  ;;  %v2903_v17 = vadd.f32 1e-16, %v7348_v34  ;;  %v7354_v33 = vpop.f32.mrb[30].mxu0  ;;  %v3326_v1 = vpack.c.bf16 %v7342_v46, %v7324_v55  ;;  %5551 = vrcp.f32 %v2905_v14 }
 0xa62   :  { %7946 = vst [vmem:[#allocation67_spill] sm:$0xff] %v7354_v33  ;;  %v7356_v36 = vpop.f32.mrb[30].mxu1  ;;  %v7360_v44 = vpop.eup %5529  ;;  %v2858_v12 = vadd.f32 1e-16, %v7354_v33  ;;  %5553 = vrcp.f32 %v2855_v4  ;;  %v3334_v4 = vpack.c.bf16 %v7350_v50, %v7330_v47 }
 0xa63   :  { %7947 = vst [vmem:[#allocation68_spill] sm:$0xff] %v7356_v36  ;;  %v7363_v45 = vpop.f32.mrb[31].mxu0  ;;  %v7365_v35 = vpop.f32.mrb[31].mxu1  ;;  %v2906_v57 = vadd.f32 1e-16, %v7356_v36  ;;  %v3325_v40 = vpack.c.bf16 %v7360_v44, %v7333_v24  ;;  %5555 = vrcp.f32 %v2903_v17 }
 0xa64   :  { %7948 = vst [vmem:[#allocation69_spill] sm:$0xff] %v7363_v45  ;;  %7949 = vst [vmem:[#allocation70_spill] sm:$0xff] %v7365_v35  ;;  %v7367_v39 = vpop.eup %5531  ;;  %v2856_v29 = vadd.f32 1e-16, %v7363_v45  ;;  %v2904_v10 = vadd.f32 1e-16, %v7365_v35  ;;  %5557 = vrcp.f32 %v2858_v12 }
 0xa65   :  { %v5534_v34 = vpop.eup %5533  ;;  %v3333_v21 = vpack.c.bf16 %v7367_v39, %v7336_v59  ;;  %5559 = vrcp.f32 %v2906_v57 }
 0xa66   :  { %v7375_v0 = vpop.eup %5535  ;;  %5561 = vrcp.f32 %v2856_v29 }
 0xa67   :  { %v5538_v28 = vpop.eup %5537  ;;  %3415 = vrot.lane.b32.xlu1 %v3333_v21, %s5888_s3  ;;  %5563 = vrcp.f32 %v2904_v10  ;;  %v5454_v10 = vld [vmem:[#allocation9] sm:$0xff]  }
 0xa68   :  { %v7379_v14 = vpop.eup %5539  ;;  %5072 = vmatprep.mubr.bf16.mxu1 %v5454_v10 }
 0xa69   :  { %v5542_v36 = vpop.eup %5541 }
 0xa6a   :  { %v7383_v5 = vpop.eup %5543  ;;  %v3328_v31 = vpack.c.bf16 %v5542_v36, %v5534_v34 }
 0xa6b   :  { %v5546_v19 = vpop.eup %5545  ;;  %3417 = vrot.lane.b32.xlu1 %v3334_v4, %s5888_s3  ;;  %v3336_v12 = vpack.c.bf16 %v7383_v5, %v7375_v0 }
 0xa6c   :  { %v5548_v17 = vpop.eup %5547  ;;  %v3327_v21 = vpack.c.bf16 %v5546_v19, %v5538_v28 }
 0xa6d   :  { %v5550_v35 = vpop.eup %5549  ;;  %v3335_v57 = vpack.c.bf16 %v5548_v17, %v7379_v14 }
 0xa6e   :  { %v5552_v15 = vpop.eup %5551 }
 0xa6f   :  { %v5554_v29 = vpop.eup %5553  ;;  %3421 = vrot.lane.b32.xlu1 %v3336_v12, %s5888_s3  ;;  %3419 = vrot.lane.b32.xlu0 %v3335_v57, %s5888_s3  ;;  %v7950_v12 = vpack.c.bf16 %v7292_v18, %v7278_v2 }
 0xa70   :  { %v5556_v22 = vpop.eup %5555 }
 0xa71   :  { %v5558_v58 = vpop.eup %5557 }
 0xa72   :  { %v5560_v4 = vpop.eup %5559  ;;  %v3330_v37 = vpack.c.bf16 %v5558_v58, %v5550_v35 }
 0xa73   :  { %v5562_v33 = vpop.eup %5561  ;;  %v3338_v60 = vpack.c.bf16 %v5560_v4, %v5552_v15 }
 0xa74   :  { %v5564_v45 = vpop.eup %5563  ;;  %v3329_v27 = vpack.c.bf16 %v5562_v33, %v5554_v29 }
 0xa75   :  { %3425 = vrot.lane.b32.xlu1 %v3338_v60, %s5888_s3  ;;  %v3337_v26 = vpack.c.bf16 %v5564_v45, %v5556_v22 }
 0xa77   :  { %3423 = vrot.lane.b32.xlu0 %v3337_v26, %s5888_s3 }
 0xa79   :  { %3542 = vrot.lane.b32.xlu1 %v7950_v12, %s5888_s3  ;;  %v5565_v12 = vld [vmem:[#allocation2 + $0x8] sm:$0xff] }
 0xa7b   :  { %3540 = vrot.lane.b32.xlu0 %v7951_v32, %s5888_s3 }
 0xa7d   :  { %3546 = vrot.lane.b32.xlu1 %v3326_v1, %s5888_s3  ;;  %v7952_v1 = vld [vmem:[#allocation32_spill] sm:$0xff] }
 0xa7f   :  { %3544 = vrot.lane.b32.xlu0 %v3325_v40, %s5888_s3 }
 0xa81   :  { %3550 = vrot.lane.b32.xlu1 %v3328_v31, %s5888_s3  ;;  %v5459_v31 = vld [vmem:[#allocation12 + $0x18] sm:$0xff]  }
 0xa83   :  { %3548 = vrot.lane.b32.xlu0 %v3327_v21, %s5888_s3 }
 0xa85   :  { %3554 = vrot.lane.b32.xlu1 %v3330_v37, %s5888_s3  ;;  %v5458_v37 = vld [vmem:[#allocation9 + $0x10] sm:$0xff]  }
 0xa87   :  { %3552 = vrot.lane.b32.xlu0 %v3329_v27, %s5888_s3 }
 0xa89   :  { %2946 = vperm.xlu1 %5426, %v7310_v62   ;;  %v5467_v62 = vld [vmem:[#allocation12 + $0x38] sm:$0xff]  }
 0xa8b   :  { %2941 = vperm.xlu0 %5425, %v7284_v52  }
 0xa8d   :  { %2951 = vperm.xlu1 %5426, %v7278_v2   ;;  %v5461_v2 = vld [vmem:[#allocation12 + $0x20] sm:$0xff]  }
 0xa8f   :  { %2956 = vperm.xlu0 %5425, %v7292_v18  }
 0xa91   :  { %2961 = vperm.xlu1 %5426, %v7333_v24  }
 0xa93   :  { %2966 = vperm.xlu0 %5425, %v7360_v44  }
 0xa95   :  { %2971 = vperm.xlu1 %5426, %v7324_v55   ;;  %v5456_v55 = vld [vmem:[#allocation9 + $0x8] sm:$0xff]  }
 0xa97   :  { %2976 = vperm.xlu0 %5425, %v7342_v46  }
 0xa99   :  { %2981 = vperm.xlu1 %5426, %v5538_v28   ;;  %v5465_v28 = vld [vmem:[#allocation12 + $0x30] sm:$0xff]  }
 0xa9b   :  { %2986 = vperm.xlu0 %5425, %v5546_v19  }
 0xa9d   :  { %2991 = vperm.xlu1 %5426, %v5534_v34  }
 0xa9f   :  { %2996 = vperm.xlu0 %5425, %v5542_v36  }
 0xaa1   :  { %3001 = vperm.xlu1 %5426, %v5554_v29  }
 0xaa3   :  { %3006 = vperm.xlu0 %5425, %v5562_v33  }
 0xaa5   :  { %3011 = vperm.xlu1 %5426, %v5550_v35  }
 0xaa7   :  { %3016 = vperm.xlu0 %5425, %v5558_v58  }
 0xaa9   :  { %3053 = vperm.xlu1 %5426, %v7286_v63   ;;  %v5463_v63 = vld [vmem:[#allocation12 + $0x28] sm:$0xff]  }
 0xaab   :  { %3058 = vperm.xlu0 %5425, %v7319_v11   ;;  %v5468_v11 = vld [vmem:[#allocation9 + $0x38] sm:$0xff]  }
 0xaad   :  { %3063 = vperm.xlu1 %5426, %v7281_v8   ;;  %v5462_v8 = vld [vmem:[#allocation9 + $0x20] sm:$0xff]  }
 0xaaf   :  { %3068 = vperm.xlu0 %5425, %v7300_v3   ;;  %v5466_v3 = vld [vmem:[#allocation9 + $0x30] sm:$0xff]  }
 0xab1   :  { %3073 = vperm.xlu1 %5426, %v7336_v59  }
 0xab3   :  { %3078 = vperm.xlu0 %5425, %v7367_v39  }
 0xab5   :  { %3083 = vperm.xlu1 %5426, %v7330_v47   ;;  %v5455_v47 = vld [vmem:[#allocation12 + $0x8] sm:$0xff]  }
 0xab7   :  { %3088 = vperm.xlu0 %5425, %v7350_v50  }
 0xab9   :  { %3093 = vperm.xlu1 %5426, %v7379_v14  }
 0xabb   :  { %3098 = vperm.xlu0 %5425, %v5548_v17  }
 0xabd   :  { %3103 = vperm.xlu1 %5426, %v7375_v0   ;;  %v5464_v0 = vld [vmem:[#allocation9 + $0x28] sm:$0xff]  }
 0xabf   :  { %3108 = vperm.xlu0 %5425, %v7383_v5  }
 0xac1   :  { %3113 = vperm.xlu1 %5426, %v5556_v22   ;;  %v5457_v22 = vld [vmem:[#allocation12 + $0x10] sm:$0xff]  }
 0xac3   :  { %3118 = vperm.xlu0 %5425, %v5564_v45  }
 0xac5   :  { %3123 = vperm.xlu1 %5426, %v5552_v15   ;;  %v5460_v15 = vld [vmem:[#allocation9 + $0x18] sm:$0xff]  }
 0xac7   :  { %3128 = vperm.xlu0 %5425, %v5560_v4  }
 0xacd   :  { %v3414_v44 = vpop.permute.xlu1 %3413 }
 0xad0   :  { %v3412_v35 = vpop.permute.xlu0 %3411 }
 0xad1   :  { %4992 = vmatprep.subr.bf16.mxu0 %v3412_v35  ;;  %5056 = vmatprep.subr.bf16.mxu1 %v3412_v35 }
 0xad2   :  { %4993 = vmatpush3.bf16.msra.mxu0 %v3412_v35  ;;  %5057 = vmatpush3.bf16.msra.mxu1 %v3412_v35 }
 0xad3   :  { %4994 = vmatprep.subr.bf16.mxu0 %v3414_v44  ;;  %5058 = vmatprep.subr.bf16.mxu1 %v3414_v44 }
 0xad6   :  { %4995 = vmatpush3.bf16.msra.mxu0 %v3414_v44  ;;  %5059 = vmatpush3.bf16.msra.mxu1 %v3414_v44 }
 0xad9   :  { %v3416_v33 = vpop.permute.xlu1 %3415 }
 0xada   :  { %4996 = vmatprep.subr.bf16.mxu0 %v3416_v33  ;;  %5060 = vmatprep.subr.bf16.mxu1 %v3416_v33 }
 0xadb   :  { %4997 = vmatpush3.bf16.msra.mxu0 %v3416_v33  ;;  %5061 = vmatpush3.bf16.msra.mxu1 %v3416_v33 }
 0xadd   :  { %v3418_v36 = vpop.permute.xlu1 %3417 }
 0xade   :  { %4998 = vmatprep.subr.bf16.mxu0 %v3418_v36  ;;  %5062 = vmatprep.subr.bf16.mxu1 %v3418_v36 }
 0xadf   :  { %4999 = vmatpush3.bf16.msra.mxu0 %v3418_v36  ;;  %5063 = vmatpush3.bf16.msra.mxu1 %v3418_v36 }
 0xae1   :  { %v3420_v45 = vpop.permute.xlu0 %3419  ;;  %v3422_v27 = vpop.permute.xlu1 %3421 }
 0xae2   :  { %5000 = vmatprep.subr.bf16.mxu0 %v3420_v45  ;;  %5064 = vmatprep.subr.bf16.mxu1 %v3420_v45 }
 0xae3   :  { %5001 = vmatpush3.bf16.msra.mxu0 %v3420_v45  ;;  %5065 = vmatpush3.bf16.msra.mxu1 %v3420_v45 }
 0xae4   :  { %5002 = vmatprep.subr.bf16.mxu0 %v3422_v27  ;;  %5066 = vmatprep.subr.bf16.mxu1 %v3422_v27 }
 0xae7   :  { %5003 = vmatpush3.bf16.msra.mxu0 %v3422_v27  ;;  %5067 = vmatpush3.bf16.msra.mxu1 %v3422_v27  ;;  %v3426_v34 = vpop.permute.xlu1 %3425 }
 0xae9   :  { %v3424_v46 = vpop.permute.xlu0 %3423 }
 0xaea   :  { %5004 = vmatprep.subr.bf16.mxu0 %v3424_v46  ;;  %5068 = vmatprep.subr.bf16.mxu1 %v3424_v46 }
 0xaeb   :  { %5005 = vmatpush3.bf16.msra.mxu0 %v3424_v46  ;;  %5069 = vmatpush3.bf16.msra.mxu1 %v3424_v46  ;;  %v3543_v58 = vpop.permute.xlu1 %3542 }
 0xaec   :  { %5006 = vmatprep.subr.bf16.mxu0 %v3426_v34  ;;  %5070 = vmatprep.subr.bf16.mxu1 %v3426_v34 }
 0xaed   :  { %v3541_v24 = vpop.permute.xlu0 %3540 }
 0xaef   :  { %5007 = vmatpush3.bf16.msra.mxu0 %v3426_v34  ;;  %5071 = vmatpush3.bf16.msra.mxu1 %v3426_v34  ;;  %v3547_v19 = vpop.permute.xlu1 %3546 }
 0xaf0   :  { %5024 = vmatprep.subr.bf16.mxu0 %v3541_v24  ;;  %5088 = vmatprep.subr.bf16.mxu1 %v3541_v24 }
 0xaf1   :  { %v3545_v5 = vpop.permute.xlu0 %3544 }
 0xaf2   :  { %5009 = vmatmul.mubr.bf16.vlgmr.msra.gmra.mrb[32].mxu0 %v5455_v47  ;;  %5073 = vmatmul.mubr.bf16.vlgmr.msra.gmra.mrb[32].mxu1 %v5456_v55 }
 0xaf3   :  { %5025 = vmatpush3.bf16.msra.mxu0 %v3541_v24  ;;  %5089 = vmatpush3.bf16.msra.mxu1 %v3541_v24  ;;  %v3551_v52 = vpop.permute.xlu1 %3550 }
 0xaf4   :  { %5026 = vmatprep.subr.bf16.mxu0 %v3543_v58  ;;  %5090 = vmatprep.subr.bf16.mxu1 %v3543_v58 }
 0xaf5   :  { %5012 = vmatprep.mubr.bf16.mxu0 %v5457_v22  ;;  %5076 = vmatprep.mubr.bf16.mxu1 %v5458_v37  ;;  %v3549_v18 = vpop.permute.xlu0 %3548 }
 0xaf7   :  { %5027 = vmatpush3.bf16.msra.mxu0 %v3543_v58  ;;  %5091 = vmatpush3.bf16.msra.mxu1 %v3543_v58  ;;  %v3555_v26 = vpop.permute.xlu1 %3554 }
 0xaf8   :  { %5028 = vmatprep.subr.bf16.mxu0 %v3545_v5  ;;  %5092 = vmatprep.subr.bf16.mxu1 %v3545_v5 }
 0xaf9   :  { %v3553_v59 = vpop.permute.xlu0 %3552 }
 0xafa   :  { %5013 = vmatmul.mubr.bf16.gmra.mrb[36].mxu0 %v5459_v31  ;;  %5077 = vmatmul.mubr.bf16.gmra.mrb[36].mxu1 %v5460_v15  ;;  %v5569_v15 = vld [vmem:[#allocation2 + $0x20] sm:$0xff] }
 0xafb   :  { %5029 = vmatpush3.bf16.msra.mxu0 %v3545_v5  ;;  %5093 = vmatpush3.bf16.msra.mxu1 %v3545_v5 }
 0xafc   :  { %5030 = vmatprep.subr.bf16.mxu0 %v3547_v19  ;;  %5094 = vmatprep.subr.bf16.mxu1 %v3547_v19 }
 0xafd   :  { %5016 = vmatprep.mubr.bf16.mxu0 %v5461_v2  ;;  %5080 = vmatprep.mubr.bf16.mxu1 %v5462_v8 }
 0xaff   :  { %5031 = vmatpush3.bf16.msra.mxu0 %v3547_v19  ;;  %5095 = vmatpush3.bf16.msra.mxu1 %v3547_v19 }
 0xb00   :  { %5032 = vmatprep.subr.bf16.mxu0 %v3549_v18  ;;  %5096 = vmatprep.subr.bf16.mxu1 %v3549_v18 }
 0xb02   :  { %5017 = vmatmul.mubr.bf16.gmra.mrb[40].mxu0 %v5463_v63  ;;  %5081 = vmatmul.mubr.bf16.gmra.mrb[40].mxu1 %v5464_v0 }
 0xb03   :  { %5033 = vmatpush3.bf16.msra.mxu0 %v3549_v18  ;;  %5097 = vmatpush3.bf16.msra.mxu1 %v3549_v18 }
 0xb04   :  { %5034 = vmatprep.subr.bf16.mxu0 %v3551_v52  ;;  %5098 = vmatprep.subr.bf16.mxu1 %v3551_v52 }
 0xb05   :  { %5020 = vmatprep.mubr.bf16.mxu0 %v5465_v28  ;;  %5084 = vmatprep.mubr.bf16.mxu1 %v5466_v3 }
 0xb07   :  { %5035 = vmatpush3.bf16.msra.mxu0 %v3551_v52  ;;  %5099 = vmatpush3.bf16.msra.mxu1 %v3551_v52 }
 0xb08   :  { %5036 = vmatprep.subr.bf16.mxu0 %v3553_v59  ;;  %5100 = vmatprep.subr.bf16.mxu1 %v3553_v59  ;;  %v2947_v60 = vpop.permute.xlu1 %2946 }
 0xb09   :  { %v3020_v40 = vmul.f32 %v2947_v60, %v7249_v61  ;;  %v5571_v60 = vld [vmem:[#allocation2 + $0x30] sm:$0xff] }
 0xb0a   :  { %5021 = vmatmul.mubr.bf16.gmra.mrb[44].mxu0 %v5467_v62  ;;  %5085 = vmatmul.mubr.bf16.gmra.mrb[44].mxu1 %v5468_v11  ;;  %v2942_v50 = vpop.permute.xlu0 %2941 }
 0xb0b   :  { %v3036_v39 = vmul.f32 %v7952_v1, %v3020_v40  ;;  %v3019_v14 = vmul.f32 %v2942_v50, %v7238_v54  ;;  %5037 = vmatpush3.bf16.msra.mxu0 %v3553_v59  ;;  %5101 = vmatpush3.bf16.msra.mxu1 %v3553_v59  ;;  %v7953_v59 = vld [vmem:[#allocation118_spill] sm:$0xff] }
 0xb0c   :  { %5038 = vmatprep.subr.bf16.mxu0 %v3555_v26  ;;  %5102 = vmatprep.subr.bf16.mxu1 %v3555_v26  ;;  %v2952_v17 = vpop.permute.xlu1 %2951 }
 0xb0d   :  { %vm3164_vm8 = vcmp.ge.f32.partialorder %v3036_v39, 0.0  ;;  %v3180_v21 = vmul.f32 0.01, %v3036_v39  ;;  %v3035_v57 = vmul.f32 %v7952_v1, %v3019_v14  ;;  %v3021_v29 = vmul.f32 %v7232_v49, %v2952_v17  ;;  %5040 = vmatprep.mubr.bf16.mxu0 %v7883_v53  ;;  %5104 = vmatprep.mubr.bf16.mxu1 %v7882_v42  ;;  %v5566_v42 = vld [vmem:[#allocation2] sm:$0xff] }
 0xb0e   :  { %v2957_v61 = vpop.permute.xlu0 %2956 }
 0xb0f   :  { %v3196_v10 = vsel %vm3164_vm8, %v3036_v39, %v3180_v21  ;;  %vm3163_vm9 = vcmp.ge.f32.partialorder %v3035_v57, 0.0  ;;  %v3179_v4 = vmul.f32 0.01, %v3035_v57  ;;  %v3037_v54 = vmul.f32 %v7952_v1, %v3021_v29  ;;  %5039 = vmatpush3.bf16.msra.mxu0 %v3555_v26  ;;  %5103 = vmatpush3.bf16.msra.mxu1 %v3555_v26 }
 0xb10   :  { %v3212_v32 = vadd.f32 %v5565_v12, %v3196_v10  ;;  %v3022_v35 = vmul.f32 %v7244_v25, %v2957_v61  ;;  %v2962_v44 = vpop.permute.xlu1 %2961  ;;  %v7954_v10 = vld [vmem:[#allocation60_spill] sm:$0xff] }
 0xb11   :  { %v3195_v33 = vsel %vm3163_vm9, %v3035_v57, %v3179_v4  ;;  %vm3165_vm10 = vcmp.ge.f32.partialorder %v3037_v54, 0.0  ;;  %v3181_v49 = vmul.f32 0.01, %v3037_v54  ;;  %v3023_v53 = vmul.f32 %v2962_v44, %v7262_v13  ;;  %v5567_v13 = vld [vmem:[#allocation2 + $0x10] sm:$0xff]  ;;  %v5573_v57 = vld [vmem:[#allocation2 + $0x40] sm:$0xff] }
 0xb12   :  { %3228 = vst [vmem:[#allocation20 + $0x8] sm:$0xff] %v3212_v32  ;;  %v3211_v36 = vadd.f32 %v5566_v42, %v3195_v33  ;;  %v3038_v45 = vmul.f32 %v7952_v1, %v3022_v35  ;;  %5041 = vmatmul.mubr.bf16.vlgmr.msra.gmra.mrb[32].mxu0 %v6441_v7  ;;  %5105 = vmatmul.mubr.bf16.vlgmr.msra.gmra.mrb[32].mxu1 %v6437_v38  ;;  %v2967_v27 = vpop.permute.xlu0 %2966  ;;  %v7955_v32 = vld [vmem:[#allocation65_spill] sm:$0xff]  ;;  %v7957_v42 = vld [vmem:[#allocation119_spill] sm:$0xff] }
 0xb13   :  { %v3197_v46 = vsel %vm3165_vm10, %v3037_v54, %v3181_v49  ;;  %v3039_v34 = vmul.f32 %v7952_v1, %v3023_v53  ;;  %v3024_v25 = vmul.f32 %v2967_v27, %v7273_v16  ;;  %5044 = vmatprep.mubr.bf16.mxu0 %v6449_v51  ;;  %5108 = vmatprep.mubr.bf16.mxu1 %v6445_v43  ;;  %v5568_v16 = vld [vmem:[#allocation2 + $0x18] sm:$0xff] }
 0xb14   :  { %3227 = vst [vmem:[#allocation20] sm:$0xff] %v3211_v36  ;;  %v3213_v47 = vadd.f32 %v5567_v13, %v3197_v46  ;;  %vm3166_vm11 = vcmp.ge.f32.partialorder %v3038_v45, 0.0  ;;  %v3182_v55 = vmul.f32 0.01, %v3038_v45  ;;  %v2972_v24 = vpop.permute.xlu1 %2971  ;;  %v7956_v53 = vld [vmem:[#allocation120_spill] sm:$0xff]  ;;  %v7958_v27 = vld [vmem:[#allocation69_spill] sm:$0xff] }
 0xb15   :  { %vm3167_vm12 = vcmp.ge.f32.partialorder %v3039_v34, 0.0  ;;  %v3183_v7 = vmul.f32 0.01, %v3039_v34  ;;  %v3040_v38 = vmul.f32 %v7952_v1, %v3024_v25  ;;  %v3025_v22 = vmul.f32 %v7256_v56, %v2972_v24  ;;  %v5570_v56 = vld [vmem:[#allocation2 + $0x28] sm:$0xff]  ;;  %v7960_v25 = vld [vmem:[#allocation121_spill] sm:$0xff]  ;;  %v5575_v24 = vld [vmem:[#allocation2 + $0x50] sm:$0xff] }
 0xb16   :  { %3229 = vst [vmem:[#allocation20 + $0x10] sm:$0xff] %v3213_v47  ;;  %v3198_v37 = vsel %vm3166_vm11, %v3038_v45, %v3182_v55  ;;  %v2977_v58 = vpop.permute.xlu0 %2976 }
 0xb17   :  { %v3214_v31 = vadd.f32 %v5568_v16, %v3198_v37  ;;  %v3199_v51 = vsel %vm3167_vm12, %v3039_v34, %v3183_v7  ;;  %vm3168_vm13 = vcmp.ge.f32.partialorder %v3040_v38, 0.0  ;;  %v3184_v43 = vmul.f32 0.01, %v3040_v38  ;;  %v7959_v34 = vld [vmem:[#allocation122_spill] sm:$0xff] }
 0xb18   :  { %v3215_v5 = vadd.f32 %v5569_v15, %v3199_v51  ;;  %v3041_v19 = vmul.f32 %v7952_v1, %v3025_v22  ;;  %v3026_v2 = vmul.f32 %v7268_v41, %v2977_v58  ;;  %v2982_v8 = vpop.permute.xlu1 %2981  ;;  %v7961_v58 = vld [vmem:[#allocation63_spill] sm:$0xff]  ;;  %v5576_v51 = vld [vmem:[#allocation2 + $0x58] sm:$0xff] }
 0xb19   :  { %3230 = vst [vmem:[#allocation20 + $0x18] sm:$0xff] %v3214_v31  ;;  %v3200_v52 = vsel %vm3168_vm13, %v3040_v38, %v3184_v43  ;;  %v3027_v63 = vmul.f32 %v2982_v8, %v7296_v30 }
 0xb1a   :  { %3231 = vst [vmem:[#allocation20 + $0x20] sm:$0xff] %v3215_v5  ;;  %v3216_v0 = vadd.f32 %v5570_v56, %v3200_v52  ;;  %vm3169_vm14 = vcmp.ge.f32.partialorder %v3041_v19, 0.0  ;;  %v3185_v18 = vmul.f32 0.01, %v3041_v19  ;;  %v3042_v28 = vmul.f32 %v7952_v1, %v3026_v2  ;;  %5045 = vmatmul.mubr.bf16.gmra.mrb[36].mxu0 %v6461_v23  ;;  %5109 = vmatmul.mubr.bf16.gmra.mrb[36].mxu1 %v6457_v6  ;;  %v2987_v3 = vpop.permute.xlu0 %2986  ;;  %v7962_v52 = vld [vmem:[#allocation67_spill] sm:$0xff] }
 0xb1b   :  { %v3043_v26 = vmul.f32 %v7952_v1, %v3027_v63  ;;  %v3028_v41 = vmul.f32 %v2987_v3, %v7315_v20  ;;  %5048 = vmatprep.mubr.bf16.mxu0 %v6469_v9  ;;  %5112 = vmatprep.mubr.bf16.mxu1 %v7953_v59  ;;  %v5572_v20 = vld [vmem:[#allocation2 + $0x38] sm:$0xff]  ;;  %v5578_v3 = vld [vmem:[#allocation2 + $0x68] sm:$0xff] }
 0xb1c   :  { %3232 = vst [vmem:[#allocation20 + $0x28] sm:$0xff] %v3216_v0  ;;  %v3201_v30 = vsel %vm3169_vm14, %v3041_v19, %v3185_v18  ;;  %vm3170_vm15 = vcmp.ge.f32.partialorder %v3042_v28, 0.0  ;;  %v3186_v62 = vmul.f32 0.01, %v3042_v28  ;;  %v2992_v11 = vpop.permute.xlu1 %2991  ;;  %v5577_v19 = vld [vmem:[#allocation2 + $0x60] sm:$0xff]  ;;  %v7963_v18 = vld [vmem:[#allocation51_spill] sm:$0xff] }
 0xb1d   :  { %v3217_v40 = vadd.f32 %v5571_v60, %v3201_v30  ;;  %vm3171_vm0 = vcmp.ge.f32.partialorder %v3043_v26, 0.0  ;;  %v3187_v23 = vmul.f32 0.01, %v3043_v26  ;;  %v3044_v6 = vmul.f32 %v7952_v1, %v3028_v41  ;;  %v7964_v30 = vld [vmem:[#allocation124_spill] sm:$0xff] }
 0xb1e   :  { %v3202_v50 = vsel %vm3170_vm15, %v3042_v28, %v3186_v62  ;;  %v3029_v39 = vmul.f32 %v7288_v48, %v2992_v11  ;;  %v2997_v14 = vpop.permute.xlu0 %2996  ;;  %v5574_v48 = vld [vmem:[#allocation2 + $0x48] sm:$0xff] }
 0xb1f   :  { %3233 = vst [vmem:[#allocation20 + $0x30] sm:$0xff] %v3217_v40  ;;  %v3218_v9 = vadd.f32 %v5572_v20, %v3202_v50  ;;  %v3203_v17 = vsel %vm3171_vm0, %v3043_v26, %v3187_v23  ;;  %vm3172_vm1 = vcmp.ge.f32.partialorder %v3044_v6, 0.0  ;;  %v3188_v21 = vmul.f32 0.01, %v3044_v6  ;;  %v7965_v62 = vld [vmem:[#allocation123_spill] sm:$0xff]  ;;  %v7966_v40 = vld [vmem:[#allocation53_spill] sm:$0xff] }
 0xb20   :  { %v3219_v29 = vadd.f32 %v5573_v57, %v3203_v17  ;;  %v3045_v61 = vmul.f32 %v7952_v1, %v3029_v39  ;;  %v3030_v4 = vmul.f32 %v7954_v10, %v2997_v14  ;;  %v3002_v54 = vpop.permute.xlu1 %3001  ;;  %v5579_v14 = vld [vmem:[#allocation2 + $0x70] sm:$0xff] }
 0xb21   :  { %3234 = vst [vmem:[#allocation20 + $0x38] sm:$0xff] %v3218_v9  ;;  %v3204_v12 = vsel %vm3172_vm1, %v3044_v6, %v3188_v21  ;;  %v3031_v35 = vmul.f32 %v3002_v54, %v7955_v32  ;;  %v1741_v9 = vld [vmem:[#allocation2 + $0x80] sm:$0xff]  ;;  %v1742_v32 = vld [vmem:[#allocation2 + $0x88] sm:$0xff] }
 0xb22   :  { %3235 = vst [vmem:[#allocation20 + $0x40] sm:$0xff] %v3219_v29  ;;  %v3220_v44 = vadd.f32 %v5574_v48, %v3204_v12  ;;  %vm3173_vm2 = vcmp.ge.f32.partialorder %v3045_v61, 0.0  ;;  %v3189_v33 = vmul.f32 0.01, %v3045_v61  ;;  %v3046_v49 = vmul.f32 %v7952_v1, %v3030_v4  ;;  %5049 = vmatmul.mubr.bf16.gmra.mrb[40].mxu0 %v7956_v53  ;;  %5113 = vmatmul.mubr.bf16.gmra.mrb[40].mxu1 %v7957_v42  ;;  %v3007_v36 = vpop.permute.xlu0 %3006  ;;  %v7967_v29 = vld [vmem:[#allocation50_spill] sm:$0xff]  ;;  %v5580_v4 = vld [vmem:[#allocation2 + $0x78] sm:$0xff] }
 0xb23   :  { %v3047_v45 = vmul.f32 %v7952_v1, %v3031_v35  ;;  %v3032_v46 = vmul.f32 %v3007_v36, %v7958_v27  ;;  %5052 = vmatprep.mubr.bf16.mxu0 %v7959_v34  ;;  %5116 = vmatprep.mubr.bf16.mxu1 %v7960_v25  ;;  %v7969_v36 = vld [vmem:[#allocation55_spill] sm:$0xff] }
 0xb24   :  { %3236 = vst [vmem:[#allocation20 + $0x48] sm:$0xff] %v3220_v44  ;;  %v3205_v13 = vsel %vm3173_vm2, %v3045_v61, %v3189_v33  ;;  %vm3174_vm3 = vcmp.ge.f32.partialorder %v3046_v49, 0.0  ;;  %v3190_v47 = vmul.f32 0.01, %v3046_v49  ;;  %v3012_v55 = vpop.permute.xlu1 %3011  ;;  %v7968_v33 = vld [vmem:[#allocation52_spill] sm:$0xff] }
 0xb25   :  { %v3221_v7 = vadd.f32 %v5575_v24, %v3205_v13  ;;  %vm3175_vm4 = vcmp.ge.f32.partialorder %v3047_v45, 0.0  ;;  %v3191_v38 = vmul.f32 0.01, %v3047_v45  ;;  %v3048_v22 = vmul.f32 %v7952_v1, %v3032_v46  ;;  %v1743_v46 = vld [vmem:[#allocation2 + $0x90] sm:$0xff] }
 0xb26   :  { %v3206_v37 = vsel %vm3174_vm3, %v3046_v49, %v3190_v47  ;;  %v3033_v16 = vmul.f32 %v7961_v58, %v3012_v55  ;;  %v3017_v31 = vpop.permute.xlu0 %3016  ;;  %v7970_v55 = vld [vmem:[#allocation57_spill] sm:$0xff] }
 0xb27   :  { %3237 = vst [vmem:[#allocation20 + $0x50] sm:$0xff] %v3221_v7  ;;  %v3222_v43 = vadd.f32 %v5576_v51, %v3206_v37  ;;  %v3207_v15 = vsel %vm3175_vm4, %v3047_v45, %v3191_v38  ;;  %vm3176_vm5 = vcmp.ge.f32.partialorder %v3048_v22, 0.0  ;;  %v3192_v5 = vmul.f32 0.01, %v3048_v22  ;;  %v1744_v38 = vld [vmem:[#allocation2 + $0x98] sm:$0xff] }
 0xb28   :  { %v3223_v2 = vadd.f32 %v5577_v19, %v3207_v15  ;;  %v3049_v8 = vmul.f32 %v7952_v1, %v3033_v16  ;;  %v3034_v63 = vmul.f32 %v7962_v52, %v3017_v31  ;;  %v3054_v56 = vpop.permute.xlu1 %3053  ;;  %v1745_v16 = vld [vmem:[#allocation2 + $0xa0] sm:$0xff]  ;;  %v1746_v52 = vld [vmem:[#allocation2 + $0xa8] sm:$0xff] }
 0xb29   :  { %3238 = vst [vmem:[#allocation20 + $0x58] sm:$0xff] %v3222_v43  ;;  %v3208_v0 = vsel %vm3176_vm5, %v3048_v22, %v3192_v5  ;;  %v3131_v28 = vmul.f32 %v3054_v56, %v7963_v18  ;;  %v7971_v15 = vld [vmem:[#allocation54_spill] sm:$0xff]  ;;  %v7972_v18 = vld [vmem:[#allocation56_spill] sm:$0xff] }
 0xb2a   :  { %3239 = vst [vmem:[#allocation20 + $0x60] sm:$0xff] %v3223_v2  ;;  %v3224_v26 = vadd.f32 %v5578_v3, %v3208_v0  ;;  %vm3177_vm6 = vcmp.ge.f32.partialorder %v3049_v8, 0.0  ;;  %v3193_v41 = vmul.f32 0.01, %v3049_v8  ;;  %v3050_v59 = vmul.f32 %v7952_v1, %v3034_v63  ;;  %5053 = vmatmul.mubr.bf16.gmra.mrb[44].mxu0 %v7964_v30  ;;  %5117 = vmatmul.mubr.bf16.gmra.mrb[44].mxu1 %v7965_v62  ;;  %v3059_v11 = vpop.permute.xlu0 %3058  ;;  %v1747_v62 = vld [vmem:[#allocation2 + $0xb0] sm:$0xff] }
 0xb2b   :  { %v3147_v60 = vmul.f32 %v7952_v1, %v3131_v28  ;;  %v3132_v23 = vmul.f32 %v3059_v11, %v7966_v40 }
 0xb2c   :  { %3240 = vst [vmem:[#allocation20 + $0x68] sm:$0xff] %v3224_v26  ;;  %v3209_v6 = vsel %vm3177_vm6, %v3049_v8, %v3193_v41  ;;  %vm3178_vm7 = vcmp.ge.f32.partialorder %v3050_v59, 0.0  ;;  %v3194_v50 = vmul.f32 0.01, %v3050_v59  ;;  %v3064_v39 = vpop.permute.xlu1 %3063  ;;  %v7973_v41 = vld [vmem:[#allocation59_spill] sm:$0xff] }
 0xb2d   :  { %v3225_v20 = vadd.f32 %v5579_v14, %v3209_v6  ;;  %vm3243_vm8 = vcmp.ge.f32.partialorder %v3147_v60, 0.0  ;;  %v3259_v17 = vmul.f32 0.01, %v3147_v60  ;;  %v3148_v21 = vmul.f32 %v7952_v1, %v3132_v23  ;;  %v7974_v6 = vld [vmem:[#allocation62_spill] sm:$0xff]  ;;  %v1748_v14 = vld [vmem:[#allocation2 + $0xb8] sm:$0xff] }
 0xb2e   :  { %v3210_v57 = vsel %vm3178_vm7, %v3050_v59, %v3194_v50  ;;  %v3133_v61 = vmul.f32 %v7967_v29, %v3064_v39  ;;  %v3069_v10 = vpop.permute.xlu0 %3068 }
 0xb2f   :  { %3241 = vst [vmem:[#allocation20 + $0x70] sm:$0xff] %v3225_v20  ;;  %v3226_v54 = vadd.f32 %v5580_v4, %v3210_v57  ;;  %v3275_v12 = vsel %vm3243_vm8, %v3147_v60, %v3259_v17  ;;  %vm3244_vm9 = vcmp.ge.f32.partialorder %v3148_v21, 0.0  ;;  %v3260_v35 = vmul.f32 0.01, %v3148_v21 }
 0xb30   :  { %v3291_v48 = vadd.f32 %v3275_v12, %v1741_v9  ;;  %v3149_v44 = vmul.f32 %v7952_v1, %v3133_v61  ;;  %v3134_v49 = vmul.f32 %v7968_v33, %v3069_v10  ;;  %v3074_v53 = vpop.permute.xlu1 %3073  ;;  %v7975_v10 = vld [vmem:[#allocation58_spill] sm:$0xff] }
 0xb31   :  { %3242 = vst [vmem:[#allocation20 + $0x78] sm:$0xff] %v3226_v54  ;;  %v3276_v42 = vsel %vm3244_vm9, %v3148_v21, %v3260_v35  ;;  %v3135_v45 = vmul.f32 %v3074_v53, %v7969_v36  ;;  %v1749_v21 = vld [vmem:[#allocation2 + $0xc0] sm:$0xff]  ;;  %v1750_v35 = vld [vmem:[#allocation2 + $0xc8] sm:$0xff] }
 0xb32   :  { %3307 = vst [vmem:[#allocation20 + $0x80] sm:$0xff] %v3291_v48  ;;  %v3292_v27 = vadd.f32 %v3276_v42, %v1742_v32  ;;  %vm3245_vm10 = vcmp.ge.f32.partialorder %v3149_v44, 0.0  ;;  %v3261_v34 = vmul.f32 0.01, %v3149_v44  ;;  %v3150_v25 = vmul.f32 %v7952_v1, %v3134_v49  ;;  %v3079_v13 = vpop.permute.xlu0 %3078  ;;  %v7976_v49 = vld [vmem:[#allocation61_spill] sm:$0xff] }
 0xb33   :  { %v3151_v47 = vmul.f32 %v7952_v1, %v3135_v45  ;;  %v3136_v24 = vmul.f32 %v3079_v13, %v7970_v55  ;;  %v7977_v45 = vld [vmem:[#allocation66_spill] sm:$0xff] }
 0xb34   :  { %3308 = vst [vmem:[#allocation20 + $0x88] sm:$0xff] %v3292_v27  ;;  %v3277_v7 = vsel %vm3245_vm10, %v3149_v44, %v3261_v34  ;;  %vm3246_vm11 = vcmp.ge.f32.partialorder %v3150_v25, 0.0  ;;  %v3262_v22 = vmul.f32 0.01, %v3150_v25  ;;  %v3084_v37 = vpop.permute.xlu1 %3083  ;;  %v1751_v34 = vld [vmem:[#allocation2 + $0xd0] sm:$0xff] }
 0xb35   :  { %v3293_v58 = vadd.f32 %v3277_v7, %v1743_v46  ;;  %vm3247_vm12 = vcmp.ge.f32.partialorder %v3151_v47, 0.0  ;;  %v3263_v31 = vmul.f32 0.01, %v3151_v47  ;;  %v3152_v51 = vmul.f32 %v7952_v1, %v3136_v24  ;;  %v7978_v24 = vld [vmem:[#allocation70_spill] sm:$0xff] }
 0xb36   :  { %v3278_v43 = vsel %vm3246_vm11, %v3150_v25, %v3262_v22  ;;  %v3137_v5 = vmul.f32 %v7971_v15, %v3084_v37  ;;  %v3089_v19 = vpop.permute.xlu0 %3088  ;;  %v1752_v22 = vld [vmem:[#allocation2 + $0xd8] sm:$0xff] }
 0xb37   :  { %3309 = vst [vmem:[#allocation20 + $0x90] sm:$0xff] %v3293_v58  ;;  %v3294_v2 = vadd.f32 %v3278_v43, %v1744_v38  ;;  %v3279_v8 = vsel %vm3247_vm12, %v3151_v47, %v3263_v31  ;;  %vm3248_vm13 = vcmp.ge.f32.partialorder %v3152_v51, 0.0  ;;  %v3264_v63 = vmul.f32 0.01, %v3152_v51  ;;  %v1753_v31 = vld [vmem:[#allocation2 + $0xe0] sm:$0xff] }
 0xb38   :  { %v3295_v56 = vadd.f32 %v3279_v8, %v1745_v16  ;;  %v3153_v0 = vmul.f32 %v7952_v1, %v3137_v5  ;;  %v3138_v28 = vmul.f32 %v7972_v18, %v3089_v19  ;;  %v3094_v3 = vpop.permute.xlu1 %3093  ;;  %v7979_v5 = vld [vmem:[#allocation64_spill] sm:$0xff] }
 0xb39   :  { %3310 = vst [vmem:[#allocation20 + $0x98] sm:$0xff] %v3294_v2  ;;  %v3280_v26 = vsel %vm3248_vm13, %v3152_v51, %v3264_v63  ;;  %v3139_v59 = vmul.f32 %v3094_v3, %v7973_v41  ;;  %v1754_v63 = vld [vmem:[#allocation2 + $0xe8] sm:$0xff] }
 0xb3a   :  { %3311 = vst [vmem:[#allocation20 + $0xa0] sm:$0xff] %v3295_v56  ;;  %v3296_v30 = vadd.f32 %v3280_v26, %v1746_v52  ;;  %vm3249_vm14 = vcmp.ge.f32.partialorder %v3153_v0, 0.0  ;;  %v3265_v11 = vmul.f32 0.01, %v3153_v0  ;;  %v3154_v60 = vmul.f32 %v7952_v1, %v3138_v28  ;;  %v3099_v40 = vpop.permute.xlu0 %3098  ;;  %v7980_v28 = vld [vmem:[#allocation68_spill] sm:$0xff] }
 0xb3b   :  { %v3155_v23 = vmul.f32 %v7952_v1, %v3139_v59  ;;  %v3140_v50 = vmul.f32 %v3099_v40, %v7974_v6  ;;  %v1755_v59 = vld [vmem:[#allocation2 + $0xf0] sm:$0xff] }
 0xb3c   :  { %3312 = vst [vmem:[#allocation20 + $0xa8] sm:$0xff] %v3296_v30  ;;  %v3281_v39 = vsel %vm3249_vm14, %v3153_v0, %v3265_v11  ;;  %vm3250_vm15 = vcmp.ge.f32.partialorder %v3154_v60, 0.0  ;;  %v3266_v20 = vmul.f32 0.01, %v3154_v60  ;;  %v3104_v9 = vpop.permute.xlu1 %3103 }
 0xb3d   :  { %v3297_v17 = vadd.f32 %v3281_v39, %v1747_v62  ;;  %vm3251_vm0 = vcmp.ge.f32.partialorder %v3155_v23, 0.0  ;;  %v3267_v57 = vmul.f32 0.01, %v3155_v23  ;;  %v3156_v29 = vmul.f32 %v7952_v1, %v3140_v50 }
 0xb3e   :  { %v3282_v61 = vsel %vm3250_vm15, %v3154_v60, %v3266_v20  ;;  %v3141_v4 = vmul.f32 %v7975_v10, %v3104_v9  ;;  %v3109_v54 = vpop.permute.xlu0 %3108  ;;  %v1756_v60 = vld [vmem:[#allocation2 + $0xf8] sm:$0xff]  ;;  %v5889_v39 = vmov 0   ;;  %v7981_v9 = vld [vmem:[#allocation34_spill] sm:$0xff] }
 0xb3f   :  { %3313 = vst [vmem:[#allocation20 + $0xb0] sm:$0xff] %v3297_v17  ;;  %v3298_v12 = vadd.f32 %v3282_v61, %v1748_v14  ;;  %v3283_v32 = vsel %vm3251_vm0, %v3155_v23, %v3267_v57  ;;  %vm3252_vm1 = vcmp.ge.f32.partialorder %v3156_v29, 0.0  ;;  %v3268_v48 = vmul.f32 0.01, %v3156_v29  ;;  %5427 = vset.pattern.permute.xlu1 %v5889_v39  ;;  %5428 = vset.pattern.permute.xlu0 %v5889_v39 }
 0xb40   :  { %v3299_v44 = vadd.f32 %v3283_v32, %v1749_v21  ;;  %v3157_v33 = vmul.f32 %v7952_v1, %v3141_v4  ;;  %v3142_v53 = vmul.f32 %v7976_v49, %v3109_v54  ;;  %v3114_v42 = vpop.permute.xlu1 %3113  ;;  %v7982_v54 = vld [vmem:[#allocation35_spill] sm:$0xff]  ;;  %v7984_v49 = vld [vmem:[#allocation37_spill] sm:$0xff] }
 0xb41   :  { %3314 = vst [vmem:[#allocation20 + $0xb8] sm:$0xff] %v3298_v12  ;;  %v3284_v36 = vsel %vm3252_vm1, %v3156_v29, %v3268_v48  ;;  %v3143_v27 = vmul.f32 %v3114_v42, %v7977_v45 }
 0xb42   :  { %3315 = vst [vmem:[#allocation20 + $0xc0] sm:$0xff] %v3299_v44  ;;  %v3300_v46 = vadd.f32 %v3284_v36, %v1750_v35  ;;  %vm3253_vm2 = vcmp.ge.f32.partialorder %v3157_v33, 0.0  ;;  %v3269_v25 = vmul.f32 0.01, %v3157_v33  ;;  %v3158_v13 = vmul.f32 %v7952_v1, %v3142_v53  ;;  %v3119_v47 = vpop.permute.xlu0 %3118  ;;  %v7983_v44 = vld [vmem:[#allocation36_spill] sm:$0xff] }
 0xb43   :  { %v3159_v55 = vmul.f32 %v7952_v1, %v3143_v27  ;;  %v3144_v7 = vmul.f32 %v3119_v47, %v7978_v24 }
 0xb44   :  { %3316 = vst [vmem:[#allocation20 + $0xc8] sm:$0xff] %v3300_v46  ;;  %v3285_v38 = vsel %vm3253_vm2, %v3157_v33, %v3269_v25  ;;  %vm3254_vm3 = vcmp.ge.f32.partialorder %v3158_v13, 0.0  ;;  %v3270_v37 = vmul.f32 0.01, %v3158_v13  ;;  %v3124_v58 = vpop.permute.xlu1 %3123 }
 0xb45   :  { %v3301_v16 = vadd.f32 %v3285_v38, %v1751_v34  ;;  %vm3255_vm4 = vcmp.ge.f32.partialorder %v3159_v55, 0.0  ;;  %v3271_v51 = vmul.f32 0.01, %v3159_v55  ;;  %v3160_v43 = vmul.f32 %v7952_v1, %v3144_v7 }
 0xb46   :  { %v3286_v15 = vsel %vm3254_vm3, %v3158_v13, %v3270_v37  ;;  %v3145_v19 = vmul.f32 %v7979_v5, %v3124_v58  ;;  %v3129_v2 = vpop.permute.xlu0 %3128  ;;  %v7985_v13 = vld [vmem:[#allocation40_spill] sm:$0xff]  ;;  %v7987_v5 = vld [vmem:[#allocation41_spill] sm:$0xff] }
 0xb47   :  { %3317 = vst [vmem:[#allocation20 + $0xd0] sm:$0xff] %v3301_v16  ;;  %v3302_v8 = vadd.f32 %v3286_v15, %v1752_v22  ;;  %v3287_v52 = vsel %vm3255_vm4, %v3159_v55, %v3271_v51  ;;  %vm3256_vm5 = vcmp.ge.f32.partialorder %v3160_v43, 0.0  ;;  %v3272_v56 = vmul.f32 0.01, %v3160_v43 }
 0xb48   :  { %v3303_v0 = vadd.f32 %v3287_v52, %v1753_v31  ;;  %v3161_v18 = vmul.f32 %v7952_v1, %v3145_v19  ;;  %v3146_v3 = vmul.f32 %v7980_v28, %v3129_v2 }
 0xb49   :  { %3318 = vst [vmem:[#allocation20 + $0xd8] sm:$0xff] %v3302_v8  ;;  %v3288_v26 = vsel %vm3256_vm5, %v3160_v43, %v3272_v56  ;;  %v7986_v43 = vld [vmem:[#allocation38_spill] sm:$0xff] }
 0xb4a   :  { %3319 = vst [vmem:[#allocation20 + $0xe0] sm:$0xff] %v3303_v0  ;;  %v3304_v41 = vadd.f32 %v3288_v26, %v1754_v63  ;;  %vm3257_vm6 = vcmp.ge.f32.partialorder %v3161_v18, 0.0  ;;  %v3273_v30 = vmul.f32 0.01, %v3161_v18  ;;  %v3162_v62 = vmul.f32 %v7952_v1, %v3146_v3 }
 0xb4c   :  { %3320 = vst [vmem:[#allocation20 + $0xe8] sm:$0xff] %v3304_v41  ;;  %v3289_v11 = vsel %vm3257_vm6, %v3161_v18, %v3273_v30  ;;  %vm3258_vm7 = vcmp.ge.f32.partialorder %v3162_v62, 0.0  ;;  %v3274_v40 = vmul.f32 0.01, %v3162_v62  ;;  %v7988_v41 = vld [vmem:[#allocation39_spill] sm:$0xff]  ;;  %v7989_v30 = vld [vmem:[#allocation44_spill] sm:$0xff] }
 0xb4d   :  { %v3305_v23 = vadd.f32 %v3289_v11, %v1755_v59 }
 0xb4e   :  { %v3290_v6 = vsel %vm3258_vm7, %v3162_v62, %v3274_v40  ;;  %v7990_v40 = vld [vmem:[#allocation42_spill] sm:$0xff] }
 0xb4f   :  { %3321 = vst [vmem:[#allocation20 + $0xf0] sm:$0xff] %v3305_v23  ;;  %v3306_v50 = vadd.f32 %v3290_v6, %v1756_v60  ;;  %v7991_v6 = vld [vmem:[#allocation45_spill] sm:$0xff] }
 0xb51   :  { %3322 = vst [vmem:[#allocation20 + $0xf8] sm:$0xff] %v3306_v50 }
 0xbe5   :  { %v5042_v14 = vpop.f32.mrb[32].mxu0  ;;  %v5106_v20 = vpop.f32.mrb[32].mxu1 }
 0xbe6   :  { %v3921_v17 = vmul.f32 %v7981_v9, %v5042_v14  ;;  %v4036_v21 = vmul.f32 %v7981_v9, %v5106_v20  ;;  %v3598_v1 = vpop.f32.mrb[33].mxu0  ;;  %v3856_v57 = vpop.f32.mrb[33].mxu1  ;;  %v7992_v20 = vld [vmem:[#allocation43_spill] sm:$0xff] }
 0xbe7   :  { %v5043_v29 = vpop.f32.mrb[34].mxu0  ;;  %v5107_v61 = vpop.f32.mrb[34].mxu1  ;;  %v3919_v12 = vmul.f32 %v7982_v54, %v3598_v1  ;;  %v4034_v32 = vmul.f32 %v7982_v54, %v3856_v57  ;;  %v7994_v57 = vld [vmem:[#allocation46_spill] sm:$0xff] }
 0xbe8   :  { %4065 = vperm.xlu0 %5428, %v4036_v21   ;;  %v3859_v10 = vpop.f32.mrb[35].mxu1  ;;  %3950 = vperm.xlu1 %5427, %v3921_v17   ;;  %v3601_v4 = vpop.f32.mrb[35].mxu0  ;;  %v3922_v33 = vmul.f32 %v7983_v44, %v5043_v29  ;;  %v4037_v25 = vmul.f32 %v7983_v44, %v5107_v61  ;;  %v7993_v17 = vld [vmem:[#allocation48_spill] sm:$0xff] }
 0xbe9   :  { %v3920_v53 = vmul.f32 %v7984_v49, %v3601_v4  ;;  %v4035_v7 = vmul.f32 %v7984_v49, %v3859_v10  ;;  %v7995_v10 = vld [vmem:[#allocation49_spill] sm:$0xff]  ;;  %v7997_v49 = vld [vmem:[#allocation31_spill] sm:$0xff] }
 0xbea   :  { %vm3935_vm8 = vcmp.eq.s32.totalorder %v7997_v49, 0  ;;  %vm4050_vm9 = vcmp.eq.s32.totalorder %v7997_v49, 1 }
 0xbec   :  { %4055 = vperm.xlu0 %5428, %v4034_v32   ;;  %3940 = vperm.xlu1 %5427, %v3919_v12   ;;  %v7996_v12 = vld [vmem:[#allocation47_spill] sm:$0xff] }
 0xbed   :  { %v5046_v35 = vpop.f32.mrb[36].mxu0  ;;  %v5110_v48 = vpop.f32.mrb[36].mxu1 }
 0xbee   :  { %v3614_v42 = vpop.f32.mrb[37].mxu0  ;;  %v3872_v36 = vpop.f32.mrb[37].mxu1  ;;  %v3925_v47 = vmul.f32 %v7985_v13, %v5046_v35  ;;  %v4040_v38 = vmul.f32 %v7985_v13, %v5110_v48 }
 0xbef   :  { %v5047_v45 = vpop.f32.mrb[38].mxu0  ;;  %v5111_v27 = vpop.f32.mrb[38].mxu1  ;;  %v3923_v15 = vmul.f32 %v7986_v43, %v3614_v42  ;;  %v4038_v52 = vmul.f32 %v7986_v43, %v3872_v36 }
 0xbf0   :  { %v3875_v46 = vpop.f32.mrb[39].mxu1  ;;  %3955 = vperm.xlu1 %5427, %v3922_v33   ;;  %3945 = vperm.xlu0 %5428, %v3920_v53   ;;  %v3617_v34 = vpop.f32.mrb[39].mxu0  ;;  %v3926_v19 = vmul.f32 %v7987_v5, %v5047_v45  ;;  %v4041_v63 = vmul.f32 %v7987_v5, %v5111_v27  ;;  %v7998_v53 = vmov 0.0  }
 0xbf1   :  { %v3924_v59 = vmul.f32 %v7988_v41, %v3617_v34  ;;  %v4039_v11 = vmul.f32 %v7988_v41, %v3875_v46  ;;  %v7541_v42 = vsel %vm3935_vm8, 1.0, %v7998_v53  ;;  %v7544_v36 = vsel %vm4050_vm9, 1.0, %v7998_v53 }
 0xbf4   :  { %4070 = vperm.xlu1 %5427, %v4037_v25   ;;  %3970 = vperm.xlu0 %5428, %v3925_v47  }
 0xbf5   :  { %v5050_v55 = vpop.f32.mrb[40].mxu0  ;;  %v5114_v24 = vpop.f32.mrb[40].mxu1 }
 0xbf6   :  { %v3630_v22 = vpop.f32.mrb[41].mxu0  ;;  %v3888_v37 = vpop.f32.mrb[41].mxu1  ;;  %v3929_v62 = vmul.f32 %v7989_v30, %v5050_v55  ;;  %v4044_v60 = vmul.f32 %v7989_v30, %v5114_v24 }
 0xbf7   :  { %v5051_v58 = vpop.f32.mrb[42].mxu0  ;;  %v5115_v16 = vpop.f32.mrb[42].mxu1  ;;  %v3927_v23 = vmul.f32 %v7990_v40, %v3630_v22  ;;  %v4042_v39 = vmul.f32 %v7990_v40, %v3888_v37 }
 0xbf8   :  { %v3891_v31 = vpop.f32.mrb[43].mxu1  ;;  %4060 = vperm.xlu1 %5427, %v4035_v7   ;;  %4085 = vperm.xlu0 %5428, %v4040_v38   ;;  %v3633_v51 = vpop.f32.mrb[43].mxu0  ;;  %v3930_v50 = vmul.f32 %v7991_v6, %v5051_v58  ;;  %v4045_v14 = vmul.f32 %v7991_v6, %v5115_v16 }
 0xbf9   :  { %v3928_v9 = vmul.f32 %v7992_v20, %v3633_v51  ;;  %v4043_v1 = vmul.f32 %v7992_v20, %v3891_v31 }
 0xbfc   :  { %3960 = vperm.xlu0 %5428, %v3923_v15   ;;  %3975 = vperm.xlu1 %5427, %v3926_v19  }
 0xbfd   :  { %v5054_v2 = vpop.f32.mrb[44].mxu0  ;;  %v5118_v8 = vpop.f32.mrb[44].mxu1 }
 0xbfe   :  { %v3646_v56 = vpop.f32.mrb[45].mxu0  ;;  %v3904_v0 = vpop.f32.mrb[45].mxu1  ;;  %v3933_v21 = vmul.f32 %v7993_v17, %v5054_v2  ;;  %v4048_v61 = vmul.f32 %v7993_v17, %v5118_v8 }
 0xbff   :  { %v5055_v18 = vpop.f32.mrb[46].mxu0  ;;  %v5119_v28 = vpop.f32.mrb[46].mxu1  ;;  %v3931_v29 = vmul.f32 %v7994_v57, %v3646_v56  ;;  %v4046_v54 = vmul.f32 %v7994_v57, %v3904_v0 }
 0xc00   :  { %v3907_v3 = vpop.f32.mrb[47].mxu1  ;;  %4075 = vperm.xlu0 %5428, %v4038_v52   ;;  %4090 = vperm.xlu1 %5427, %v4041_v63   ;;  %v3649_v26 = vpop.f32.mrb[47].mxu0  ;;  %v3934_v4 = vmul.f32 %v7995_v10, %v5055_v18  ;;  %v4049_v48 = vmul.f32 %v7995_v10, %v5119_v28 }
 0xc01   :  { %v3932_v32 = vmul.f32 %v7996_v12, %v3649_v26  ;;  %v4047_v35 = vmul.f32 %v7996_v12, %v3907_v3 }
 0xc04   :  { %3965 = vperm.xlu1 %5427, %v3924_v59   ;;  %3990 = vperm.xlu0 %5428, %v3929_v62  }
 0xc08   :  { %4080 = vperm.xlu1 %5427, %v4039_v11   ;;  %4105 = vperm.xlu0 %5428, %v4044_v60  }
 0xc0c   :  { %3980 = vperm.xlu0 %5428, %v3927_v23   ;;  %3995 = vperm.xlu1 %5427, %v3930_v50  }
 0xc10   :  { %4095 = vperm.xlu0 %5428, %v4042_v39   ;;  %4110 = vperm.xlu1 %5427, %v4045_v14  }
 0xc14   :  { %3985 = vperm.xlu1 %5427, %v3928_v9   ;;  %4010 = vperm.xlu0 %5428, %v3933_v21  }
 0xc18   :  { %4100 = vperm.xlu1 %5427, %v4043_v1   ;;  %4000 = vperm.xlu0 %5428, %v3931_v29  }
 0xc1c   :  { %4125 = vperm.xlu1 %5427, %v4048_v61   ;;  %4015 = vperm.xlu0 %5428, %v3934_v4  }
 0xc20   :  { %4115 = vperm.xlu1 %5427, %v4046_v54   ;;  %4005 = vperm.xlu0 %5428, %v3932_v32  }
 0xc24   :  { %4120 = vperm.xlu1 %5427, %v4047_v35  }
 0xc28   :  { %4130 = vperm.xlu1 %5427, %v4049_v48  }
 0xc67   :  { %v3951_v44 = vpop.permute.xlu1 %3950  ;;  %v4066_v33 = vpop.permute.xlu0 %4065 }
 0xc68   :  { %v4020_v58 = vmul.f32 %v7541_v42, %v3951_v44  ;;  %v4135_v16 = vmul.f32 %v7544_v36, %v4066_v33 }
 0xc6b   :  { %v3941_v45 = vpop.permute.xlu1 %3940  ;;  %v4056_v27 = vpop.permute.xlu0 %4055 }
 0xc6c   :  { %v4018_v46 = vmul.f32 %v7541_v42, %v3941_v45  ;;  %v4133_v34 = vmul.f32 %v7544_v36, %v4056_v27 }
 0xc6e   :  { %v4149_v25 = vadd.f32 %v4133_v34, %v4018_v46 }
 0xc6f   :  { %v3956_v13 = vpop.permute.xlu1 %3955  ;;  %v3946_v47 = vpop.permute.xlu0 %3945 }
 0xc70   :  { %4165 = vxpose.xlu0.b32.start [1/16] (narrow) %v4149_v25, 8  ;;  %v4019_v22 = vmul.f32 %v7541_v42, %v3946_v47 }
 0xc73   :  { %v4071_v55 = vpop.permute.xlu1 %4070  ;;  %v3971_v24 = vpop.permute.xlu0 %3970 }
 0xc77   :  { %v4061_v7 = vpop.permute.xlu1 %4060  ;;  %v4086_v38 = vpop.permute.xlu0 %4085 }
 0xc78   :  { %v4134_v37 = vmul.f32 %v7544_v36, %v4061_v7 }
 0xc7a   :  { %v4150_v31 = vadd.f32 %v4134_v37, %v4019_v22 }
 0xc7b   :  { %v3976_v51 = vpop.permute.xlu1 %3975  ;;  %v3961_v43 = vpop.permute.xlu0 %3960 }
 0xc7c   :  { %5812 = shalt.err (!%p5809_p1)
}
 0xc7d   :  { %s5813_s5 = scalar_lea.hbm %s7617_s12, 4096 }
 0xc7e   :  { %p5814_p2 = scmp.ne.s32.totalorder %s7617_s12, %s5813_s5  ;;  %p5817_p3 = scmp.lt.u32.totalorder %s5813_s5, %s7617_s12 }
 0xc80   :  { %p5819_p4 = pnand %p5817_p3, %p5814_p2 }
 0xc82   :  { %5822 = shalt.err (!%p5819_p4)
}
 0xc83   :  { %4209 = dma.vmem_to_hbm [thread:$0]  %s4204_s25, 4096, %s7617_s12, [#allocation5], %s5870_s18, %s5870_s18, %s5871_s19   ;;  %4166 = vxpose.xlu0.b32.cont [2/16] (narrow) %v4150_v31, 8  ;;  %v4151_v15 = vadd.f32 %v4135_v16, %v4020_v58  ;;  %v4136_v5 = vmul.f32 %v7544_v36, %v4071_v55  ;;  %v4091_v19 = vpop.permute.xlu1 %4090  ;;  %v4076_v2 = vpop.permute.xlu0 %4075  ;;  %v4021_v8 = vmul.f32 %v7541_v42, %v3956_v13  ;;  %v4022_v18 = vmul.f32 %v7541_v42, %v3961_v43 }
 0xc84   :  { %v4137_v63 = vmul.f32 %v7544_v36, %v4076_v2  ;;  %v4139_v30 = vmul.f32 %v7544_v36, %v4086_v38  ;;  %v4024_v40 = vmul.f32 %v7541_v42, %v3971_v24  ;;  %v4140_v6 = vmul.f32 %v7544_v36, %v4091_v19  ;;  %s5891_s12 = smov [#allocation21]  }
 0xc85   :  { %v4152_v52 = vadd.f32 %v4136_v5, %v4021_v8  ;;  %v4025_v14 = vmul.f32 %v7541_v42, %v3976_v51  ;;  %s4216_s18 = sshll.u32 %s5891_s12, 4  ;;  %s4217_s18 = int_to_ptr.vmem [resolvable:$true] %s4216_s18 }
 0xc86   :  { %v4153_v28 = vadd.f32 %v4137_v63, %v4022_v18  ;;  %v4155_v23 = vadd.f32 %v4139_v30, %v4024_v40  ;;  %s5823_s19 = scalar_lea.vmem %s4217_s18, 32  ;;  %p5828_p6 = scmp.lt.s32.totalorder %s4217_s18, %s4217_s18 }
 0xc87   :  { %4167 = vxpose.xlu0.b32.cont [3/16] (narrow) %v4151_v15, 8  ;;  %v3966_v56 = vpop.permute.xlu1 %3965  ;;  %v3991_v0 = vpop.permute.xlu0 %3990  ;;  %v4156_v20 = vadd.f32 %v4140_v6, %v4025_v14  ;;  %p5824_p5 = scmp.ne.s32.totalorder %s4217_s18, %s5823_s19  ;;  %p5829_p7 = scmp.lt.s32.totalorder %s5823_s19, %s5823_s19 }
 0xc88   :  { %v4023_v41 = vmul.f32 %v7541_v42, %v3966_v56  ;;  %v4028_v35 = vmul.f32 %v7541_v42, %v3991_v0 }
 0xc89   :  { %p5830_p8 = por %p5829_p7, %p5828_p6 }
 0xc8b   :  { %4168 = vxpose.xlu0.b32.cont [4/16] (narrow) %v4152_v52, 8  ;;  %v4081_v3 = vpop.permute.xlu1 %4080  ;;  %v4106_v26 = vpop.permute.xlu0 %4105  ;;  %p5831_p9 = pnand %p5830_p8, %p5824_p5 }
 0xc8c   :  { %v4138_v59 = vmul.f32 %v7544_v36, %v4081_v3  ;;  %v4143_v54 = vmul.f32 %v7544_v36, %v4106_v26 }
 0xc8e   :  { %v4154_v62 = vadd.f32 %v4138_v59, %v4023_v41  ;;  %v4159_v33 = vadd.f32 %v4143_v54, %v4028_v35 }
 0xc8f   :  { %4169 = vxpose.xlu0.b32.cont [5/16] (narrow) %v4153_v28, 8  ;;  %v3996_v11 = vpop.permute.xlu1 %3995  ;;  %v3981_v60 = vpop.permute.xlu0 %3980 }
 0xc90   :  { %v4026_v1 = vmul.f32 %v7541_v42, %v3981_v60  ;;  %v4029_v46 = vmul.f32 %v7541_v42, %v3996_v11 }
 0xc93   :  { %4170 = vxpose.xlu0.b32.cont [6/16] (narrow) %v4154_v62, 8  ;;  %v4111_v50 = vpop.permute.xlu1 %4110  ;;  %v4096_v39 = vpop.permute.xlu0 %4095 }
 0xc94   :  { %v4141_v9 = vmul.f32 %v7544_v36, %v4096_v39  ;;  %v4144_v49 = vmul.f32 %v7544_v36, %v4111_v50 }
 0xc96   :  { %v4157_v57 = vadd.f32 %v4141_v9, %v4026_v1  ;;  %v4160_v34 = vadd.f32 %v4144_v49, %v4029_v46 }
 0xc97   :  { %4171 = vxpose.xlu0.b32.cont [7/16] (narrow) %v4155_v23, 8  ;;  %v3986_v17 = vpop.permute.xlu1 %3985  ;;  %v4011_v21 = vpop.permute.xlu0 %4010 }
 0xc98   :  { %v4027_v61 = vmul.f32 %v7541_v42, %v3986_v17  ;;  %v4032_v48 = vmul.f32 %v7541_v42, %v4011_v21 }
 0xc9b   :  { %4172 = vxpose.xlu0.b32.cont [8/16] (narrow) %v4156_v20, 8  ;;  %v4101_v29 = vpop.permute.xlu1 %4100  ;;  %v4001_v4 = vpop.permute.xlu0 %4000 }
 0xc9c   :  { %v4142_v10 = vmul.f32 %v7544_v36, %v4101_v29  ;;  %v4030_v47 = vmul.f32 %v7541_v42, %v4001_v4 }
 0xc9e   :  { %v4158_v12 = vadd.f32 %v4142_v10, %v4027_v61 }
 0xc9f   :  { %4173 = vxpose.xlu0.b32.cont [9/16] (narrow) %v4157_v57, 8  ;;  %v4126_v32 = vpop.permute.xlu1 %4125  ;;  %v4016_v45 = vpop.permute.xlu0 %4015 }
 0xca0   :  { %v4147_v44 = vmul.f32 %v7544_v36, %v4126_v32  ;;  %v4033_v22 = vmul.f32 %v7541_v42, %v4016_v45 }
 0xca2   :  { %v4163_v53 = vadd.f32 %v4147_v44, %v4032_v48 }
 0xca3   :  { %4174 = vxpose.xlu0.b32.cont [10/16] (narrow) %v4158_v12, 8  ;;  %v4116_v27 = vpop.permute.xlu1 %4115  ;;  %v4006_v55 = vpop.permute.xlu0 %4005 }
 0xca4   :  { %v4145_v25 = vmul.f32 %v7544_v36, %v4116_v27  ;;  %v4031_v37 = vmul.f32 %v7541_v42, %v4006_v55 }
 0xca6   :  { %v4161_v24 = vadd.f32 %v4145_v25, %v4030_v47 }
 0xca7   :  { %4175 = vxpose.xlu0.b32.cont [11/16] (narrow) %v4159_v33, 8  ;;  %v4121_v13 = vpop.permute.xlu1 %4120 }
 0xca8   :  { %v4146_v7 = vmul.f32 %v7544_v36, %v4121_v13 }
 0xcaa   :  { %v4162_v16 = vadd.f32 %v4146_v7, %v4031_v37 }
 0xcab   :  { %4176 = vxpose.xlu0.b32.cont [12/16] (narrow) %v4160_v34, 8  ;;  %v4131_v38 = vpop.permute.xlu1 %4130 }
 0xcac   :  { %v4148_v58 = vmul.f32 %v7544_v36, %v4131_v38 }
 0xcae   :  { %v4164_v31 = vadd.f32 %v4148_v58, %v4033_v22 }
 0xcaf   :  { %4177 = vxpose.xlu0.b32.cont [13/16] (narrow) %v4161_v24, 8 }
 0xcb3   :  { %4178 = vxpose.xlu0.b32.cont [14/16] (narrow) %v4162_v16, 8 }
 0xcb7   :  { %4179 = vxpose.xlu0.b32.cont [15/16] (narrow) %v4163_v53, 8 }
 0xcbb   :  { %4180 = vxpose.xlu0.b32.end [16/16] (narrow) %v4164_v31, 8 }
 0xcff   :  { %v4181_v51 = vpop.trf.xlu0 }
 0xd00   :  { %4197 = vst [vmem:[#allocation21] sm:$0x3] %v4181_v51 }
 0xd01   :  { %5834 = shalt.err (!%p5831_p9)
}
 0xd02   :  { %s5835_s28 = scalar_lea.hbm %s7618_s13, 32 }
 0xd03   :  { %p5836_p10 = scmp.ne.s32.totalorder %s7618_s13, %s5835_s28  ;;  %p5839_p11 = scmp.lt.u32.totalorder %s5835_s28, %s7618_s13 }
 0xd05   :  { %p5841_p12 = pnand %p5839_p11, %p5836_p10 }
 0xd07   :  { %5844 = shalt.err (!%p5841_p12)
}
 0xd08   :  { %4219 = dma.vmem_to_hbm [thread:$0]  %s4217_s18, 32, %s7618_s13, [#allocation22]  }
 0xd09   :  { %5861 = dma.done.wait [#allocation5], 4096  }
 0xd0a   :  { %5862 = vsyncadd [#allocation5], 4294963200 }
 0xd0b   :  { %5863 = dma.done.wait [#allocation22], 32  }
 0xd0c   :  { %5864 = vsyncadd [#allocation22], 4294967264 }
 0xd0d   :  { %4226 = vsyncpa [#allocation4], 1 }
 0xd0e   :  { %4227 = vsyncpa [#allocation7], 1 }
 0xd0f   :  { %4228 = vsyncpa [#allocation10], 1 }
 0xd10   :  { %4229 = vsyncpa [#allocation13], 1 }
 0xd11   :  { %4230 = vsyncpa [#allocation16], 1 }
 0xd12   :  { %4231 = vsyncpa [#allocation19], 1 }
 0xd13   :  { %4232 = vsyncpa [#allocation5], 1 }
 0xd14   :  { %4233 = vsyncpa [#allocation22], 1 }

</bundles_post_ra>
